<compile_context>
chip_gen: v7x
topology: tpu7x:2x2x1
jax: 0.10.0
libtpu: 0.0.40
codegen_flags: <defaults>
</compile_context>

<pallas_src>
import functools

import jax
import jax.numpy as jnp
from jax import lax
from jax.experimental import pallas as pl
from jax.experimental.pallas import tpu as pltpu


def _round_up(x, m):
    return (x + m - 1) // m * m


def edge_detection_kernel(x_ref, w1_ref, b1_ref, w2_ref, b2_ref, w3_ref, b3_ref,
                          w4_ref, b4_ref, o_ref, ypad_ref, zpad_ref, patch_ref,
                          *, h, w, pad):
    hw = h * w
    f32 = jnp.float32
    cm = ypad_ref.shape[0]

    # Zero only the two lane-halo strips of the staging buffers (128-aligned,
    # full-lane stores; the interiors are fully overwritten every step).  This
    # is done every grid step rather than once under pl.when(program_id == 0)
    # so the kernel stays correct when the "parallel" batch axis is split
    # across TensorCores, each of which owns its own scratch instance.
    halo = jnp.zeros((cm, pad), f32)
    ypad_ref[:, 0:pad] = halo
    ypad_ref[:, pad + hw:pad + hw + pad] = halo
    zpad_ref[:, 0:pad] = halo
    zpad_ref[:, pad + hw:pad + hw + pad] = halo

    # Column masks for the horizontal image borders (the flat-index zero halo
    # already takes care of the vertical borders).  Hoisted: built once and
    # reused by all three convs.
    col = lax.broadcasted_iota(jnp.int32, (1, hw), 1) % w
    not_left = (col > 0).astype(f32)          # kills (x-1) taps at x == 0
    not_right = (col < (w - 1)).astype(f32)   # kills (x+1) taps at x == W-1

    def leaky(v, alpha):
        return jnp.where(v >= 0, v, alpha * v)

    def conv3x3(src_ref, w_r, b_r):
        # src_ref: (C, hw + 2*pad) with zero halos; image interior at
        # [pad, pad + hw).  Build the (9*C, hw) im2col patch matrix in scratch
        # (aligned sublane-offset stores), then one fused MXU dot.
        c = src_ref.shape[0]
        t = 0
        for dy in (-1, 0, 1):
            for dx in (-1, 0, 1):
                k = dy * w + dx
                s = src_ref[:, pad + k:pad + k + hw]
                if dx == -1:
                    s = s * not_left
                elif dx == 1:
                    s = s * not_right
                patch_ref[t * c:(t + 1) * c, :] = s
                t += 1
        acc = jnp.dot(w_r[...], patch_ref[0:9 * c, :],
                      preferred_element_type=f32,
                      precision=lax.Precision.HIGHEST)
        return acc + b_r[...]                 # bias (Cout, 1) broadcasts over lanes

    # --- proj: conv3x3 + LeakyReLU(0.2) ---
    y = leaky(conv3x3(x_ref, w1_ref, b1_ref), 0.2)            # (cm, hw)
    ypad_ref[:, pad:pad + hw] = y

    # --- ResUnit body conv1: conv3x3 + LeakyReLU(0.2) ---
    z = leaky(conv3x3(ypad_ref, w2_ref, b2_ref), 0.2)         # (cm, hw)
    zpad_ref[:, pad:pad + hw] = z

    # --- ResUnit body conv2 (no act), residual add, LeakyReLU(0.01) ---
    r = conv3x3(zpad_ref, w3_ref, b3_ref)                     # (cm, hw)
    r = leaky(y + r, 0.01)

    # --- out_conv (1x1) + sigmoid ---
    o = jnp.dot(w4_ref[...], r, preferred_element_type=f32,
                precision=lax.Precision.HIGHEST) + b4_ref[...]  # (cout, hw)
    o_ref[...] = jax.nn.sigmoid(o).astype(o_ref.dtype)


def _pack_w3x3(w_hwio, cin_pad):
    """(3,3,Cin,Cout) HWIO -> (Cout, 9*cin_pad), tap-major / channel-minor."""
    kh, kw, ci, co = w_hwio.shape
    if ci < cin_pad:
        w_hwio = jnp.pad(w_hwio, ((0, 0), (0, 0), (0, cin_pad - ci), (0, 0)))
    return jnp.transpose(w_hwio.reshape(kh * kw * cin_pad, co), (1, 0))


def edge_detection(x_nchw, params):
    """x_nchw: (N, Cin, H, W) float32 (PyTorch layout). Returns (N, Cout, H, W)."""
    w1, b1, w2, b2, w3, b3, w4, b4 = params
    n, cin, h, w = x_nchw.shape
    cm = w1.shape[-1]
    cout = w4.shape[-1]
    hw = h * w
    cin_p = _round_up(cin, 8)        # pad tiny Cin up to a full sublane tile
    pad = _round_up(w + 1, 128)      # 128-aligned lane halo (>= one image row + 1)
    hwp = hw + 2 * pad

    # Flatten NCHW -> (N, C, H*W) (free metadata reshape) and add the zero lane
    # halo + channel padding once in the wrapper (glue).
    x = x_nchw.reshape(n, cin, hw)
    x = jnp.pad(x, ((0, 0), (0, cin_p - cin), (pad, pad)))

    # Re-pack weights/biases for the transposed im2col matmuls (glue).
    w1m = _pack_w3x3(w1, cin_p)                 # (cm, 9*cin_p)
    w2m = _pack_w3x3(w2, cm)                    # (cm, 9*cm)
    w3m = _pack_w3x3(w3, cm)                    # (cm, 9*cm)
    w4m = jnp.transpose(w4, (1, 0))             # (cout, cm)
    b1m = b1.reshape(cm, 1)
    b2m = b2.reshape(cm, 1)
    b3m = b3.reshape(cm, 1)
    b4m = b4.reshape(cout, 1)

    kern = functools.partial(edge_detection_kernel, h=h, w=w, pad=pad)

    # NOTE: for realistic ProPainter frame sizes, add a second (row-block) grid
    # axis with a small halo per conv so per-step VMEM stays bounded on v7x;
    # the demo frames here fit comfortably per step.
    out = pl.pallas_call(
        kern,
        out_shape=jax.ShapeDtypeStruct((n, cout, hw), jnp.float32),
        grid_spec=pltpu.PrefetchScalarGridSpec(
            num_scalar_prefetch=0,
            grid=(n,),
            in_specs=[
                pl.BlockSpec((None, cin_p, hwp), lambda i: (i, 0, 0)),
                pl.BlockSpec((cm, 9 * cin_p), lambda i: (0, 0)),
                pl.BlockSpec((cm, 1), lambda i: (0, 0)),
                pl.BlockSpec((cm, 9 * cm), lambda i: (0, 0)),
                pl.BlockSpec((cm, 1), lambda i: (0, 0)),
                pl.BlockSpec((cm, 9 * cm), lambda i: (0, 0)),
                pl.BlockSpec((cm, 1), lambda i: (0, 0)),
                pl.BlockSpec((cout, cm), lambda i: (0, 0)),
                pl.BlockSpec((cout, 1), lambda i: (0, 0)),
            ],
            out_specs=pl.BlockSpec((None, cout, hw), lambda i: (i, 0, 0)),
            scratch_shapes=[
                pltpu.VMEM((cm, hwp), jnp.float32),      # halo-padded y
                pltpu.VMEM((cm, hwp), jnp.float32),      # halo-padded z
                pltpu.VMEM((9 * cm, hw), jnp.float32),   # im2col patch matrix
            ],
        ),
        compiler_params=pltpu.CompilerParams(
            dimension_semantics=("parallel",)),
    )(x, w1m, b1m, w2m, b2m, w3m, b3m, w4m, b4m)

    return out.reshape(n, cout, h, w)           # already NCHW; free reshape


def edge_detection_ref(x_nchw, params):
    """Plain-JAX reference (mirrors the PyTorch forward), NCHW throughout."""
    w1, b1, w2, b2, w3, b3, w4, b4 = params
    dn = ("NCHW", "HWIO", "NCHW")

    def conv3(a, wk, bk):
        return lax.conv_general_dilated(
            a, wk, (1, 1), "SAME", dimension_numbers=dn,
            precision=lax.Precision.HIGHEST) + bk.reshape(1, -1, 1, 1)

    y = conv3(x_nchw, w1, b1)
    y = jnp.where(y >= 0, y, 0.2 * y)
    z = conv3(y, w2, b2)
    z = jnp.where(z >= 0, z, 0.2 * z)
    r = conv3(z, w3, b3)
    r = y + r
    r = jnp.where(r >= 0, r, 0.01 * r)
    o = jnp.einsum("nchw,cd->ndhw", r, w4,
                   precision=lax.Precision.HIGHEST) + b4.reshape(1, -1, 1, 1)
    return jax.nn.sigmoid(o)


def init_params(key, cin, cm, cout):
    ks = jax.random.split(key, 8)
    w1 = jax.random.normal(ks[0], (3, 3, cin, cm), jnp.float32) * 0.1
    b1 = jax.random.normal(ks[1], (1, cm), jnp.float32) * 0.01
    w2 = jax.random.normal(ks[2], (3, 3, cm, cm), jnp.float32) * 0.1
    b2 = jax.random.normal(ks[3], (1, cm), jnp.float32) * 0.01
    w3 = jax.random.normal(ks[4], (3, 3, cm, cm), jnp.float32) * 0.1
    b3 = jax.random.normal(ks[5], (1, cm), jnp.float32) * 0.01
    w4 = jax.random.normal(ks[6], (cm, cout), jnp.float32) * 0.1
    b4 = jax.random.normal(ks[7], (1, cout), jnp.float32) * 0.01
    return (w1, b1, w2, b2, w3, b3, w4, b4)


if __name__ == "__main__":
    # Small shapes consistent with the module's use in propainter_rfc
    # (activation=LeakyReLU(0.2), final_activation=LeakyReLU(0.01)).
    N, Cin, Cm, Cout, H, W = 2, 4, 16, 1, 16, 16

    key = jax.random.PRNGKey(0)
    pkey, xkey = jax.random.split(key)
    params = init_params(pkey, Cin, Cm, Cout)
    x = jax.random.normal(xkey, (N, Cin, H, W), jnp.float32)

    out = jax.jit(edge_detection)(x, params)
    out = jax.block_until_ready(out)

    ref = edge_detection_ref(x, params)
    assert out.shape == (N, Cout, H, W), out.shape
    assert jnp.allclose(out, ref, rtol=1e-3, atol=1e-3), float(
        jnp.max(jnp.abs(out - ref)))

    print("KERNEL_OK")
</pallas_src>

<mosaic_0001>
module attributes {stable_mosaic.version = 11 : i64} {
  func.func @edge_detection_kernel(%arg0: i32, %arg1: memref<1x8x512xf32, #tpu.memory_space<vmem>>, %arg2: memref<16x72xf32, #tpu.memory_space<vmem>>, %arg3: memref<16x1xf32, #tpu.memory_space<vmem>>, %arg4: memref<16x144xf32, #tpu.memory_space<vmem>>, %arg5: memref<16x1xf32, #tpu.memory_space<vmem>>, %arg6: memref<16x144xf32, #tpu.memory_space<vmem>>, %arg7: memref<16x1xf32, #tpu.memory_space<vmem>>, %arg8: memref<1x16xf32, #tpu.memory_space<vmem>>, %arg9: memref<1x1xf32, #tpu.memory_space<vmem>>, %arg10: memref<1x1x256xf32, #tpu.memory_space<vmem>>, %arg11: memref<16x512xf32, #tpu.memory_space<vmem>>, %arg12: memref<16x512xf32, #tpu.memory_space<vmem>>, %arg13: memref<144x256xf32, #tpu.memory_space<vmem>>) attributes {dimension_semantics = [#tpu.dimension_semantics<parallel>], iteration_bounds = array<i64: 2>, scalar_prefetch = 0 : i64, scratch_operands = 3 : i64, tpu.core_type = #tpu.core_type<tc>, window_params = [{transform_indices = @transform_0, window_bounds = array<i64: 1, 8, 512>}, {pipeline_mode = #tpu.pipeline_mode<synchronous>, transform_indices = @transform_1, window_bounds = array<i64: 16, 72>}, {pipeline_mode = #tpu.pipeline_mode<synchronous>, transform_indices = @transform_2, window_bounds = array<i64: 16, 1>}, {pipeline_mode = #tpu.pipeline_mode<synchronous>, transform_indices = @transform_3, window_bounds = array<i64: 16, 144>}, {pipeline_mode = #tpu.pipeline_mode<synchronous>, transform_indices = @transform_4, window_bounds = array<i64: 16, 1>}, {pipeline_mode = #tpu.pipeline_mode<synchronous>, transform_indices = @transform_5, window_bounds = array<i64: 16, 144>}, {pipeline_mode = #tpu.pipeline_mode<synchronous>, transform_indices = @transform_6, window_bounds = array<i64: 16, 1>}, {pipeline_mode = #tpu.pipeline_mode<synchronous>, transform_indices = @transform_7, window_bounds = array<i64: 1, 16>}, {pipeline_mode = #tpu.pipeline_mode<synchronous>, transform_indices = @transform_8, window_bounds = array<i64: 1, 1>}, {transform_indices = @transform_9, window_bounds = array<i64: 1, 1, 256>}]} {
    %cst = arith.constant 0.000000e+00 : f32
    %0 = vector.broadcast %cst : f32 to vector<16x128xf32>
    %c0 = arith.constant 0 : index
    %c0_0 = arith.constant 0 : index
    %1 = vector.load %arg11[%c0, %c0_0] : memref<16x512xf32, #tpu.memory_space<vmem>>, vector<16x128xf32>
    tpu.vector_store %arg11[%c0, %c0_0], %0 {strides = array<i32>} : memref<16x512xf32, #tpu.memory_space<vmem>>, vector<16x128xf32>,
    %c0_1 = arith.constant 0 : index
    %c384 = arith.constant 384 : index
    %2 = vector.load %arg11[%c0_1, %c384] : memref<16x512xf32, #tpu.memory_space<vmem>>, vector<16x128xf32>
    tpu.vector_store %arg11[%c0_1, %c384], %0 {strides = array<i32>} : memref<16x512xf32, #tpu.memory_space<vmem>>, vector<16x128xf32>,
    %c0_2 = arith.constant 0 : index
    %c0_3 = arith.constant 0 : index
    %3 = vector.load %arg12[%c0_2, %c0_3] : memref<16x512xf32, #tpu.memory_space<vmem>>, vector<16x128xf32>
    tpu.vector_store %arg12[%c0_2, %c0_3], %0 {strides = array<i32>} : memref<16x512xf32, #tpu.memory_space<vmem>>, vector<16x128xf32>,
    %c0_4 = arith.constant 0 : index
    %c384_5 = arith.constant 384 : index
    %4 = vector.load %arg12[%c0_4, %c384_5] : memref<16x512xf32, #tpu.memory_space<vmem>>, vector<16x128xf32>
    tpu.vector_store %arg12[%c0_4, %c384_5], %0 {strides = array<i32>} : memref<16x512xf32, #tpu.memory_space<vmem>>, vector<16x128xf32>,
    %5 = tpu.iota {dimensions = array<i32: 1>} : vector<1x256xi32>
    %c16_i32 = arith.constant 16 : i32
    %c0_i32 = arith.constant 0 : i32
    %6 = arith.cmpi eq, %c16_i32, %c0_i32 : i32
    %c1_i32 = arith.constant 1 : i32
    %7 = arith.select %6, %c1_i32, %c16_i32 : i32
    %8 = vector.broadcast %7 : i32 to vector<1x256xi32>
    %9 = arith.remsi %5, %8 : vector<1x256xi32>
    %c0_i32_6 = arith.constant 0 : i32
    %10 = vector.broadcast %c0_i32_6 : i32 to vector<1x256xi32>
    %11 = arith.cmpi ne, %9, %10 : vector<1x256xi32>
    %c0_i32_7 = arith.constant 0 : i32
    %12 = vector.broadcast %c0_i32_7 : i32 to vector<1x256xi32>
    %13 = arith.cmpi slt, %9, %12 : vector<1x256xi32>
    %c0_i32_8 = arith.constant 0 : i32
    %14 = arith.cmpi slt, %7, %c0_i32_8 : i32
    %15 = vector.broadcast %14 : i1 to vector<1x256xi1>
    %16 = vector.broadcast %15 : vector<1x256xi1> to vector<1x256xi1>
    %17 = arith.xori %13, %16 : vector<1x256xi1>
    %18 = arith.andi %17, %11 : vector<1x256xi1>
    %19 = vector.broadcast %7 : i32 to vector<1x256xi32>
    %20 = arith.addi %9, %19 : vector<1x256xi32>
    %21 = arith.select %18, %20, %9 : vector<1x256xi1>, vector<1x256xi32>
    %c0_i32_9 = arith.constant 0 : i32
    %22 = vector.broadcast %c0_i32_9 : i32 to vector<1x256xi32>
    %23 = arith.cmpi sgt, %21, %22 : vector<1x256xi32>
    %24 = arith.extui %23 : vector<1x256xi1> to vector<1x256xi32>
    %25 = arith.sitofp %24 : vector<1x256xi32> to vector<1x256xf32>
    %c15_i32 = arith.constant 15 : i32
    %26 = vector.broadcast %c15_i32 : i32 to vector<1x256xi32>
    %27 = arith.cmpi slt, %21, %26 : vector<1x256xi32>
    %28 = arith.extui %27 : vector<1x256xi1> to vector<1x256xi32>
    %29 = arith.sitofp %28 : vector<1x256xi32> to vector<1x256xf32>
    %c0_10 = arith.constant 0 : index
    %c0_11 = arith.constant 0 : index
    %c111 = arith.constant 111 : index
    %30 = vector.load %arg1[%c0_10, %c0_11, %c111] : memref<1x8x512xf32, #tpu.memory_space<vmem>>, vector<1x8x256xf32>
    %31 = vector.shape_cast %30 : vector<1x8x256xf32> to vector<8x256xf32>
    %32 = vector.broadcast %25 : vector<1x256xf32> to vector<8x256xf32>
    %33 = arith.mulf %31, %32 : vector<8x256xf32>
    %c0_12 = arith.constant 0 : index
    %c0_13 = arith.constant 0 : index
    %34 = vector.load %arg13[%c0_12, %c0_13] : memref<144x256xf32, #tpu.memory_space<vmem>>, vector<8x256xf32>
    tpu.vector_store %arg13[%c0_12, %c0_13], %33 {strides = array<i32>} : memref<144x256xf32, #tpu.memory_space<vmem>>, vector<8x256xf32>,
    %c0_14 = arith.constant 0 : index
    %c0_15 = arith.constant 0 : index
    %c112 = arith.constant 112 : index
    %35 = vector.load %arg1[%c0_14, %c0_15, %c112] : memref<1x8x512xf32, #tpu.memory_space<vmem>>, vector<1x8x256xf32>
    %36 = vector.shape_cast %35 : vector<1x8x256xf32> to vector<8x256xf32>
    %c8 = arith.constant 8 : index
    %c0_16 = arith.constant 0 : index
    %37 = vector.load %arg13[%c8, %c0_16] : memref<144x256xf32, #tpu.memory_space<vmem>>, vector<8x256xf32>
    tpu.vector_store %arg13[%c8, %c0_16], %36 {strides = array<i32>} : memref<144x256xf32, #tpu.memory_space<vmem>>, vector<8x256xf32>,
    %c0_17 = arith.constant 0 : index
    %c0_18 = arith.constant 0 : index
    %c113 = arith.constant 113 : index
    %38 = vector.load %arg1[%c0_17, %c0_18, %c113] : memref<1x8x512xf32, #tpu.memory_space<vmem>>, vector<1x8x256xf32>
    %39 = vector.shape_cast %38 : vector<1x8x256xf32> to vector<8x256xf32>
    %40 = vector.broadcast %29 : vector<1x256xf32> to vector<8x256xf32>
    %41 = arith.mulf %39, %40 : vector<8x256xf32>
    %c16 = arith.constant 16 : index
    %c0_19 = arith.constant 0 : index
    %42 = vector.load %arg13[%c16, %c0_19] : memref<144x256xf32, #tpu.memory_space<vmem>>, vector<8x256xf32>
    tpu.vector_store %arg13[%c16, %c0_19], %41 {strides = array<i32>} : memref<144x256xf32, #tpu.memory_space<vmem>>, vector<8x256xf32>,
    %c0_20 = arith.constant 0 : index
    %c0_21 = arith.constant 0 : index
    %c127 = arith.constant 127 : index
    %43 = vector.load %arg1[%c0_20, %c0_21, %c127] : memref<1x8x512xf32, #tpu.memory_space<vmem>>, vector<1x8x256xf32>
    %44 = vector.shape_cast %43 : vector<1x8x256xf32> to vector<8x256xf32>
    %45 = vector.broadcast %25 : vector<1x256xf32> to vector<8x256xf32>
    %46 = arith.mulf %44, %45 : vector<8x256xf32>
    %c24 = arith.constant 24 : index
    %c0_22 = arith.constant 0 : index
    %47 = vector.load %arg13[%c24, %c0_22] : memref<144x256xf32, #tpu.memory_space<vmem>>, vector<8x256xf32>
    tpu.vector_store %arg13[%c24, %c0_22], %46 {strides = array<i32>} : memref<144x256xf32, #tpu.memory_space<vmem>>, vector<8x256xf32>,
    %c0_23 = arith.constant 0 : index
    %c0_24 = arith.constant 0 : index
    %c128 = arith.constant 128 : index
    %48 = vector.load %arg1[%c0_23, %c0_24, %c128] : memref<1x8x512xf32, #tpu.memory_space<vmem>>, vector<1x8x256xf32>
    %49 = vector.shape_cast %48 : vector<1x8x256xf32> to vector<8x256xf32>
    %c32 = arith.constant 32 : index
    %c0_25 = arith.constant 0 : index
    %50 = vector.load %arg13[%c32, %c0_25] : memref<144x256xf32, #tpu.memory_space<vmem>>, vector<8x256xf32>
    tpu.vector_store %arg13[%c32, %c0_25], %49 {strides = array<i32>} : memref<144x256xf32, #tpu.memory_space<vmem>>, vector<8x256xf32>,
    %c0_26 = arith.constant 0 : index
    %c0_27 = arith.constant 0 : index
    %c129 = arith.constant 129 : index
    %51 = vector.load %arg1[%c0_26, %c0_27, %c129] : memref<1x8x512xf32, #tpu.memory_space<vmem>>, vector<1x8x256xf32>
    %52 = vector.shape_cast %51 : vector<1x8x256xf32> to vector<8x256xf32>
    %53 = vector.broadcast %29 : vector<1x256xf32> to vector<8x256xf32>
    %54 = arith.mulf %52, %53 : vector<8x256xf32>
    %c40 = arith.constant 40 : index
    %c0_28 = arith.constant 0 : index
    %55 = vector.load %arg13[%c40, %c0_28] : memref<144x256xf32, #tpu.memory_space<vmem>>, vector<8x256xf32>
    tpu.vector_store %arg13[%c40, %c0_28], %54 {strides = array<i32>} : memref<144x256xf32, #tpu.memory_space<vmem>>, vector<8x256xf32>,
    %c0_29 = arith.constant 0 : index
    %c0_30 = arith.constant 0 : index
    %c143 = arith.constant 143 : index
    %56 = vector.load %arg1[%c0_29, %c0_30, %c143] : memref<1x8x512xf32, #tpu.memory_space<vmem>>, vector<1x8x256xf32>
    %57 = vector.shape_cast %56 : vector<1x8x256xf32> to vector<8x256xf32>
    %58 = vector.broadcast %25 : vector<1x256xf32> to vector<8x256xf32>
    %59 = arith.mulf %57, %58 : vector<8x256xf32>
    %c48 = arith.constant 48 : index
    %c0_31 = arith.constant 0 : index
    %60 = vector.load %arg13[%c48, %c0_31] : memref<144x256xf32, #tpu.memory_space<vmem>>, vector<8x256xf32>
    tpu.vector_store %arg13[%c48, %c0_31], %59 {strides = array<i32>} : memref<144x256xf32, #tpu.memory_space<vmem>>, vector<8x256xf32>,
    %c0_32 = arith.constant 0 : index
    %c0_33 = arith.constant 0 : index
    %c144 = arith.constant 144 : index
    %61 = vector.load %arg1[%c0_32, %c0_33, %c144] : memref<1x8x512xf32, #tpu.memory_space<vmem>>, vector<1x8x256xf32>
    %62 = vector.shape_cast %61 : vector<1x8x256xf32> to vector<8x256xf32>
    %c56 = arith.constant 56 : index
    %c0_34 = arith.constant 0 : index
    %63 = vector.load %arg13[%c56, %c0_34] : memref<144x256xf32, #tpu.memory_space<vmem>>, vector<8x256xf32>
    tpu.vector_store %arg13[%c56, %c0_34], %62 {strides = array<i32>} : memref<144x256xf32, #tpu.memory_space<vmem>>, vector<8x256xf32>,
    %c0_35 = arith.constant 0 : index
    %c0_36 = arith.constant 0 : index
    %c145 = arith.constant 145 : index
    %64 = vector.load %arg1[%c0_35, %c0_36, %c145] : memref<1x8x512xf32, #tpu.memory_space<vmem>>, vector<1x8x256xf32>
    %65 = vector.shape_cast %64 : vector<1x8x256xf32> to vector<8x256xf32>
    %66 = vector.broadcast %29 : vector<1x256xf32> to vector<8x256xf32>
    %67 = arith.mulf %65, %66 : vector<8x256xf32>
    %c64 = arith.constant 64 : index
    %c0_37 = arith.constant 0 : index
    %68 = vector.load %arg13[%c64, %c0_37] : memref<144x256xf32, #tpu.memory_space<vmem>>, vector<8x256xf32>
    tpu.vector_store %arg13[%c64, %c0_37], %67 {strides = array<i32>} : memref<144x256xf32, #tpu.memory_space<vmem>>, vector<8x256xf32>,
    %c0_38 = arith.constant 0 : index
    %c0_39 = arith.constant 0 : index
    %69 = vector.load %arg2[%c0_38, %c0_39] : memref<16x72xf32, #tpu.memory_space<vmem>>, vector<16x72xf32>
    %c0_40 = arith.constant 0 : index
    %c0_41 = arith.constant 0 : index
    %70 = vector.load %arg13[%c0_40, %c0_41] : memref<144x256xf32, #tpu.memory_space<vmem>>, vector<72x256xf32>
    %cst_42 = arith.constant dense<0.000000e+00> : vector<16x256xf32>
    %71 = tpu.matmul %69, %70, %cst_42 {dimension_numbers = #tpu.dot_dimension_numbers<[1], [0], [0], [1], [0, 0, 1, 1], [], []>, precision = #tpu.contract_precision<fp32>} : vector<16x72xf32>, vector<72x256xf32>, vector<16x256xf32> -> vector<16x256xf32>
    %c0_43 = arith.constant 0 : index
    %c0_44 = arith.constant 0 : index
    %72 = vector.load %arg3[%c0_43, %c0_44] : memref<16x1xf32, #tpu.memory_space<vmem>>, vector<16x1xf32>
    %73 = vector.broadcast %72 : vector<16x1xf32> to vector<16x256xf32>
    %74 = arith.addf %71, %73 : vector<16x256xf32>
    %cst_45 = arith.constant 0.000000e+00 : f32
    %75 = vector.broadcast %cst_45 : f32 to vector<16x256xf32>
    %76 = arith.cmpf oge, %74, %75 : vector<16x256xf32>
    %cst_46 = arith.constant 2.000000e-01 : f32
    %77 = vector.broadcast %cst_46 : f32 to vector<16x256xf32>
    %78 = arith.mulf %77, %74 : vector<16x256xf32>
    %79 = arith.select %76, %74, %78 : vector<16x256xi1>, vector<16x256xf32>
    %c0_47 = arith.constant 0 : index
    %c128_48 = arith.constant 128 : index
    %80 = vector.load %arg11[%c0_47, %c128_48] : memref<16x512xf32, #tpu.memory_space<vmem>>, vector<16x256xf32>
    tpu.vector_store %arg11[%c0_47, %c128_48], %79 {strides = array<i32>} : memref<16x512xf32, #tpu.memory_space<vmem>>, vector<16x256xf32>,
    %c0_49 = arith.constant 0 : index
    %c111_50 = arith.constant 111 : index
    %81 = vector.load %arg11[%c0_49, %c111_50] : memref<16x512xf32, #tpu.memory_space<vmem>>, vector<16x256xf32>
    %82 = vector.broadcast %25 : vector<1x256xf32> to vector<16x256xf32>
    %83 = arith.mulf %81, %82 : vector<16x256xf32>
    %c0_51 = arith.constant 0 : index
    %c0_52 = arith.constant 0 : index
    %84 = vector.load %arg13[%c0_51, %c0_52] : memref<144x256xf32, #tpu.memory_space<vmem>>, vector<16x256xf32>
    tpu.vector_store %arg13[%c0_51, %c0_52], %83 {strides = array<i32>} : memref<144x256xf32, #tpu.memory_space<vmem>>, vector<16x256xf32>,
    %c0_53 = arith.constant 0 : index
    %c112_54 = arith.constant 112 : index
    %85 = vector.load %arg11[%c0_53, %c112_54] : memref<16x512xf32, #tpu.memory_space<vmem>>, vector<16x256xf32>
    %c16_55 = arith.constant 16 : index
    %c0_56 = arith.constant 0 : index
    %86 = vector.load %arg13[%c16_55, %c0_56] : memref<144x256xf32, #tpu.memory_space<vmem>>, vector<16x256xf32>
    tpu.vector_store %arg13[%c16_55, %c0_56], %85 {strides = array<i32>} : memref<144x256xf32, #tpu.memory_space<vmem>>, vector<16x256xf32>,
    %c0_57 = arith.constant 0 : index
    %c113_58 = arith.constant 113 : index
    %87 = vector.load %arg11[%c0_57, %c113_58] : memref<16x512xf32, #tpu.memory_space<vmem>>, vector<16x256xf32>
    %88 = vector.broadcast %29 : vector<1x256xf32> to vector<16x256xf32>
    %89 = arith.mulf %87, %88 : vector<16x256xf32>
    %c32_59 = arith.constant 32 : index
    %c0_60 = arith.constant 0 : index
    %90 = vector.load %arg13[%c32_59, %c0_60] : memref<144x256xf32, #tpu.memory_space<vmem>>, vector<16x256xf32>
    tpu.vector_store %arg13[%c32_59, %c0_60], %89 {strides = array<i32>} : memref<144x256xf32, #tpu.memory_space<vmem>>, vector<16x256xf32>,
    %c0_61 = arith.constant 0 : index
    %c127_62 = arith.constant 127 : index
    %91 = vector.load %arg11[%c0_61, %c127_62] : memref<16x512xf32, #tpu.memory_space<vmem>>, vector<16x256xf32>
    %92 = vector.broadcast %25 : vector<1x256xf32> to vector<16x256xf32>
    %93 = arith.mulf %91, %92 : vector<16x256xf32>
    %c48_63 = arith.constant 48 : index
    %c0_64 = arith.constant 0 : index
    %94 = vector.load %arg13[%c48_63, %c0_64] : memref<144x256xf32, #tpu.memory_space<vmem>>, vector<16x256xf32>
    tpu.vector_store %arg13[%c48_63, %c0_64], %93 {strides = array<i32>} : memref<144x256xf32, #tpu.memory_space<vmem>>, vector<16x256xf32>,
    %c0_65 = arith.constant 0 : index
    %c128_66 = arith.constant 128 : index
    %95 = vector.load %arg11[%c0_65, %c128_66] : memref<16x512xf32, #tpu.memory_space<vmem>>, vector<16x256xf32>
    %c64_67 = arith.constant 64 : index
    %c0_68 = arith.constant 0 : index
    %96 = vector.load %arg13[%c64_67, %c0_68] : memref<144x256xf32, #tpu.memory_space<vmem>>, vector<16x256xf32>
    tpu.vector_store %arg13[%c64_67, %c0_68], %95 {strides = array<i32>} : memref<144x256xf32, #tpu.memory_space<vmem>>, vector<16x256xf32>,
    %c0_69 = arith.constant 0 : index
    %c129_70 = arith.constant 129 : index
    %97 = vector.load %arg11[%c0_69, %c129_70] : memref<16x512xf32, #tpu.memory_space<vmem>>, vector<16x256xf32>
    %98 = vector.broadcast %29 : vector<1x256xf32> to vector<16x256xf32>
    %99 = arith.mulf %97, %98 : vector<16x256xf32>
    %c80 = arith.constant 80 : index
    %c0_71 = arith.constant 0 : index
    %100 = vector.load %arg13[%c80, %c0_71] : memref<144x256xf32, #tpu.memory_space<vmem>>, vector<16x256xf32>
    tpu.vector_store %arg13[%c80, %c0_71], %99 {strides = array<i32>} : memref<144x256xf32, #tpu.memory_space<vmem>>, vector<16x256xf32>,
    %c0_72 = arith.constant 0 : index
    %c143_73 = arith.constant 143 : index
    %101 = vector.load %arg11[%c0_72, %c143_73] : memref<16x512xf32, #tpu.memory_space<vmem>>, vector<16x256xf32>
    %102 = vector.broadcast %25 : vector<1x256xf32> to vector<16x256xf32>
    %103 = arith.mulf %101, %102 : vector<16x256xf32>
    %c96 = arith.constant 96 : index
    %c0_74 = arith.constant 0 : index
    %104 = vector.load %arg13[%c96, %c0_74] : memref<144x256xf32, #tpu.memory_space<vmem>>, vector<16x256xf32>
    tpu.vector_store %arg13[%c96, %c0_74], %103 {strides = array<i32>} : memref<144x256xf32, #tpu.memory_space<vmem>>, vector<16x256xf32>,
    %c0_75 = arith.constant 0 : index
    %c144_76 = arith.constant 144 : index
    %105 = vector.load %arg11[%c0_75, %c144_76] : memref<16x512xf32, #tpu.memory_space<vmem>>, vector<16x256xf32>
    %c112_77 = arith.constant 112 : index
    %c0_78 = arith.constant 0 : index
    %106 = vector.load %arg13[%c112_77, %c0_78] : memref<144x256xf32, #tpu.memory_space<vmem>>, vector<16x256xf32>
    tpu.vector_store %arg13[%c112_77, %c0_78], %105 {strides = array<i32>} : memref<144x256xf32, #tpu.memory_space<vmem>>, vector<16x256xf32>,
    %c0_79 = arith.constant 0 : index
    %c145_80 = arith.constant 145 : index
    %107 = vector.load %arg11[%c0_79, %c145_80] : memref<16x512xf32, #tpu.memory_space<vmem>>, vector<16x256xf32>
    %108 = vector.broadcast %29 : vector<1x256xf32> to vector<16x256xf32>
    %109 = arith.mulf %107, %108 : vector<16x256xf32>
    %c128_81 = arith.constant 128 : index
    %c0_82 = arith.constant 0 : index
    %110 = vector.load %arg13[%c128_81, %c0_82] : memref<144x256xf32, #tpu.memory_space<vmem>>, vector<16x256xf32>
    tpu.vector_store %arg13[%c128_81, %c0_82], %109 {strides = array<i32>} : memref<144x256xf32, #tpu.memory_space<vmem>>, vector<16x256xf32>,
    %c0_83 = arith.constant 0 : index
    %c0_84 = arith.constant 0 : index
    %111 = vector.load %arg4[%c0_83, %c0_84] : memref<16x144xf32, #tpu.memory_space<vmem>>, vector<16x144xf32>
    %c0_85 = arith.constant 0 : index
    %c0_86 = arith.constant 0 : index
    %112 = vector.load %arg13[%c0_85, %c0_86] : memref<144x256xf32, #tpu.memory_space<vmem>>, vector<144x256xf32>
    %cst_87 = arith.constant dense<0.000000e+00> : vector<16x256xf32>
    %113 = tpu.matmul %111, %112, %cst_87 {dimension_numbers = #tpu.dot_dimension_numbers<[1], [0], [0], [1], [0, 0, 1, 1], [], []>, precision = #tpu.contract_precision<fp32>} : vector<16x144xf32>, vector<144x256xf32>, vector<16x256xf32> -> vector<16x256xf32>
    %c0_88 = arith.constant 0 : index
    %c0_89 = arith.constant 0 : index
    %114 = vector.load %arg5[%c0_88, %c0_89] : memref<16x1xf32, #tpu.memory_space<vmem>>, vector<16x1xf32>
    %115 = vector.broadcast %114 : vector<16x1xf32> to vector<16x256xf32>
    %116 = arith.addf %113, %115 : vector<16x256xf32>
    %cst_90 = arith.constant 0.000000e+00 : f32
    %117 = vector.broadcast %cst_90 : f32 to vector<16x256xf32>
    %118 = arith.cmpf oge, %116, %117 : vector<16x256xf32>
    %cst_91 = arith.constant 2.000000e-01 : f32
    %119 = vector.broadcast %cst_91 : f32 to vector<16x256xf32>
    %120 = arith.mulf %119, %116 : vector<16x256xf32>
    %121 = arith.select %118, %116, %120 : vector<16x256xi1>, vector<16x256xf32>
    %c0_92 = arith.constant 0 : index
    %c128_93 = arith.constant 128 : index
    %122 = vector.load %arg12[%c0_92, %c128_93] : memref<16x512xf32, #tpu.memory_space<vmem>>, vector<16x256xf32>
    tpu.vector_store %arg12[%c0_92, %c128_93], %121 {strides = array<i32>} : memref<16x512xf32, #tpu.memory_space<vmem>>, vector<16x256xf32>,
    %c0_94 = arith.constant 0 : index
    %c111_95 = arith.constant 111 : index
    %123 = vector.load %arg12[%c0_94, %c111_95] : memref<16x512xf32, #tpu.memory_space<vmem>>, vector<16x256xf32>
    %124 = vector.broadcast %25 : vector<1x256xf32> to vector<16x256xf32>
    %125 = arith.mulf %123, %124 : vector<16x256xf32>
    %c0_96 = arith.constant 0 : index
    %c0_97 = arith.constant 0 : index
    %126 = vector.load %arg13[%c0_96, %c0_97] : memref<144x256xf32, #tpu.memory_space<vmem>>, vector<16x256xf32>
    tpu.vector_store %arg13[%c0_96, %c0_97], %125 {strides = array<i32>} : memref<144x256xf32, #tpu.memory_space<vmem>>, vector<16x256xf32>,
    %c0_98 = arith.constant 0 : index
    %c112_99 = arith.constant 112 : index
    %127 = vector.load %arg12[%c0_98, %c112_99] : memref<16x512xf32, #tpu.memory_space<vmem>>, vector<16x256xf32>
    %c16_100 = arith.constant 16 : index
    %c0_101 = arith.constant 0 : index
    %128 = vector.load %arg13[%c16_100, %c0_101] : memref<144x256xf32, #tpu.memory_space<vmem>>, vector<16x256xf32>
    tpu.vector_store %arg13[%c16_100, %c0_101], %127 {strides = array<i32>} : memref<144x256xf32, #tpu.memory_space<vmem>>, vector<16x256xf32>,
    %c0_102 = arith.constant 0 : index
    %c113_103 = arith.constant 113 : index
    %129 = vector.load %arg12[%c0_102, %c113_103] : memref<16x512xf32, #tpu.memory_space<vmem>>, vector<16x256xf32>
    %130 = vector.broadcast %29 : vector<1x256xf32> to vector<16x256xf32>
    %131 = arith.mulf %129, %130 : vector<16x256xf32>
    %c32_104 = arith.constant 32 : index
    %c0_105 = arith.constant 0 : index
    %132 = vector.load %arg13[%c32_104, %c0_105] : memref<144x256xf32, #tpu.memory_space<vmem>>, vector<16x256xf32>
    tpu.vector_store %arg13[%c32_104, %c0_105], %131 {strides = array<i32>} : memref<144x256xf32, #tpu.memory_space<vmem>>, vector<16x256xf32>,
    %c0_106 = arith.constant 0 : index
    %c127_107 = arith.constant 127 : index
    %133 = vector.load %arg12[%c0_106, %c127_107] : memref<16x512xf32, #tpu.memory_space<vmem>>, vector<16x256xf32>
    %134 = vector.broadcast %25 : vector<1x256xf32> to vector<16x256xf32>
    %135 = arith.mulf %133, %134 : vector<16x256xf32>
    %c48_108 = arith.constant 48 : index
    %c0_109 = arith.constant 0 : index
    %136 = vector.load %arg13[%c48_108, %c0_109] : memref<144x256xf32, #tpu.memory_space<vmem>>, vector<16x256xf32>
    tpu.vector_store %arg13[%c48_108, %c0_109], %135 {strides = array<i32>} : memref<144x256xf32, #tpu.memory_space<vmem>>, vector<16x256xf32>,
    %c0_110 = arith.constant 0 : index
    %c128_111 = arith.constant 128 : index
    %137 = vector.load %arg12[%c0_110, %c128_111] : memref<16x512xf32, #tpu.memory_space<vmem>>, vector<16x256xf32>
    %c64_112 = arith.constant 64 : index
    %c0_113 = arith.constant 0 : index
    %138 = vector.load %arg13[%c64_112, %c0_113] : memref<144x256xf32, #tpu.memory_space<vmem>>, vector<16x256xf32>
    tpu.vector_store %arg13[%c64_112, %c0_113], %137 {strides = array<i32>} : memref<144x256xf32, #tpu.memory_space<vmem>>, vector<16x256xf32>,
    %c0_114 = arith.constant 0 : index
    %c129_115 = arith.constant 129 : index
    %139 = vector.load %arg12[%c0_114, %c129_115] : memref<16x512xf32, #tpu.memory_space<vmem>>, vector<16x256xf32>
    %140 = vector.broadcast %29 : vector<1x256xf32> to vector<16x256xf32>
    %141 = arith.mulf %139, %140 : vector<16x256xf32>
    %c80_116 = arith.constant 80 : index
    %c0_117 = arith.constant 0 : index
    %142 = vector.load %arg13[%c80_116, %c0_117] : memref<144x256xf32, #tpu.memory_space<vmem>>, vector<16x256xf32>
    tpu.vector_store %arg13[%c80_116, %c0_117], %141 {strides = array<i32>} : memref<144x256xf32, #tpu.memory_space<vmem>>, vector<16x256xf32>,
    %c0_118 = arith.constant 0 : index
    %c143_119 = arith.constant 143 : index
    %143 = vector.load %arg12[%c0_118, %c143_119] : memref<16x512xf32, #tpu.memory_space<vmem>>, vector<16x256xf32>
    %144 = vector.broadcast %25 : vector<1x256xf32> to vector<16x256xf32>
    %145 = arith.mulf %143, %144 : vector<16x256xf32>
    %c96_120 = arith.constant 96 : index
    %c0_121 = arith.constant 0 : index
    %146 = vector.load %arg13[%c96_120, %c0_121] : memref<144x256xf32, #tpu.memory_space<vmem>>, vector<16x256xf32>
    tpu.vector_store %arg13[%c96_120, %c0_121], %145 {strides = array<i32>} : memref<144x256xf32, #tpu.memory_space<vmem>>, vector<16x256xf32>,
    %c0_122 = arith.constant 0 : index
    %c144_123 = arith.constant 144 : index
    %147 = vector.load %arg12[%c0_122, %c144_123] : memref<16x512xf32, #tpu.memory_space<vmem>>, vector<16x256xf32>
    %c112_124 = arith.constant 112 : index
    %c0_125 = arith.constant 0 : index
    %148 = vector.load %arg13[%c112_124, %c0_125] : memref<144x256xf32, #tpu.memory_space<vmem>>, vector<16x256xf32>
    tpu.vector_store %arg13[%c112_124, %c0_125], %147 {strides = array<i32>} : memref<144x256xf32, #tpu.memory_space<vmem>>, vector<16x256xf32>,
    %c0_126 = arith.constant 0 : index
    %c145_127 = arith.constant 145 : index
    %149 = vector.load %arg12[%c0_126, %c145_127] : memref<16x512xf32, #tpu.memory_space<vmem>>, vector<16x256xf32>
    %150 = vector.broadcast %29 : vector<1x256xf32> to vector<16x256xf32>
    %151 = arith.mulf %149, %150 : vector<16x256xf32>
    %c128_128 = arith.constant 128 : index
    %c0_129 = arith.constant 0 : index
    %152 = vector.load %arg13[%c128_128, %c0_129] : memref<144x256xf32, #tpu.memory_space<vmem>>, vector<16x256xf32>
    tpu.vector_store %arg13[%c128_128, %c0_129], %151 {strides = array<i32>} : memref<144x256xf32, #tpu.memory_space<vmem>>, vector<16x256xf32>,
    %c0_130 = arith.constant 0 : index
    %c0_131 = arith.constant 0 : index
    %153 = vector.load %arg6[%c0_130, %c0_131] : memref<16x144xf32, #tpu.memory_space<vmem>>, vector<16x144xf32>
    %c0_132 = arith.constant 0 : index
    %c0_133 = arith.constant 0 : index
    %154 = vector.load %arg13[%c0_132, %c0_133] : memref<144x256xf32, #tpu.memory_space<vmem>>, vector<144x256xf32>
    %cst_134 = arith.constant dense<0.000000e+00> : vector<16x256xf32>
    %155 = tpu.matmul %153, %154, %cst_134 {dimension_numbers = #tpu.dot_dimension_numbers<[1], [0], [0], [1], [0, 0, 1, 1], [], []>, precision = #tpu.contract_precision<fp32>} : vector<16x144xf32>, vector<144x256xf32>, vector<16x256xf32> -> vector<16x256xf32>
    %c0_135 = arith.constant 0 : index
    %c0_136 = arith.constant 0 : index
    %156 = vector.load %arg7[%c0_135, %c0_136] : memref<16x1xf32, #tpu.memory_space<vmem>>, vector<16x1xf32>
    %157 = vector.broadcast %156 : vector<16x1xf32> to vector<16x256xf32>
    %158 = arith.addf %155, %157 : vector<16x256xf32>
    %159 = arith.addf %79, %158 : vector<16x256xf32>
    %cst_137 = arith.constant 0.000000e+00 : f32
    %160 = vector.broadcast %cst_137 : f32 to vector<16x256xf32>
    %161 = arith.cmpf oge, %159, %160 : vector<16x256xf32>
    %cst_138 = arith.constant 0.00999999977 : f32
    %162 = vector.broadcast %cst_138 : f32 to vector<16x256xf32>
    %163 = arith.mulf %162, %159 : vector<16x256xf32>
    %164 = arith.select %161, %159, %163 : vector<16x256xi1>, vector<16x256xf32>
    %c0_139 = arith.constant 0 : index
    %c0_140 = arith.constant 0 : index
    %165 = vector.load %arg8[%c0_139, %c0_140] : memref<1x16xf32, #tpu.memory_space<vmem>>, vector<1x16xf32>
    %cst_141 = arith.constant dense<0.000000e+00> : vector<1x256xf32>
    %166 = tpu.matmul %165, %164, %cst_141 {dimension_numbers = #tpu.dot_dimension_numbers<[1], [0], [0], [1], [0, 0, 1, 1], [], []>, precision = #tpu.contract_precision<fp32>} : vector<1x16xf32>, vector<16x256xf32>, vector<1x256xf32> -> vector<1x256xf32>
    %c0_142 = arith.constant 0 : index
    %c0_143 = arith.constant 0 : index
    %167 = vector.load %arg9[%c0_142, %c0_143] : memref<1x1xf32, #tpu.memory_space<vmem>>, vector<1x1xf32>
    %168 = vector.broadcast %167 : vector<1x1xf32> to vector<1x256xf32>
    %169 = arith.addf %166, %168 : vector<1x256xf32>
    %170 = arith.negf %169 : vector<1x256xf32>
    %171 = math.exp %170 : vector<1x256xf32>
    %cst_144 = arith.constant 1.000000e+00 : f32
    %172 = vector.broadcast %cst_144 : f32 to vector<1x256xf32>
    %173 = arith.addf %172, %171 : vector<1x256xf32>
    %174 = arith.divf %172, %173 : vector<1x256xf32>
    %c0_145 = arith.constant 0 : index
    %c0_146 = arith.constant 0 : index
    %c0_147 = arith.constant 0 : index
    %175 = vector.load %arg10[%c0_145, %c0_146, %c0_147] : memref<1x1x256xf32, #tpu.memory_space<vmem>>, vector<1x1x256xf32>
    %176 = vector.shape_cast %175 : vector<1x1x256xf32> to vector<1x256xf32>
    %177 = vector.shape_cast %174 : vector<1x256xf32> to vector<1x1x256xf32>
    tpu.vector_store %arg10[%c0_145, %c0_146, %c0_147], %177 {strides = array<i32>} : memref<1x1x256xf32, #tpu.memory_space<vmem>>, vector<1x1x256xf32>,
    return
  }
  func.func @transform_0(%arg0: i32) -> (i32, i32, i32) {
    %c0_i32 = arith.constant 0 : i32
    %c0_i32_0 = arith.constant 0 : i32
    %c0_i32_1 = arith.constant 0 : i32
    return %arg0, %c0_i32, %c0_i32_0 : i32, i32, i32
  }
  func.func @transform_1(%arg0: i32) -> (i32, i32) {
    %c0_i32 = arith.constant 0 : i32
    %c0_i32_0 = arith.constant 0 : i32
    %c0_i32_1 = arith.constant 0 : i32
    return %c0_i32, %c0_i32_0 : i32, i32
  }
  func.func @transform_2(%arg0: i32) -> (i32, i32) {
    %c0_i32 = arith.constant 0 : i32
    %c0_i32_0 = arith.constant 0 : i32
    %c0_i32_1 = arith.constant 0 : i32
    return %c0_i32, %c0_i32_0 : i32, i32
  }
  func.func @transform_3(%arg0: i32) -> (i32, i32) {
    %c0_i32 = arith.constant 0 : i32
    %c0_i32_0 = arith.constant 0 : i32
    %c0_i32_1 = arith.constant 0 : i32
    return %c0_i32, %c0_i32_0 : i32, i32
  }
  func.func @transform_4(%arg0: i32) -> (i32, i32) {
    %c0_i32 = arith.constant 0 : i32
    %c0_i32_0 = arith.constant 0 : i32
    %c0_i32_1 = arith.constant 0 : i32
    return %c0_i32, %c0_i32_0 : i32, i32
  }
  func.func @transform_5(%arg0: i32) -> (i32, i32) {
    %c0_i32 = arith.constant 0 : i32
    %c0_i32_0 = arith.constant 0 : i32
    %c0_i32_1 = arith.constant 0 : i32
    return %c0_i32, %c0_i32_0 : i32, i32
  }
  func.func @transform_6(%arg0: i32) -> (i32, i32) {
    %c0_i32 = arith.constant 0 : i32
    %c0_i32_0 = arith.constant 0 : i32
    %c0_i32_1 = arith.constant 0 : i32
    return %c0_i32, %c0_i32_0 : i32, i32
  }
  func.func @transform_7(%arg0: i32) -> (i32, i32) {
    %c0_i32 = arith.constant 0 : i32
    %c0_i32_0 = arith.constant 0 : i32
    %c0_i32_1 = arith.constant 0 : i32
    return %c0_i32, %c0_i32_0 : i32, i32
  }
  func.func @transform_8(%arg0: i32) -> (i32, i32) {
    %c0_i32 = arith.constant 0 : i32
    %c0_i32_0 = arith.constant 0 : i32
    %c0_i32_1 = arith.constant 0 : i32
    return %c0_i32, %c0_i32_0 : i32, i32
  }
  func.func @transform_9(%arg0: i32) -> (i32, i32, i32) {
    %c0_i32 = arith.constant 0 : i32
    %c0_i32_0 = arith.constant 0 : i32
    %c0_i32_1 = arith.constant 0 : i32
    return %arg0, %c0_i32, %c0_i32_0 : i32, i32, i32
  }
}

</mosaic_0001>

<bundles_post_ra>
// kernel: edge_detection.1
= control target key start
LH: loop header
LB: loop body
LE: loop exit
PB: predicated region body
PF: predicated region fallthrough
CT: control target
= control target key end

     0   :  { %s5556_s11 = smov 0   ;;  %s7848_s0 = inlined_call_operand.vmem [shape: f32[2,8,512], index: 0, kind: input, shape index: {}]   ;;  %s7849_s1 = inlined_call_operand.vmem [shape: f32[16,72], index: 1, kind: input, shape index: {}]   ;;  %s7850_s2 = inlined_call_operand.vmem [shape: f32[16,1], index: 2, kind: input, shape index: {}]   ;;  %s7851_s3 = inlined_call_operand.vmem [shape: f32[16,144], index: 3, kind: input, shape index: {}]   ;;  %s7852_s4 = inlined_call_operand.vmem [shape: f32[16,1], index: 4, kind: input, shape index: {}]   ;;  %s7853_s5 = inlined_call_operand.vmem [shape: f32[16,144], index: 5, kind: input, shape index: {}]   ;;  %s7854_s6 = inlined_call_operand.vmem [shape: f32[16,1], index: 6, kind: input, shape index: {}]   ;;  %s7855_s7 = inlined_call_operand.vmem [shape: f32[1,16], index: 7, kind: input, shape index: {}]   ;;  %s7856_s8 = inlined_call_operand.<no memory space> [shape: f32[1,1], index: 8, kind: input, shape index: {}]   ;;  %s7857_s9 = inlined_call_operand.vmem [shape: f32[2,1,256], index: 9, kind: output, shape index: {}]  }
   0x1   :  { %v14_v0 = vstv %s7856_s8 }
   0x2   :  { %15 = vst [vmem:[#allocation5] sm:$0x1] %v14_v0 }
   0x3 LB: > { %s4752_s12 = sadd.s32 4294967295, %s5490_s11   ;;  %p4756_p0 = scmp.ge.s32.totalorder %s5490_s11, 1  ;;  %s5490_s11 = sphi %s5556_s11, %s21_s11  }
   0x4   : > { %p289_p1 = scmp.lt.s32.totalorder %s5490_s11, 3 }
   0x6   : > { %p290_p2 = pnand %p4756_p0, %p289_p1 }
   0x8   : > { %293 = sbr.rel (%p290_p2) target bundleno = 2091 (0x82b), region = 56 }
   0xf   : > { %v7858_v1 = vlaneseq  ;;  %v7862_v2 = vmov 0.0   ;;  %p324_p3 = scmp.lt.s32.totalorder %s4752_s12, 1  ;;  %s5493_s8 = smov 127   ;;  %v5501_v16 = vmov 0   ;;  %vm389_vm4 = vcmask 908288   ;;  %v627_v59 = vld [vmem:[%s7850_s2 + $0x8] sm:$0xff] }
  0x10   : > { %727 = vmatprep.mubr.f32.mxu0 %v7862_v2  ;;  %s5494_s13 = smov 111   ;;  %s5495_s15 = smov 113   ;;  %5455 = vset.pattern.permute.xlu1 %v5501_v16  ;;  %vm441_vm5 = vcmask 924672   ;;  %vm472_vm6 = vcmask 1039360   ;;  %vm458_vm7 = vcmask 121856   ;;  %vm406_vm8 = vcmask 138240  }
  0x11   : > { %v342_v3 = vand.u32 127, %v7858_v1  ;;  %s8432_s12 = smov (!%p324_p3, %s4752_s12), 1  ;;  %s5496_s16 = smov 1   ;;  %5454 = vset.pattern.permute.xlu0 %v5501_v16  ;;  %vm489_vm9 = vcmask 7168   ;;  %v626_v62 = vld [vmem:[%s7850_s2] sm:$0xff]  ;;  %vm425_vm10 = vcmask 130048  }
  0x12   : > { %s4768_s14 = sshll.u32 %s8432_s12, 5  ;;  %s5497_s20 = smov 15   ;;  %vm638_vm11 = vcmask 588800   ;;  %vm570_vm12 = vcmask 916480  }
  0x13   : > { %v343_v4 = vadd.s32 128, %v342_v3  ;;  %v348_v5 = vand.u32 15, %v342_v3  ;;  %s5580_s19 = scalar_lea.vmem %s7848_s0, %s4768_s14  ;;  %s5498_s21 = smov 17  }
  0x14   : > { %v5585_v13 = vld [vmem:[%s5580_s19 + $0x10] sm:$0xff]  ;;  %v5588_v14 = vld [vmem:[%s5580_s19 + $0x8] sm:$0xff]  ;;  %s5499_s22 = smov 16   ;;  %v413_v15 = vld [vmem:[%s5580_s19] sm:$0xff]  ;;  %s5500_s23 = smov 112  }
  0x15   : > { %v355_v6 = vand.u32 15, %v343_v4  ;;  %vm368_vm0 = vcmp.gt.s32.totalorder %v348_v5, 0  ;;  %vm374_vm1 = vcmp.lt.s32.totalorder %v348_v5, 15  ;;  %v531_v36 = vld [vmem:[%s5580_s19 + $0x18] sm:$0xff]  ;;  %s4759_s26 = sshll.u32 %s8432_s12, 1 }
  0x16   : > { %v4760_v7 = vsel %vm368_vm0, 1.0, %v7862_v2  ;;  %v4762_v9 = vsel %vm374_vm1, 1.0, %v7862_v2  ;;  %s332_s29 = scalar_lea.vmem %s7857_s9, %s4759_s26 }
  0x17   : > { %vm369_vm2 = vcmp.gt.s32.totalorder %v355_v6, 0  ;;  %vm375_vm3 = vcmp.lt.s32.totalorder %v355_v6, 15 }
  0x18   : > { %v4761_v8 = vsel %vm369_vm2, 1.0, %v7862_v2  ;;  %v4763_v10 = vsel %vm375_vm3, 1.0, %v7862_v2 }
  0x19   : > { %v5434_v11 = vpack.i.bf16 %v4761_v8, %v4760_v7  ;;  %v5429_v12 = vpack.i.bf16 %v4763_v10, %v4762_v9 }
  0x1b   : > { %5435 = vrot.lane.b32.xlu1 %v5434_v11, %s5493_s8  ;;  %5425 = vrot.lane.b32.xlu0 %v5434_v11, %s5494_s13 }
  0x1f   : > { %5430 = vrot.lane.b32.xlu0 %v5429_v12, %s5495_s15  ;;  %5440 = vrot.lane.b32.xlu1 %v5429_v12, %s5496_s16 }
  0x23   : > { %5445 = vrot.lane.b32.xlu0 %v5434_v11, %s5497_s20  ;;  %5450 = vrot.lane.b32.xlu1 %v5429_v12, %s5498_s21 }
  0x27   : > { %423 = vrot.lane.b32.xlu1 %v5585_v13, %s5499_s22  ;;  %421 = vrot.lane.b32.xlu0 %v5588_v14, %s5499_s22 }
  0x2b   : > { %419 = vrot.lane.b32.xlu1 %v413_v15, %s5499_s22 }
  0x2f   : > { %566 = vrot.lane.b32.xlu1 %v5585_v13, %s5500_s23 }
  0x8d   : > { %v5436_v17 = vpop.permute.xlu1 %5435  ;;  %v5426_v18 = vpop.permute.xlu0 %5425 }
  0x8e   : > { %v5598_v19 = vunpack.i.l.bf16 %v5436_v17  ;;  %v5600_v20 = vunpack.i.l.bf16 %v5426_v18  ;;  %v5602_v21 = vunpack.i.h.bf16 %v5426_v18  ;;  %v5623_v34 = vunpack.i.h.bf16 %v5436_v17 }
  0x90   : > { %8039 = vst [vmem:[#allocation6_spill] sm:$0xff] %v5602_v21  ;;  %v477_v22 = vmul.f32 %v5598_v19, %v413_v15  ;;  %v394_v23 = vmul.f32 %v5600_v20, %v413_v15  ;;  %v396_v29 = vmul.f32 %v5602_v21, %v5585_v13  ;;  %8042 = vst [vmem:[#allocation9_spill] sm:$0xff] %v5623_v34  ;;  %v5702_v60 = vmul.f32 0.0, %v5600_v20 }
  0x91   : > { %v5431_v24 = vpop.permute.xlu0 %5430  ;;  %v5441_v25 = vpop.permute.xlu1 %5440  ;;  %v479_v39 = vmul.f32 %v5623_v34, %v5585_v13  ;;  %v5636_v40 = vsel %vm389_vm4, %v5600_v20, %v5602_v21  ;;  %v5662_v50 = vsel %vm472_vm6, %v5598_v19, %v5623_v34  ;;  %v5721_v0 = vmul.f32 0.0, %v5598_v19 }
  0x92   : > { %v5606_v26 = vunpack.i.l.bf16 %v5431_v24  ;;  %483 = vrot.lane.b32.xlu1 %v477_v22, %s5496_s16  ;;  %400 = vrot.lane.b32.xlu0 %v394_v23, %s5498_s21  ;;  %v5610_v27 = vunpack.i.l.bf16 %v5441_v25  ;;  %v5612_v28 = vunpack.i.h.bf16 %v5431_v24  ;;  %v5443_v38 = vunpack.i.h.bf16 %v5441_v25  ;;  %8043 = vst [vmem:[#allocation10_spill] sm:$0xff] %v5636_v40  ;;  %8048 = vst [vmem:[#allocation15_spill] sm:$0xff] %v5662_v50 }
  0x93   : > { %v395_v43 = vmul.f32 %v5588_v14, %v5636_v40  ;;  %v478_v54 = vmul.f32 %v5662_v50, %v5588_v14  ;;  %8052 = vst [vmem:[#allocation19_spill] sm:$0xff] %v5702_v60  ;;  %8054 = vst [vmem:[#allocation21_spill] sm:$0xff] %v5721_v0 }
  0x94   : > { %8040 = vst [vmem:[#allocation7_spill] sm:$0xff] %v5610_v27  ;;  %8041 = vst [vmem:[#allocation8_spill] sm:$0xff] %v5612_v28  ;;  %v446_v30 = vmul.f32 %v5606_v26, %v413_v15  ;;  %v511_v33 = vmul.f32 %v5610_v27, %v5588_v14  ;;  %v448_v35 = vmul.f32 %v5612_v28, %v5585_v13  ;;  %v5714_v63 = vmul.f32 0.0, %v5606_v26 }
  0x95   : > { %v5446_v31 = vpop.permute.xlu0 %5445  ;;  %v513_v42 = vmul.f32 %v5443_v38, %v531_v36  ;;  %v5451_v44 = vpop.permute.xlu1 %5450  ;;  %v5647_v45 = vsel %vm441_vm5, %v5606_v26, %v5612_v28  ;;  %v5682_v55 = vsel %vm489_vm9, %v5610_v27, %v5443_v38  ;;  %v5727_v3 = vmul.f32 0.0, %v5443_v38 }
  0x96   : > { %404 = vrot.lane.b32.xlu1 %v396_v29, %s5498_s21  ;;  %452 = vrot.lane.b32.xlu0 %v446_v30, %s5497_s20  ;;  %v5619_v32 = vunpack.i.h.bf16 %v5446_v31  ;;  %v5640_v41 = vunpack.i.l.bf16 %v5446_v31  ;;  %8045 = vst [vmem:[#allocation12_spill] sm:$0xff] %v5647_v45  ;;  %v5651_v46 = vunpack.i.h.bf16 %v5451_v44  ;;  %v5653_v47 = vunpack.i.l.bf16 %v5451_v44  ;;  %8051 = vst [vmem:[#allocation18_spill] sm:$0xff] %v5682_v55 }
  0x97   : > { %v447_v49 = vmul.f32 %v5647_v45, %v5588_v14  ;;  %v512_v57 = vmul.f32 %v5682_v55, %v5585_v13  ;;  %8053 = vst [vmem:[#allocation20_spill] sm:$0xff] %v5714_v63  ;;  %8055 = vst [vmem:[#allocation22_spill] sm:$0xff] %v5727_v3 }
  0x98   : > { %v542_v37 = vmul.f32 %v5619_v32, %v531_v36  ;;  %8044 = vst [vmem:[#allocation11_spill] sm:$0xff] %v5640_v41  ;;  %8046 = vst [vmem:[#allocation13_spill] sm:$0xff] %v5651_v46  ;;  %v540_v48 = vmul.f32 %v5640_v41, %v5588_v14  ;;  %v5667_v51 = vsel %vm458_vm7, %v5640_v41, %v5619_v32  ;;  %v5736_v4 = vmul.f32 0.0, %v5619_v32 }
  0x99   : > { %8047 = vst [vmem:[#allocation14_spill] sm:$0xff] %v5653_v47  ;;  %8049 = vst [vmem:[#allocation16_spill] sm:$0xff] %v5667_v51  ;;  %v5674_v52 = vsel %vm406_vm8, %v5653_v47, %v5651_v46  ;;  %v541_v53 = vmul.f32 %v5667_v51, %v5585_v13  ;;  %v588_v58 = vmul.f32 %v5653_v47, %v5588_v14  ;;  %v424_v5 = vpop.permute.xlu1 %423  ;;  %v422_v8 = vpop.permute.xlu0 %421 }
  0x9a   : > { %456 = vrot.lane.b32.xlu1 %v448_v35, %s5497_s20  ;;  %517 = vrot.lane.b32.xlu0 %v511_v33, %s5493_s8  ;;  %8050 = vst [vmem:[#allocation17_spill] sm:$0xff] %v5674_v52  ;;  %v589_v56 = vmul.f32 %v5674_v52, %v5585_v13  ;;  %v590_v61 = vmul.f32 %v5651_v46, %v531_v36  ;;  %8056 = vst [vmem:[#allocation23_spill] sm:$0xff] %v5736_v4 }
  0x9b   : > { %v427_v15 = vsel %vm425_vm10, %v422_v8, %v424_v5 }
  0x9c   : > { %v649_v18 = vand.u32 4294901760, %v427_v15 }
  0x9d   : > { %v420_v6 = vpop.permute.xlu1 %419 }
  0x9e   : > { %487 = vrot.lane.b32.xlu1 %v479_v39, %s5496_s16  ;;  %550 = vrot.lane.b32.xlu0 %v542_v37, %s5495_s15  ;;  %v426_v19 = vsel %vm425_vm10, %v420_v6, %v422_v8  ;;  %v5746_v23 = vsub.f32 %v427_v15, %v649_v18 }
  0x9f   : > { %v651_v24 = vand.u32 4294901760, %v426_v19 }
  0xa0   : > { %v7861_v35 = vand.u32 4294901760, %v5746_v23 }
  0xa1   : > { %v5742_v7 = vpop.permute.xlu1 %566  ;;  %v5750_v31 = vsub.f32 %v426_v19, %v651_v24 }
  0xa2   : > { %521 = vrot.lane.b32.xlu1 %v513_v42, %s5493_s8  ;;  %402 = vrot.lane.b32.xlu0 %v395_v43, %s5498_s21  ;;  %v607_v43 = vld [vmem:[%s7849_s1 + $0x8] sm:$0xff] }
  0xa3   : > { %v7860_v44 = vand.u32 4294901760, %v5750_v31 }
  0xa5   : > { %v5784_v6 = vsub.f32 %v5750_v31, %v7860_v44 }
  0xa6   : > { %546 = vrot.lane.b32.xlu1 %v540_v48, %s5495_s15  ;;  %454 = vrot.lane.b32.xlu0 %v447_v49, %s5497_s20  ;;  %v661_v48 = vand.u32 4294901760, %v5585_v13  ;;  %v5771_v49 = vsub.f32 %v5746_v23, %v7861_v35 }
  0xaa   : > { %548 = vrot.lane.b32.xlu1 %v541_v53, %s5495_s15  ;;  %485 = vrot.lane.b32.xlu0 %v478_v54, %s5496_s16 }
  0xae   : > { %596 = vrot.lane.b32.xlu1 %v589_v56, %s5494_s13  ;;  %519 = vrot.lane.b32.xlu0 %v512_v57, %s5493_s8  ;;  %v663_v57 = vand.u32 4294901760, %v5588_v14 }
  0xb2   : > { %594 = vrot.lane.b32.xlu1 %v588_v58, %s5494_s13  ;;  %568 = vrot.lane.b32.xlu0 %v531_v36, %s5500_s23  ;;  %v606_v36 = vld [vmem:[%s7849_s1] sm:$0xff]  ;;  %v643_v58 = vsel %vm638_vm11, %v607_v43, 0 }
  0xb3   : > { %v640_v53 = vsel %vm638_vm11, %v606_v36, 0 }
  0xb4   : > { %v5779_v5 = vand.u32 4294901760, %v640_v53 }
  0xb6   : > { %635 = vperm.xlu1 %5455, %v627_v59   ;;  %564 = vrot.lane.b32.xlu0 %v5588_v14, %s5500_s23  ;;  %v5804_v43 = vsub.f32 %v640_v53, %v5779_v5 }
  0xba   : > { %1401 = vrot.lane.b32.xlu1 %v5702_v60, %s5498_s21  ;;  %598 = vrot.lane.b32.xlu0 %v590_v61, %s5494_s13 }
  0xbe   : > { %5457 = vrot.lane.b32.xlu1 %v7862_v2, %s5499_s22  ;;  %630 = vperm.xlu0 %5454, %v626_v62  }
  0xc2   : > { %1485 = vrot.lane.b32.xlu1 %v5714_v63, %s5497_s20  ;;  %1407 = vrot.lane.b32.xlu0 %v5702_v60, %s5498_s21 }
  0xc6   : > { %1527 = vrot.lane.b32.xlu1 %v5721_v0, %s5496_s16  ;;  %1479 = vrot.lane.b32.xlu0 %v5714_v63, %s5497_s20 }
  0xca   : > { %1575 = vrot.lane.b32.xlu1 %v5727_v3, %s5493_s8  ;;  %1521 = vrot.lane.b32.xlu0 %v5721_v0, %s5496_s16 }
  0xce   : > { %1581 = vrot.lane.b32.xlu1 %v5727_v3, %s5493_s8 }
  0xd2   : > { %1617 = vrot.lane.b32.xlu1 %v5736_v4, %s5495_s15 }
  0xd6   : > { %1623 = vrot.lane.b32.xlu1 %v5736_v4, %s5495_s15 }
 0x104   : > { %v484_v9 = vpop.permute.xlu1 %483  ;;  %v401_v10 = vpop.permute.xlu0 %400 }
 0x108   : > { %v405_v11 = vpop.permute.xlu1 %404  ;;  %v453_v12 = vpop.permute.xlu0 %452 }
 0x10c   : > { %v457_v16 = vpop.permute.xlu1 %456  ;;  %v518_v17 = vpop.permute.xlu0 %517 }
 0x110   : > { %v488_v20 = vpop.permute.xlu1 %487  ;;  %v551_v22 = vpop.permute.xlu0 %550 }
 0x114   : > { %v522_v25 = vpop.permute.xlu1 %521  ;;  %v403_v26 = vpop.permute.xlu0 %402 }
 0x115   : > { %v407_v29 = vsel %vm406_vm8, %v401_v10, %v403_v26  ;;  %v408_v30 = vsel %vm406_vm8, %v403_v26, %v405_v11  ;;  %v5787_v11 = vsub.f32 %v5585_v13, %v661_v48  ;;  %v5797_v26 = vsub.f32 %v5588_v14, %v663_v57 }
 0x116   : > { %v645_v32 = vand.u32 4294901760, %v408_v30  ;;  %v647_v33 = vand.u32 4294901760, %v407_v29 }
 0x118   : > { %v5756_v37 = vpop.permute.xlu1 %546  ;;  %v455_v38 = vpop.permute.xlu0 %454  ;;  %v5758_v39 = vpack.c.bf16 %v649_v18, %v645_v32  ;;  %v5760_v42 = vpack.c.bf16 %v651_v24, %v647_v33  ;;  %v5792_v18 = vsub.f32 %v408_v30, %v645_v32  ;;  %v5794_v19 = vsub.f32 %v407_v29, %v647_v33 }
 0x119   : > { %v460_v54 = vsel %vm458_vm7, %v455_v38, %v457_v16  ;;  %v459_v59 = vsel %vm458_vm7, %v453_v12, %v455_v38  ;;  %v7864_v29 = vand.u32 4294901760, %v5787_v11 }
 0x11a   : > { %4770 = vmatprep.subr.bf16.mxu0 %v5758_v39  ;;  %v653_v16 = vand.u32 4294901760, %v460_v54  ;;  %v7867_v35 = vand.u32 4294901760, %v5792_v18 }
 0x11b   : > { %4772 = vmatpush1.bf16.msra.mxu0 %v5760_v42 }
 0x11c   : > { %v486_v56 = vpop.permute.xlu0 %485  ;;  %v549_v8 = vpop.permute.xlu1 %548 }
 0x11d   : > { %v490_v61 = vsel %vm489_vm9, %v484_v9, %v486_v56  ;;  %v491_v62 = vsel %vm489_vm9, %v486_v56, %v488_v20  ;;  %v5790_v9 = vand.u32 4294901760, %v643_v58  ;;  %v655_v20 = vand.u32 4294901760, %v459_v59 }
 0x11e   : > { %v657_v10 = vand.u32 4294901760, %v491_v62  ;;  %v659_v12 = vand.u32 4294901760, %v490_v61  ;;  %v553_v14 = vsel %vm441_vm5, %v549_v8, %v551_v22  ;;  %v5823_v22 = vsub.f32 %v460_v54, %v653_v16 }
 0x11f   : > { %v669_v32 = vand.u32 4294901760, %v553_v14  ;;  %v552_v54 = vsel %vm441_vm5, %v5756_v37, %v549_v8  ;;  %v5847_v2 = vsub.f32 %v459_v59, %v655_v20  ;;  %v753_v37 = vsub.f32 %v5792_v18, %v7867_v35 }
 0x120   : > { %v520_v24 = vpop.permute.xlu0 %519  ;;  %v5801_v38 = vpack.c.bf16 %v657_v10, %v653_v16  ;;  %v5806_v30 = vpack.c.bf16 %v659_v12, %v655_v20  ;;  %v5811_v33 = vsub.f32 %v491_v62, %v657_v10  ;;  %v597_v53 = vpop.permute.xlu1 %596  ;;  %v5830_v15 = vsub.f32 %v490_v61, %v659_v12 }
 0x121   : > { %v523_v36 = vsel %vm472_vm6, %v518_v17, %v520_v24  ;;  %v524_v13 = vsel %vm472_vm6, %v520_v24, %v522_v25  ;;  %v5815_v17 = vsub.f32 %v643_v58, %v5790_v9  ;;  %v8057_v61 = vand.u32 4294901760, %v5794_v19 }
 0x122   : > { %v665_v56 = vand.u32 4294901760, %v524_v13  ;;  %v667_v1 = vand.u32 4294901760, %v523_v36  ;;  %4774 = vmatprep.subr.bf16.mxu0 %v5801_v38  ;;  %v8059_v59 = vand.u32 4294901760, %v5797_v26  ;;  %v754_v63 = vand.u32 4294901760, %v753_v37 }
 0x123   : > { %4776 = vmatpush1.bf16.msra.mxu0 %v5806_v30  ;;  %v759_v12 = vsub.f32 %v5794_v19, %v8057_v61  ;;  %v5882_v60 = vsub.f32 %v553_v14, %v669_v32  ;;  %v8063_v47 = vand.u32 4294901760, %v5830_v15 }
 0x124   : > { %v569_v24 = vpop.permute.xlu0 %568  ;;  %v5819_v44 = vpack.c.bf16 %v665_v56, %v661_v48  ;;  %v5827_v10 = vpack.c.bf16 %v667_v1, %v663_v57  ;;  %v5836_v48 = vsub.f32 %v5787_v11, %v7864_v29  ;;  %v5840_v16 = vsub.f32 %v524_v13, %v665_v56  ;;  %v595_v35 = vpop.permute.xlu1 %594 }
 0x125   : > { %v572_v62 = vsel %vm570_vm12, %v5742_v7, %v569_v24  ;;  %v8058_v13 = vand.u32 4294901760, %v5804_v43  ;;  %v5864_v20 = vsub.f32 %v5797_v26, %v8059_v59  ;;  %v671_v24 = vand.u32 4294901760, %v552_v54 }
 0x126   : > { %v673_v25 = vand.u32 4294901760, %v572_v62  ;;  %4778 = vmatprep.subr.bf16.mxu0 %v5819_v44  ;;  %v5867_v4 = vsub.f32 %v523_v36, %v667_v1  ;;  %v8061_v59 = vand.u32 4294901760, %v5815_v17  ;;  %v760_v46 = vand.u32 4294901760, %v759_v12 }
 0x127   : > { %4780 = vmatpush1.bf16.msra.mxu0 %v5827_v10  ;;  %v731_v56 = vsub.f32 %v5804_v43, %v8058_v13  ;;  %v824_v57 = vand.u32 4294901760, %v5882_v60 }
 0x128   : > { %v565_v58 = vpop.permute.xlu0 %564  ;;  %v5850_v29 = vpack.c.bf16 %v673_v25, %v669_v32  ;;  %v742_v0 = vsub.f32 %v5815_v17, %v8061_v59  ;;  %v795_v59 = vsub.f32 %v5830_v15, %v8063_v47 }
 0x129   : > { %v571_v8 = vsel %vm570_vm12, %v565_v58, %v5742_v7  ;;  %v5870_v7 = vsub.f32 %v572_v62, %v673_v25  ;;  %v8060_v58 = vand.u32 4294901760, %v5811_v33  ;;  %v600_v25 = vsel %vm389_vm4, %v595_v35, %v597_v53 }
 0x12a   : > { %v675_v3 = vand.u32 4294901760, %v571_v8  ;;  %4782 = vmatprep.subr.bf16.mxu0 %v5850_v29  ;;  %v732_v32 = vand.u32 4294901760, %v731_v56  ;;  %v8066_v35 = vand.u32 4294901760, %v5771_v49  ;;  %v743_v41 = vand.u32 4294901760, %v742_v0 }
 0x12b   : > { %v789_v13 = vsub.f32 %v5811_v33, %v8060_v58  ;;  %v8062_v58 = vand.u32 4294901760, %v5823_v22  ;;  %v796_v55 = vand.u32 4294901760, %v795_v59  ;;  %v8069_v0 = vand.u32 4294901760, %v5870_v7 }
 0x12c   : > { %v599_v1 = vpop.permute.xlu0 %598  ;;  %v5880_v36 = vpack.c.bf16 %v675_v3, %v671_v24  ;;  %v5893_v52 = vsub.f32 %v571_v8, %v675_v3  ;;  %v5907_v3 = vand.u32 4294901760, %v600_v25  ;;  %v802_v8 = vand.u32 4294901760, %v5836_v48 }
 0x12d   : > { %v601_v62 = vsel %vm389_vm4, %v597_v53, %v599_v1  ;;  %v777_v61 = vsub.f32 %v5823_v22, %v8062_v58  ;;  %v790_v14 = vand.u32 4294901760, %v789_v13  ;;  %v8064_v53 = vand.u32 4294901760, %v5840_v16 }
 0x12e   : > { %v5895_v37 = vand.u32 4294901760, %v601_v62  ;;  %4784 = vmatpush1.bf16.msra.mxu0 %v5880_v36  ;;  %v8065_v1 = vand.u32 4294901760, %v5847_v2  ;;  %v5905_v58 = vsub.f32 %v552_v54, %v671_v24  ;;  %v4785_v56 = vpack.c.bf16 %v8066_v35, %v754_v63 }
 0x12f   : > { %v813_v12 = vsub.f32 %v5840_v16, %v8064_v53  ;;  %v778_v13 = vand.u32 4294901760, %v777_v61  ;;  %v8067_v53 = vand.u32 4294901760, %v5867_v4  ;;  %v8068_v24 = vand.u32 4294901760, %v5784_v6 }
 0x130   : > { %v783_v47 = vsub.f32 %v5847_v2, %v8065_v1  ;;  %678 = vmatprep.subr.mxu0 %v5895_v37  ;;  %v5922_v48 = vsub.f32 %v601_v62, %v5895_v37  ;;  %v837_v61 = vsub.f32 %v5870_v7, %v8069_v0  ;;  %v830_v35 = vand.u32 4294901760, %v5905_v58 }
 0x131   : > { %v819_v51 = vsub.f32 %v5867_v4, %v8067_v53  ;;  %v4787_v1 = vpack.c.bf16 %v8068_v24, %v760_v46  ;;  %v4789_v63 = vpack.c.bf16 %v790_v14, %v778_v13  ;;  %v814_v49 = vand.u32 4294901760, %v813_v12 }
 0x132   : > { %680 = vmatpush1.msra.mxu0 %v5907_v3  ;;  %v784_v53 = vand.u32 4294901760, %v783_v47  ;;  %v8070_v54 = vmov 0.0   ;;  %v808_v46 = vand.u32 4294901760, %v5864_v20  ;;  %v825_v6 = vsub.f32 %v5882_v60, %v824_v57 }
 0x133   : > { %4786 = vmatprep.subr.bf16.mxu0 %v4785_v56  ;;  %733 = vmatmul.mubr.f32.vlgmr.msra.gmra.mrb[0].mxu0 %v732_v32  ;;  %v5934_v62 = vsub.f32 %v600_v25, %v5907_v3  ;;  %v8071_v59 = vand.u32 4294901760, %v5893_v52  ;;  %v820_v12 = vand.u32 4294901760, %v819_v51  ;;  %v4793_v56 = vpack.c.bf16 %v814_v49, %v802_v8 }
 0x134   : > { %4788 = vmatpush1.bf16.msra.mxu0 %v4787_v1  ;;  %738 = vmatprep.mubr.f32.mxu0 %v8070_v54  ;;  %v4791_v14 = vpack.c.bf16 %v796_v55, %v784_v53  ;;  %v838_v47 = vand.u32 4294901760, %v837_v61  ;;  %v848_v13 = vand.u32 4294901760, %v5922_v48  ;;  %v831_v20 = vsub.f32 %v5905_v58, %v830_v35 }
 0x135   : > { %4790 = vmatprep.subr.bf16.mxu0 %v4789_v63  ;;  %v843_v32 = vsub.f32 %v5893_v52, %v8071_v59  ;;  %v826_v25 = vand.u32 4294901760, %v825_v6  ;;  %v854_v24 = vand.u32 4294901760, %v5934_v62  ;;  %v4795_v63 = vpack.c.bf16 %v820_v12, %v808_v46 }
 0x136   : > { %v849_v51 = vsub.f32 %v5922_v48, %v848_v13  ;;  %v4801_v53 = vpack.c.bf16 %v5746_v23, %v5792_v18  ;;  %v4803_v46 = vpack.c.bf16 %v5750_v31, %v5794_v19  ;;  %v4805_v6 = vpack.c.bf16 %v5811_v33, %v5823_v22 }
 0x137   : > { %744 = vmatmul.mubr.f32.gmra.mrb[2].mxu0 %v743_v41  ;;  %v844_v1 = vand.u32 4294901760, %v843_v32  ;;  %v4797_v55 = vpack.c.bf16 %v838_v47, %v826_v25  ;;  %v832_v41 = vand.u32 4294901760, %v831_v20  ;;  %v855_v8 = vsub.f32 %v5934_v62, %v854_v24 }
 0x138   : > { %4792 = vmatpush1.bf16.msra.mxu0 %v4791_v14  ;;  %904 = vmatprep.mubr.f32.mxu0 %v8070_v54  ;;  %v850_v0 = vand.u32 4294901760, %v849_v51  ;;  %v4807_v59 = vpack.c.bf16 %v5830_v15, %v5847_v2  ;;  %v4809_v32 = vpack.c.bf16 %v5840_v16, %v5787_v11  ;;  %v4811_v14 = vpack.c.bf16 %v5867_v4, %v5797_v26 }
 0x139   : > { %4794 = vmatprep.subr.bf16.mxu0 %v4793_v56  ;;  %v4799_v49 = vpack.c.bf16 %v844_v1, %v832_v41  ;;  %v856_v61 = vand.u32 4294901760, %v855_v8  ;;  %v4813_v12 = vpack.c.bf16 %v5870_v7, %v5882_v60  ;;  %v4815_v56 = vpack.c.bf16 %v5893_v52, %v5905_v58 }
 0x13a   : > { %v8072_v47 = vand.u32 4294901760, %v5792_v18  ;;  %v8073_v20 = vand.u32 4294901760, %v5746_v23  ;;  %v8074_v1 = vand.u32 4294901760, %v5794_v19  ;;  %v8076_v51 = vand.u32 4294901760, %v5804_v43 }
 0x13b   : > { %v8077_v41 = vand.u32 4294901760, %v5823_v22  ;;  %v8078_v8 = vand.u32 4294901760, %v5811_v33  ;;  %v8079_v23 = vand.u32 4294901760, %v5847_v2  ;;  %v8080_v18 = vand.u32 4294901760, %v5830_v15 }
 0x13c   : > { %4796 = vmatpush1.bf16.msra.mxu0 %v4795_v63  ;;  %v4833_v25 = vpack.c.bf16 %v8073_v20, %v8072_v47  ;;  %v8075_v63 = vand.u32 4294901760, %v5750_v31  ;;  %v8081_v31 = vand.u32 4294901760, %v5787_v11  ;;  %v8084_v33 = vand.u32 4294901760, %v5797_v26  ;;  %v636_v26 = vpop.permute.xlu1 %635 }
 0x13d   : > { %4798 = vmatprep.subr.bf16.mxu0 %v4797_v55  ;;  %v4839_v19 = vpack.c.bf16 %v8080_v18, %v8079_v23  ;;  %v8085_v22 = vand.u32 4294901760, %v5867_v4  ;;  %v8086_v15 = vand.u32 4294901760, %v5870_v7  ;;  %v8095_v18 = vld [vmem:[#allocation16_spill] sm:$0xff] }
 0x13e   : > { %v4835_v55 = vpack.c.bf16 %v8075_v63, %v8074_v1 }
 0x13f   : > { %v4843_v2 = vpack.c.bf16 %v8085_v22, %v8084_v33  ;;  %v4845_v11 = vpack.c.bf16 %v8086_v15, %v824_v57 }
 0x140   : > { %4800 = vmatpush1.bf16.msra.mxu0 %v4799_v49  ;;  %v4837_v49 = vpack.c.bf16 %v8078_v8, %v8077_v41  ;;  %v8094_v8 = vld [vmem:[#allocation18_spill] sm:$0xff] }
 0x141   : > { %851 = vmatprep.subr.mxu0 %v850_v0  ;;  %v8082_v0 = vand.u32 4294901760, %v5840_v16 }
 0x144   : > { %857 = vmatpush1.msra.mxu0 %v856_v61  ;;  %v8083_v61 = vand.u32 4294901760, %v5815_v17 }
 0x145   : > { %4802 = vmatprep.subr.bf16.mxu0 %v4801_v53  ;;  %906 = vmatmul.mubr.f32.vlgmr.msra.gmra.mrb[0].mxu0 %v5779_v5 }
 0x146   : > { %4804 = vmatpush1.bf16.msra.mxu0 %v4803_v46  ;;  %911 = vmatprep.mubr.f32.mxu0 %v8070_v54 }
 0x147   : > { %4806 = vmatprep.subr.bf16.mxu0 %v4805_v6 }
 0x149   : > { %913 = vmatmul.mubr.f32.gmra.mrb[2].mxu0 %v5790_v9 }
 0x14a   : > { %4808 = vmatpush1.bf16.msra.mxu0 %v4807_v59  ;;  %1019 = vmatprep.mubr.f32.mxu0 %v8070_v54 }
 0x14b   : > { %4810 = vmatprep.subr.bf16.mxu0 %v4809_v32 }
 0x14e   : > { %4812 = vmatpush1.bf16.msra.mxu0 %v4811_v14 }
 0x14f   : > { %4814 = vmatprep.subr.bf16.mxu0 %v4813_v12 }
 0x152   : > { %4816 = vmatpush1.bf16.msra.mxu0 %v4815_v56 }
 0x153   : > { %969 = vmatprep.subr.mxu0 %v5922_v48 }
 0x156   : > { %972 = vmatpush1.msra.mxu0 %v5934_v62 }
 0x157   : > { %4818 = vmatprep.subr.bf16.mxu0 %v5758_v39  ;;  %1022 = vmatmul.mubr.f32.vlgmr.msra.gmra.mrb[0].mxu0 %v5804_v43  ;;  %v4841_v43 = vpack.c.bf16 %v8082_v0, %v8081_v31 }
 0x158   : > { %4820 = vmatpush1.bf16.msra.mxu0 %v5760_v42  ;;  %1027 = vmatprep.mubr.f32.mxu0 %v8070_v54 }
 0x159   : > { %4822 = vmatprep.subr.bf16.mxu0 %v5801_v38 }
 0x15b   : > { %1030 = vmatmul.mubr.f32.gmra.mrb[2].mxu0 %v5815_v17  ;;  %v8087_v17 = vand.u32 4294901760, %v5893_v52  ;;  %v631_v52 = vpop.permute.xlu0 %630 }
 0x15c   : > { %4824 = vmatpush1.bf16.msra.mxu0 %v5806_v30  ;;  %1118 = vmatprep.mubr.f32.mxu0 %v8070_v54 }
 0x15d   : > { %4826 = vmatprep.subr.bf16.mxu0 %v5819_v44  ;;  %v4847_v16 = vpack.c.bf16 %v8087_v17, %v830_v35 }
 0x160   : > { %4828 = vmatpush1.bf16.msra.mxu0 %v5827_v10 }
 0x161   : > { %4830 = vmatprep.subr.bf16.mxu0 %v5850_v29 }
 0x164   : > { %4832 = vmatpush1.bf16.msra.mxu0 %v5880_v36 }
 0x165   : > { %1069 = vmatprep.subr.mxu0 %v5895_v37 }
 0x168   : > { %1071 = vmatpush1.msra.mxu0 %v5907_v3 }
 0x169   : > { %4834 = vmatprep.subr.bf16.mxu0 %v4833_v25  ;;  %1122 = vmatmul.mubr.f32.vlgmr.msra.gmra.mrb[0].mxu0 %v8076_v51 }
 0x16a   : > { %4836 = vmatpush1.bf16.msra.mxu0 %v4835_v55  ;;  %1127 = vmatprep.mubr.f32.mxu0 %v8070_v54 }
 0x16b   : > { %4838 = vmatprep.subr.bf16.mxu0 %v4837_v49 }
 0x16d   : > { %1131 = vmatmul.mubr.f32.gmra.mrb[2].mxu0 %v8083_v61  ;;  %v8096_v61 = vld [vmem:[#allocation11_spill] sm:$0xff] }
 0x16e   : > { %4840 = vmatpush1.bf16.msra.mxu0 %v4839_v19  ;;  %1255 = vmatprep.mubr.f32.mxu0 %v8070_v54 }
 0x16f   : > { %4842 = vmatprep.subr.bf16.mxu0 %v4841_v43 }
 0x172   : > { %4844 = vmatpush1.bf16.msra.mxu0 %v4843_v2 }
 0x173   : > { %4846 = vmatprep.subr.bf16.mxu0 %v4845_v11  ;;  %v8097_v11 = vld [vmem:[#allocation17_spill] sm:$0xff] }
 0x176   : > { %4848 = vmatpush1.bf16.msra.mxu0 %v4847_v16 }
 0x177   : > { %1204 = vmatprep.subr.mxu0 %v848_v13 }
 0x17a   : > { %1208 = vmatpush1.msra.mxu0 %v854_v24 }
 0x17b   : > { %4850 = vmatprep.subr.bf16.mxu0 %v5758_v39  ;;  %1257 = vmatmul.mubr.f32.vlgmr.msra.gmra.mrb[0].mxu0 %v5779_v5 }
 0x17c   : > { %4852 = vmatpush1.bf16.msra.mxu0 %v5760_v42  ;;  %1262 = vmatprep.mubr.f32.mxu0 %v8070_v54 }
 0x17d   : > { %4854 = vmatprep.subr.bf16.mxu0 %v5801_v38 }
 0x17f   : > { %1264 = vmatmul.mubr.f32.gmra.mrb[2].mxu0 %v5790_v9 }
 0x180   : > { %4856 = vmatpush1.bf16.msra.mxu0 %v5806_v30  ;;  %1352 = vmatprep.mubr.f32.mxu0 %v8070_v54 }
 0x181   : > { %4858 = vmatprep.subr.bf16.mxu0 %v5819_v44 }
 0x184   : > { %4860 = vmatpush1.bf16.msra.mxu0 %v5827_v10 }
 0x185   : > { %4862 = vmatprep.subr.bf16.mxu0 %v5850_v29 }
 0x188   : > { %4864 = vmatpush1.bf16.msra.mxu0 %v5880_v36 }
 0x189   : > { %1303 = vmatprep.subr.mxu0 %v5895_v37 }
 0x18c   : > { %1305 = vmatpush1.msra.mxu0 %v5907_v3 }
 0x18d   : > { %1354 = vmatmul.mubr.f32.vlgmr.msra.gmra.mrb[0].mxu0 %v5779_v5 }
 0x18e   : > { %1359 = vmatprep.mubr.f32.mxu0 %v8070_v54 }
 0x191   : > { %1361 = vmatmul.mubr.f32.gmra.mrb[2].mxu0 %v5790_v9 }
 0x260   : > { %v1355_v60 = vpop.f32.mrb[0].mxu0 }
 0x261   : > { %v5321_v4 = vadd.f32 %v1355_v60, %v631_v52  ;;  %v1357_v39 = vpop.f32.mrb[1].mxu0 }
 0x262   : > { %v5322_v42 = vadd.f32 %v1357_v39, %v631_v52  ;;  %v8098_v52 = vld [vmem:[#allocation14_spill] sm:$0xff] }
 0x263   : > { %vm1367_vm13 = vcmp.ge.f32.partialorder %v5321_v4, 0.0  ;;  %v1371_v44 = vmul.f32 0.2, %v5321_v4 }
 0x264   : > { %vm1368_vm14 = vcmp.ge.f32.partialorder %v5322_v42, 0.0  ;;  %v1372_v38 = vmul.f32 0.2, %v5322_v42  ;;  %v1362_v30 = vpop.f32.mrb[2].mxu0 }
 0x265   : > { %v6046_v29 = vsel %vm1367_vm13, %v5321_v4, %v1371_v44  ;;  %v5323_v10 = vadd.f32 %v1362_v30, %v636_v26  ;;  %v1364_v57 = vpop.f32.mrb[3].mxu0  ;;  %v1755_v4 = vld [vmem:[%s7852_s4] sm:$0xff]  ;;  %v8099_v44 = vld [vmem:[#allocation19_spill] sm:$0xff]  ;;  %v1402_v30 = vpop.permute.xlu1 %1401 }
 0x266   : > { %8088 = vst [vmem:[#allocation24_spill] sm:$0xff] %v6046_v29  ;;  %v6048_v5 = vsel %vm1368_vm14, %v5322_v42, %v1372_v38  ;;  %v5324_v7 = vadd.f32 %v1364_v57, %v636_v26  ;;  %1439 = vrot.lane.b32.xlu1 %v6046_v29, %s5499_s22  ;;  %v1390_v37 = vmul.f32 %v6046_v29, %v5636_v40  ;;  %v7893_v53 = vand.u32 4294901760, %v6046_v29  ;;  %v8100_v26 = vld [vmem:[#allocation13_spill] sm:$0xff]  ;;  %v1716_v57 = vld [vmem:[%s7851_s3 + $0x8] sm:$0xff] }
 0x267   : > { %8089 = vst [vmem:[#allocation25_spill] sm:$0xff] %v6048_v5  ;;  %v1373_v9 = vmul.f32 0.2, %v5323_v10  ;;  %1441 = vrot.lane.b32.xlu0 %v6048_v5, %s5499_s22  ;;  %vm1369_vm15 = vcmp.ge.f32.partialorder %v5323_v10, 0.0  ;;  %v1468_v58 = vmul.f32 %v6046_v29, %v5647_v45  ;;  %v1469_v35 = vmul.f32 %v5612_v28, %v6048_v5 }
 0x268   : > { %vm1370_vm0 = vcmp.ge.f32.partialorder %v5324_v7, 0.0  ;;  %v1374_v36 = vmul.f32 0.2, %v5324_v7  ;;  %v1510_v62 = vmul.f32 %v6046_v29, %v5662_v50  ;;  %v7895_v13 = vand.u32 4294901760, %v6048_v5 }
 0x269   : > { %v6059_v3 = vsel %vm1369_vm15, %v5323_v10, %v1373_v9  ;;  %v1511_v6 = vmul.f32 %v5623_v34, %v6048_v5  ;;  %v1559_v14 = vmul.f32 %v5610_v27, %v6046_v29  ;;  %v6091_v12 = vsub.f32 %v6046_v29, %v7893_v53  ;;  %v8102_v10 = vld [vmem:[#allocation20_spill] sm:$0xff] }
 0x26a   : > { %1403 = vrot.lane.b32.xlu1 %v1390_v37, %s5498_s21  ;;  %8090 = vst [vmem:[#allocation26_spill] sm:$0xff] %v6059_v3  ;;  %v6061_v48 = vsel %vm1370_vm0, %v5324_v7, %v1374_v36  ;;  %v7892_v46 = vand.u32 4294901760, %v6059_v3  ;;  %v6079_v59 = vsub.f32 %v6048_v5, %v7895_v13  ;;  %v1391_v55 = vmul.f32 %v5602_v21, %v6048_v5  ;;  %v5458_v7 = vpop.permute.xlu1 %5457 }
 0x26b   : > { %8091 = vst [vmem:[#allocation27_spill] sm:$0xff] %v6061_v48  ;;  %1481 = vrot.lane.b32.xlu0 %v1468_v58, %s5497_s20  ;;  %v7894_v24 = vand.u32 4294901760, %v6061_v48  ;;  %v7888_v25 = vand.u32 4294901760, %v6091_v12  ;;  %v1393_v41 = vmul.f32 %v6059_v3, %v5636_v40  ;;  %v1560_v49 = vmul.f32 %v6048_v5, %v8094_v8  ;;  %v8103_v58 = vld [vmem:[#allocation21_spill] sm:$0xff] }
 0x26c   : > { %v6096_v56 = vsub.f32 %v6059_v3, %v7892_v46  ;;  %v7890_v47 = vand.u32 4294901760, %v6079_v59  ;;  %v1562_v23 = vmul.f32 %v5610_v27, %v6059_v3  ;;  %v1602_v19 = vmul.f32 %v6048_v5, %v8095_v18 }
 0x26d   : > { %v6084_v32 = vsub.f32 %v6061_v48, %v7894_v24  ;;  %v1472_v31 = vmul.f32 %v5612_v28, %v6061_v48  ;;  %v1514_v0 = vmul.f32 %v5623_v34, %v6061_v48  ;;  %v1471_v43 = vmul.f32 %v6059_v3, %v5647_v45 }
 0x26e   : > { %1483 = vrot.lane.b32.xlu1 %v1469_v35, %s5497_s20  ;;  %v7889_v1 = vand.u32 4294901760, %v6096_v56  ;;  %v1604_v33 = vmul.f32 %v8096_v61, %v6059_v3  ;;  %v1513_v22 = vmul.f32 %v6059_v3, %v5662_v50  ;;  %v1394_v2 = vmul.f32 %v5602_v21, %v6061_v48 }
 0x26f   : > { %1523 = vrot.lane.b32.xlu0 %v1510_v62, %s5496_s16  ;;  %v7891_v20 = vand.u32 4294901760, %v6084_v32  ;;  %v1601_v15 = vmul.f32 %v8096_v61, %v6046_v29  ;;  %v1680_v17 = vmul.f32 %v6048_v5, %v8097_v11  ;;  %v1683_v16 = vmul.f32 %v6061_v48, %v8097_v11  ;;  %v1756_v62 = vld [vmem:[%s7852_s4 + $0x8] sm:$0xff] }
 0x270   : > { %v6116_v51 = vpack.c.bf16 %v7889_v1, %v7888_v25  ;;  %v1679_v60 = vmul.f32 %v8098_v52, %v6046_v29  ;;  %v1563_v39 = vmul.f32 %v6061_v48, %v8094_v8  ;;  %v1605_v42 = vmul.f32 %v6061_v48, %v8095_v18 }
 0x271   : > { %v6108_v63 = vpack.c.bf16 %v7891_v20, %v7890_v47  ;;  %v6187_v38 = vmul.f32 0.0, %v8100_v26  ;;  %v1768_v9 = vsel %vm425_vm10, %v1716_v57, 0  ;;  %v1682_v36 = vmul.f32 %v8098_v52, %v6059_v3 }
 0x272   : > { %1525 = vrot.lane.b32.xlu1 %v1511_v6, %s5496_s16  ;;  %8093 = vst [vmem:[#allocation29_spill] sm:$0xff] %v6116_v51  ;;  %v6203_v37 = vand.u32 4294901760, %v1768_v9 }
 0x273   : > { %1571 = vrot.lane.b32.xlu0 %v1559_v14, %s5493_s8  ;;  %8092 = vst [vmem:[#allocation28_spill] sm:$0xff] %v6108_v63  ;;  %8101 = vst [vmem:[#allocation19_spill] sm:$0xff] %v6187_v38  ;;  %v6215_v14 = vpop.permute.xlu1 %1485 }
 0x274   : > { %v6209_v35 = vsub.f32 %v1768_v9, %v6203_v37  ;;  %v5460_v9 = vunpack.i.h.bf16 %v5458_v7 }
 0x276   : > { %1445 = vrot.lane.b32.xlu1 %v6059_v3, %s5499_s22  ;;  %8104 = vst [vmem:[#allocation13_spill] sm:$0xff] %v6209_v35  ;;  %v7887_v6 = vand.u32 4294901760, %v6209_v35 }
 0x277   : > { %1405 = vrot.lane.b32.xlu0 %v1391_v55, %s5498_s21  ;;  %v8105_v55 = vld [vmem:[#allocation22_spill] sm:$0xff] }
 0x27a   : > { %1409 = vrot.lane.b32.xlu1 %v1393_v41, %s5498_s21  ;;  %v1876_v41 = vsub.f32 %v6209_v35, %v7887_v6 }
 0x27b   : > { %1573 = vrot.lane.b32.xlu0 %v1560_v49, %s5493_s8 }
 0x27c   : > { %v1877_v49 = vand.u32 4294901760, %v1876_v41 }
 0x27e   : > { %1577 = vrot.lane.b32.xlu1 %v1562_v23, %s5493_s8  ;;  %1878 = vmatprep.mubr.f32.mxu1 %v1877_v49  ;;  %v6226_v23 = vpop.permute.xlu1 %1527 }
 0x27f   : > { %1615 = vrot.lane.b32.xlu0 %v1602_v19, %s5495_s15  ;;  %v8106_v19 = vld [vmem:[#allocation23_spill] sm:$0xff] }
 0x282   : > { %1489 = vrot.lane.b32.xlu1 %v1472_v31, %s5497_s20  ;;  %v6232_v31 = vpop.permute.xlu1 %1575 }
 0x283   : > { %1447 = vrot.lane.b32.xlu0 %v6061_v48, %s5499_s22 }
 0x286   : > { %1531 = vrot.lane.b32.xlu1 %v1514_v0, %s5496_s16  ;;  %v6238_v0 = vpop.permute.xlu1 %1581 }
 0x287   : > { %1487 = vrot.lane.b32.xlu0 %v1471_v43, %s5497_s20  ;;  %v1408_v43 = vpop.permute.xlu0 %1407 }
 0x28a   : > { %1619 = vrot.lane.b32.xlu1 %v1604_v33, %s5495_s15  ;;  %v6240_v33 = vpop.permute.xlu1 %1617 }
 0x28b   : > { %1529 = vrot.lane.b32.xlu0 %v1513_v22, %s5496_s16  ;;  %v1480_v22 = vpop.permute.xlu0 %1479 }
 0x28e   : > { %5462 = vrot.lane.b32.xlu1 %v8070_v54, %s5500_s23 }
 0x28f   : > { %1411 = vrot.lane.b32.xlu0 %v1394_v2, %s5498_s21  ;;  %v6242_v2 = vpop.permute.xlu1 %1623 }
 0x292   : > { %1649 = vrot.lane.b32.xlu1 %v6046_v29, %s5500_s23 }
 0x293   : > { %1613 = vrot.lane.b32.xlu0 %v1601_v15, %s5495_s15  ;;  %v1522_v15 = vpop.permute.xlu0 %1521 }
 0x296   : > { %1693 = vrot.lane.b32.xlu1 %v1680_v17, %s5494_s13 }
 0x297   : > { %1651 = vrot.lane.b32.xlu0 %v6048_v5, %s5500_s23 }
 0x29a   : > { %1699 = vrot.lane.b32.xlu1 %v1683_v16, %s5494_s13 }
 0x29b   : > { %1657 = vrot.lane.b32.xlu0 %v6061_v48, %s5500_s23 }
 0x29e   : > { %1691 = vrot.lane.b32.xlu1 %v1679_v60, %s5494_s13 }
 0x29f   : > { %1655 = vrot.lane.b32.xlu0 %v6059_v3, %s5500_s23 }
 0x2a2   : > { %1759 = vperm.xlu1 %5455, %v1755_v4  }
 0x2a3   : > { %1579 = vrot.lane.b32.xlu0 %v1563_v39, %s5493_s8 }
 0x2a6   : > { %2789 = vrot.lane.b32.xlu1 %v8099_v44, %s5498_s21 }
 0x2a7   : > { %1621 = vrot.lane.b32.xlu0 %v1605_v42, %s5495_s15 }
 0x2aa   : > { %5467 = vrot.lane.b32.xlu1 %v8070_v54, %s5499_s22 }
 0x2ab   : > { %1695 = vrot.lane.b32.xlu0 %v6187_v38, %s5494_s13 }
 0x2ae   : > { %2873 = vrot.lane.b32.xlu1 %v8102_v10, %s5497_s20 }
 0x2af   : > { %1701 = vrot.lane.b32.xlu0 %v6187_v38, %s5494_s13 }
 0x2b2   : > { %2915 = vrot.lane.b32.xlu1 %v8103_v58, %s5496_s16 }
 0x2b3   : > { %1697 = vrot.lane.b32.xlu0 %v1682_v36, %s5494_s13 }
 0x2b6   : > { %2963 = vrot.lane.b32.xlu1 %v8105_v55, %s5493_s8 }
 0x2b7   : > { %1764 = vperm.xlu0 %5454, %v1756_v62  }
 0x2ba   : > { %2969 = vrot.lane.b32.xlu1 %v8105_v55, %s5493_s8 }
 0x2bb   : > { %2795 = vrot.lane.b32.xlu0 %v8099_v44, %s5498_s21  ;;  %v5459_v44 = vunpack.i.l.bf16 %v5458_v7 }
 0x2be   : > { %3005 = vrot.lane.b32.xlu1 %v8106_v19, %s5495_s15 }
 0x2bf   : > { %2867 = vrot.lane.b32.xlu0 %v8102_v10, %s5497_s20 }
 0x2c2   : > { %3011 = vrot.lane.b32.xlu1 %v8106_v19, %s5495_s15 }
 0x2c3   : > { %2909 = vrot.lane.b32.xlu0 %v8103_v58, %s5496_s16 }
 0x2d8   : > { %v1440_v17 = vpop.permute.xlu1 %1439 }
 0x2d9   : > { %v1442_v16 = vpop.permute.xlu0 %1441  ;;  %v6245_v26 = vsel %vm425_vm10, %v5459_v44, %v1440_v17 }
 0x2da   : > { %v7897_v36 = vand.u32 4294901760, %v6245_v26  ;;  %v6289_v53 = vsel %vm425_vm10, %v1440_v17, %v1442_v16 }
 0x2dc   : > { %v1404_v60 = vpop.permute.xlu1 %1403  ;;  %v6260_v19 = vsub.f32 %v6245_v26, %v7897_v36 }
 0x2dd   : > { %v1482_v4 = vpop.permute.xlu0 %1481  ;;  %v6251_v58 = vsel %vm406_vm8, %v1402_v30, %v1404_v60 }
 0x2de   : > { %v7899_v44 = vand.u32 4294901760, %v6251_v58  ;;  %v7903_v47 = vand.u32 4294901760, %v6260_v19  ;;  %v6318_v18 = vsel %vm458_vm7, %v1480_v22, %v1482_v4 }
 0x2e0   : > { %v1484_v39 = vpop.permute.xlu1 %1483  ;;  %v6279_v20 = vsub.f32 %v6251_v58, %v7899_v44 }
 0x2e1   : > { %v1524_v42 = vpop.permute.xlu0 %1523  ;;  %v6313_v11 = vsel %vm458_vm7, %v1482_v4, %v1484_v39 }
 0x2e2   : > { %v7910_v36 = vand.u32 4294901760, %v6279_v20 }
 0x2e4   : > { %v1526_v10 = vpop.permute.xlu1 %1525 }
 0x2e5   : > { %v6247_v57 = vpop.permute.xlu0 %1571  ;;  %v6321_v8 = vsel %vm489_vm9, %v1524_v42, %v1526_v10 }
 0x2e8   : > { %v1446_v62 = vpop.permute.xlu1 %1445 }
 0x2e9   : > { %v6254_v55 = vsel %vm425_vm10, %v5460_v9, %v1446_v62  ;;  %v1406_v41 = vpop.permute.xlu0 %1405 }
 0x2ea   : > { %v7896_v49 = vand.u32 4294901760, %v6254_v55  ;;  %v1414_v22 = vsel %vm406_vm8, %v1404_v60, %v1406_v41 }
 0x2ec   : > { %v6266_v7 = vsub.f32 %v6254_v55, %v7896_v49  ;;  %v1410_v30 = vpop.permute.xlu1 %1409 }
 0x2ed   : > { %v6269_v6 = vsel %vm406_vm8, %v1408_v43, %v1410_v30  ;;  %v6271_v9 = vpop.permute.xlu0 %1573 }
 0x2ee   : > { %v7904_v25 = vand.u32 4294901760, %v6266_v7  ;;  %v7898_v1 = vand.u32 4294901760, %v6269_v6 }
 0x2f0   : > { %v6284_v46 = vsub.f32 %v6269_v6, %v7898_v1  ;;  %v6286_v43 = vpop.permute.xlu1 %1577  ;;  %v6297_v13 = vpack.c.bf16 %v7904_v25, %v7903_v47  ;;  %v1781_v1 = vand.u32 4294901760, %v6289_v53 }
 0x2f1   : > { %v6291_v24 = vpop.permute.xlu0 %1615 }
 0x2f2   : > { %8107 = vst [vmem:[#allocation20_spill] sm:$0xff] %v6297_v13  ;;  %v7911_v49 = vand.u32 4294901760, %v6284_v46  ;;  %v6310_v47 = vsub.f32 %v6289_v53, %v1781_v1 }
 0x2f4   : > { %v1490_v44 = vpop.permute.xlu1 %1489  ;;  %v6306_v17 = vpack.c.bf16 %v7911_v49, %v7910_v36  ;;  %v1789_v36 = vand.u32 4294901760, %v6313_v11  ;;  %v8109_v41 = vand.u32 4294901760, %v6310_v47 }
 0x2f5   : > { %v1448_v38 = vpop.permute.xlu0 %1447 }
 0x2f6   : > { %8108 = vst [vmem:[#allocation21_spill] sm:$0xff] %v6306_v17  ;;  %v1452_v16 = vsel %vm425_vm10, %v1446_v62, %v1448_v38  ;;  %v6358_v4 = vsub.f32 %v6313_v11, %v1789_v36 }
 0x2f7   : > { %v1785_v52 = vand.u32 4294901760, %v1452_v16 }
 0x2f8   : > { %v1532_v25 = vpop.permute.xlu1 %1531  ;;  %v8120_v51 = vand.u32 4294901760, %v6358_v4 }
 0x2f9   : > { %v6315_v54 = vsub.f32 %v1452_v16, %v1785_v52  ;;  %v1488_v61 = vpop.permute.xlu0 %1487 }
 0x2fa   : > { %v6325_v38 = vsel %vm458_vm7, %v6215_v14, %v1488_v61  ;;  %v6328_v53 = vsel %vm458_vm7, %v1488_v61, %v1490_v44  ;;  %v6338_v14 = vsel %vm489_vm9, %v1522_v15, %v1524_v42  ;;  %v1773_v42 = vand.u32 4294901760, %v1414_v22 }
 0x2fb   : > { %v1793_v39 = vand.u32 4294901760, %v6328_v53  ;;  %v8110_v10 = vand.u32 4294901760, %v6315_v54  ;;  %v8112_v21 = vand.u32 4294901760, %v6325_v38  ;;  %v8115_v40 = vand.u32 4294901760, %v6338_v14 }
 0x2fc   : > { %v6344_v62 = vpop.permute.xlu1 %1619  ;;  %v6384_v28 = vsub.f32 %v1414_v22, %v1773_v42 }
 0x2fd   : > { %v1530_v44 = vpop.permute.xlu0 %1529  ;;  %v6342_v49 = vsub.f32 %v6328_v53, %v1793_v39  ;;  %v6355_v15 = vpack.c.bf16 %v8110_v10, %v8109_v41  ;;  %v8114_v10 = vand.u32 4294901760, %v6321_v8 }
 0x2fe   : > { %v6348_v16 = vsel %vm489_vm9, %v6226_v23, %v1530_v44  ;;  %v1536_v60 = vsel %vm489_vm9, %v1530_v44, %v1532_v25  ;;  %v6364_v23 = vsub.f32 %v6325_v38, %v8112_v21  ;;  %v8113_v44 = vand.u32 4294901760, %v6318_v18 }
 0x2ff   : > { %8111 = vst [vmem:[#allocation22_spill] sm:$0xff] %v6355_v15  ;;  %v1801_v61 = vand.u32 4294901760, %v1536_v60  ;;  %v1803_v25 = vand.u32 4294901760, %v6348_v16  ;;  %v6375_v41 = vsub.f32 %v6321_v8, %v8114_v10  ;;  %v6390_v10 = vsub.f32 %v6338_v14, %v8115_v40 }
 0x300   : > { %v6370_v27 = vsub.f32 %v6318_v18, %v8113_v44  ;;  %v5463_v34 = vpop.permute.xlu1 %5462  ;;  %v8117_v40 = vand.u32 4294901760, %v6251_v58  ;;  %v8118_v15 = vand.u32 4294901760, %v6269_v6  ;;  %v8191_v35 = vand.u32 4294901760, %v6342_v49 }
 0x301   : > { %v6377_v11 = vsub.f32 %v1536_v60, %v1801_v61  ;;  %v1412_v53 = vpop.permute.xlu0 %1411  ;;  %v6381_v21 = vsub.f32 %v6348_v16, %v1803_v25  ;;  %v7926_v63 = vand.u32 4294901760, %v6375_v41  ;;  %v5464_v13 = vunpack.i.l.bf16 %v5463_v34 }
 0x302   : > { %v1416_v50 = vsel %vm406_vm8, %v1410_v30, %v1412_v53  ;;  %v6405_v60 = vpack.c.bf16 %v8118_v15, %v8117_v40  ;;  %v8121_v16 = vand.u32 4294901760, %v6342_v49  ;;  %v8124_v6 = vand.u32 4294901760, %v6370_v27 }
 0x303   : > { %v1777_v45 = vand.u32 4294901760, %v1416_v50  ;;  %v8125_v15 = vand.u32 4294901760, %v6364_v23 }
 0x304   : > { %8119 = vst [vmem:[#allocation30_spill] sm:$0xff] %v6405_v60  ;;  %v6411_v17 = vpack.c.bf16 %v8121_v16, %v8120_v51  ;;  %v8127_v51 = vand.u32 4294901760, %v6377_v11 }
 0x305   : > { %v6396_v30 = vsub.f32 %v1416_v50, %v1777_v45  ;;  %v1614_v22 = vpop.permute.xlu0 %1613  ;;  %v6398_v53 = vpack.c.bf16 %v1777_v45, %v1773_v42  ;;  %v7929_v50 = vand.u32 4294901760, %v6384_v28  ;;  %v6416_v42 = vpack.c.bf16 %v1785_v52, %v1781_v1  ;;  %v1715_v52 = vld [vmem:[%s7851_s3] sm:$0xff] }
 0x306   : > { %8122 = vst [vmem:[#allocation31_spill] sm:$0xff] %v6411_v17  ;;  %v6424_v40 = vpack.c.bf16 %v8125_v15, %v8124_v6  ;;  %v6430_v16 = vpack.c.bf16 %v8127_v51, %v7926_v63  ;;  %v5465_v6 = vunpack.i.h.bf16 %v5463_v34  ;;  %v1650_v15 = vpop.permute.xlu1 %1649  ;;  %v8130_v51 = vand.u32 4294901760, %v6245_v26 }
 0x307   : > { %8116 = vst [vmem:[#allocation23_spill] sm:$0xff] %v6398_v53  ;;  %v7930_v45 = vand.u32 4294901760, %v6396_v30  ;;  %4866 = vmatprep.subr.bf16.mxu1 %v6398_v53  ;;  %8123 = vst [vmem:[#allocation32_spill] sm:$0xff] %v6416_v42  ;;  %v8131_v63 = vand.u32 4294901760, %v6254_v55  ;;  %v8134_v17 = vand.u32 4294901760, %v6381_v21  ;;  %v6461_v34 = vand.u32 4294901760, %v1715_v52 }
 0x308   : > { %4868 = vmatpush1.bf16.msra.mxu1 %v6405_v60  ;;  %8126 = vst [vmem:[#allocation33_spill] sm:$0xff] %v6424_v40  ;;  %8128 = vst [vmem:[#allocation34_spill] sm:$0xff] %v6430_v16  ;;  %v8133_v40 = vand.u32 4294901760, %v6390_v10  ;;  %v8137_v55 = vand.u32 4294901760, %v6318_v18  ;;  %v1584_v18 = vsel %vm472_vm6, %v6271_v9, %v6232_v31  ;;  %v8143_v31 = vand.u32 4294901760, %v6338_v14 }
 0x309   : > { %4870 = vmatprep.subr.bf16.mxu1 %v6416_v42  ;;  %v1652_v1 = vpop.permute.xlu0 %1651  ;;  %v6440_v44 = vpack.c.bf16 %v7930_v45, %v7929_v50  ;;  %v6449_v16 = vpack.c.bf16 %v8131_v63, %v8130_v51  ;;  %v6458_v45 = vpack.c.bf16 %v1793_v39, %v1789_v36  ;;  %v8140_v51 = vand.u32 4294901760, %v6321_v8 }
 0x30a   : > { %v6443_v58 = vsel %vm570_vm12, %v1652_v1, %v5464_v13  ;;  %v6455_v42 = vpack.c.bf16 %v8134_v17, %v8133_v40  ;;  %v1718_v13 = vld [vmem:[%s7851_s3 + $0x18] sm:$0xff]  ;;  %v8138_v17 = vand.u32 4294901760, %v6325_v38  ;;  %v6490_v38 = vpop.permute.xlu1 %1693 }
 0x30b   : > { %8129 = vst [vmem:[#allocation35_spill] sm:$0xff] %v6440_v44  ;;  %8132 = vst [vmem:[#allocation36_spill] sm:$0xff] %v6449_v16  ;;  %v7931_v50 = vand.u32 4294901760, %v6443_v58  ;;  %v8146_v44 = vand.u32 4294901760, %v6061_v48 }
 0x30c   : > { %8135 = vst [vmem:[#allocation37_spill] sm:$0xff] %v6455_v42  ;;  %8136 = vst [vmem:[#allocation38_spill] sm:$0xff] %v6458_v45  ;;  %4872 = vmatpush1.bf16.msra.mxu1 %v6449_v16  ;;  %v6474_v36 = vpack.c.bf16 %v8138_v17, %v8137_v55  ;;  %v6484_v42 = vpack.c.bf16 %v1801_v61, %v8140_v51  ;;  %v6494_v55 = vsub.f32 %v1715_v52, %v6461_v34  ;;  %v1717_v52 = vld [vmem:[%s7851_s3 + $0x10] sm:$0xff] }
 0x30d   : > { %4874 = vmatprep.subr.bf16.mxu1 %v6458_v45  ;;  %v1658_v63 = vpop.permute.xlu0 %1657  ;;  %v6479_v39 = vsub.f32 %v6443_v58, %v7931_v50  ;;  %v1583_v17 = vsel %vm472_vm6, %v6247_v57, %v6271_v9  ;;  %v1813_v50 = vand.u32 4294901760, %v1584_v18  ;;  %v1626_v57 = vsel %vm441_vm5, %v6291_v24, %v6240_v33 }
 0x30e   : > { %v6468_v26 = vsel %vm570_vm12, %v1658_v63, %v5465_v6  ;;  %8139 = vst [vmem:[#allocation39_spill] sm:$0xff] %v6474_v36  ;;  %8141 = vst [vmem:[#allocation40_spill] sm:$0xff] %v6484_v42  ;;  %v1771_v6 = vsel %vm425_vm10, %v1718_v13, 0  ;;  %v6507_v13 = vpack.c.bf16 %v1803_v25, %v8143_v31  ;;  %v1815_v14 = vand.u32 4294901760, %v1583_v17  ;;  %v6548_v9 = vpop.permute.xlu1 %1699 }
 0x30f   : > { %v7932_v40 = vand.u32 4294901760, %v6468_v26  ;;  %8142 = vst [vmem:[#allocation41_spill] sm:$0xff] %v6494_v55  ;;  %v6509_v51 = vand.u32 4294901760, %v1771_v6  ;;  %v8148_v31 = vand.u32 4294901760, %v6046_v29 }
 0x310   : > { %4876 = vmatpush1.bf16.msra.mxu1 %v6474_v36  ;;  %8144 = vst [vmem:[#allocation42_spill] sm:$0xff] %v6507_v13  ;;  %v8149_v36 = vand.u32 4294901760, %v6059_v3  ;;  %v6557_v3 = vsub.f32 %v1584_v18, %v1813_v50 }
 0x311   : > { %v6502_v8 = vsub.f32 %v6468_v26, %v7932_v40  ;;  %4878 = vmatprep.subr.bf16.mxu1 %v6484_v42  ;;  %v1656_v61 = vpop.permute.xlu0 %1655  ;;  %v8145_v40 = vand.u32 4294901760, %v6048_v5 }
 0x312   : > { %v6523_v25 = vsel %vm570_vm12, %v1656_v61, %v1658_v63  ;;  %v6530_v45 = vpack.c.bf16 %v8149_v36, %v8148_v31  ;;  %v8152_v61 = vand.u32 4294901760, %v6479_v39  ;;  %v1661_v31 = vsel %vm570_vm12, %v1650_v15, %v1652_v1 }
 0x313   : > { %v6520_v42 = vpack.c.bf16 %v8146_v44, %v8145_v40  ;;  %v1625_v44 = vsel %vm441_vm5, %v1614_v22, %v6291_v24  ;;  %v6539_v40 = vand.u32 4294901760, %v1717_v52  ;;  %v8153_v48 = vand.u32 4294901760, %v6502_v8 }
 0x314   : > { %4880 = vmatpush1.bf16.msra.mxu1 %v6507_v13  ;;  %8150 = vst [vmem:[#allocation44_spill] sm:$0xff] %v6530_v45  ;;  %v6555_v22 = vsub.f32 %v1771_v6, %v6509_v51  ;;  %v1835_v5 = vand.u32 4294901760, %v6523_v25  ;;  %v1821_v1 = vand.u32 4294901760, %v1626_v57  ;;  %v1823_v15 = vand.u32 4294901760, %v1625_v44 }
 0x315   : > { %8147 = vst [vmem:[#allocation43_spill] sm:$0xff] %v6520_v42  ;;  %4882 = vmatprep.subr.bf16.mxu1 %v6520_v42  ;;  %v1580_v63 = vpop.permute.xlu0 %1579  ;;  %8151 = vst [vmem:[#allocation45_spill] sm:$0xff] %v6539_v40  ;;  %v6545_v36 = vpack.c.bf16 %v8153_v48, %v8152_v61  ;;  %v6560_v61 = vsub.f32 %v1583_v17, %v1815_v14  ;;  %v6581_v16 = vsub.f32 %v1717_v52, %v6539_v40 }
 0x316   : > { %v1585_v33 = vsel %vm472_vm6, %v6286_v43, %v1580_v63  ;;  %v1586_v24 = vsel %vm472_vm6, %v1580_v63, %v6238_v0  ;;  %8155 = vst [vmem:[#allocation47_spill] sm:$0xff] %v6555_v22  ;;  %v8156_v43 = vand.u32 4294901760, %v6494_v55  ;;  %v1831_v0 = vand.u32 4294901760, %v1661_v31 }
 0x317   : > { %8154 = vst [vmem:[#allocation46_spill] sm:$0xff] %v6545_v36  ;;  %v1817_v29 = vand.u32 4294901760, %v1586_v24  ;;  %v1819_v48 = vand.u32 4294901760, %v1585_v33  ;;  %v6594_v52 = vsub.f32 %v1625_v44, %v1823_v15 }
 0x318   : > { %4884 = vmatpush1.bf16.msra.mxu1 %v6530_v45  ;;  %v6566_v36 = vsub.f32 %v6494_v55, %v8156_v43  ;;  %v7959_v43 = vand.u32 4294901760, %v6557_v3 }
 0x319   : > { %v6568_v6 = vsub.f32 %v1586_v24, %v1817_v29  ;;  %v6570_v18 = vsub.f32 %v1585_v33, %v1819_v48  ;;  %v1622_v63 = vpop.permute.xlu0 %1621  ;;  %v6572_v42 = vpack.c.bf16 %v1817_v29, %v1813_v50  ;;  %v6578_v45 = vpack.c.bf16 %v1819_v48, %v1815_v14 }
 0x31a   : > { %v1627_v17 = vsel %vm441_vm5, %v6344_v62, %v1622_v63  ;;  %v1628_v13 = vsel %vm441_vm5, %v1622_v63, %v6242_v2  ;;  %v6585_v24 = vsub.f32 %v6523_v25, %v1835_v5  ;;  %v6591_v50 = vsub.f32 %v1626_v57, %v1821_v1  ;;  %v1692_v2 = vpop.permute.xlu1 %1691 }
 0x31b   : > { %8157 = vst [vmem:[#allocation48_spill] sm:$0xff] %v6572_v42  ;;  %8158 = vst [vmem:[#allocation49_spill] sm:$0xff] %v6578_v45  ;;  %4886 = vmatprep.subr.bf16.mxu1 %v6572_v42  ;;  %v1825_v14 = vand.u32 4294901760, %v1628_v13  ;;  %v1827_v48 = vand.u32 4294901760, %v1627_v17  ;;  %v6596_v63 = vsub.f32 %v1661_v31, %v1831_v0  ;;  %v8159_v29 = vand.u32 4294901760, %v6568_v6 }
 0x31c   : > { %4888 = vmatpush1.bf16.msra.mxu1 %v6578_v45  ;;  %v1703_v31 = vsel %vm389_vm4, %v1692_v2, %v6490_v38  ;;  %v8167_v25 = vand.u32 4294901760, %v6560_v61 }
 0x31d   : > { %v1696_v33 = vpop.permute.xlu0 %1695  ;;  %v6603_v42 = vpack.c.bf16 %v8159_v29, %v7959_v43  ;;  %v6605_v57 = vsub.f32 %v1628_v13, %v1825_v14  ;;  %v6607_v62 = vsub.f32 %v1627_v17, %v1827_v48  ;;  %v6611_v44 = vpack.c.bf16 %v1825_v14, %v1821_v1 }
 0x31e   : > { %v1704_v45 = vsel %vm389_vm4, %v6490_v38, %v1696_v33  ;;  %v6616_v55 = vpack.c.bf16 %v1827_v48, %v1823_v15  ;;  %v7960_v29 = vand.u32 4294901760, %v6591_v50  ;;  %v8163_v33 = vand.u32 4294901760, %v6443_v58 }
 0x31f   : > { %8160 = vst [vmem:[#allocation50_spill] sm:$0xff] %v6603_v42  ;;  %8161 = vst [vmem:[#allocation51_spill] sm:$0xff] %v6611_v44  ;;  %v1837_v60 = vand.u32 4294901760, %v1704_v45  ;;  %v7961_v13 = vand.u32 4294901760, %v6605_v57  ;;  %4890 = vmatprep.subr.bf16.mxu1 %v6611_v44  ;;  %v8164_v1 = vand.u32 4294901760, %v6468_v26  ;;  %v8166_v48 = vand.u32 4294901760, %v6396_v30 }
 0x320   : > { %8162 = vst [vmem:[#allocation52_spill] sm:$0xff] %v6616_v55  ;;  %4892 = vmatpush1.bf16.msra.mxu1 %v6616_v55  ;;  %v8168_v17 = vand.u32 4294901760, %v6570_v18  ;;  %v1839_v26 = vand.u32 4294901760, %v1703_v31  ;;  %v8175_v42 = vand.u32 4294901760, %v6596_v63 }
 0x321   : > { %v6626_v14 = vpack.c.bf16 %v8164_v1, %v8163_v33  ;;  %v1702_v15 = vpop.permute.xlu0 %1701  ;;  %v1921_v43 = vsub.f32 %v6396_v30, %v8166_v48  ;;  %v6643_v1 = vpack.c.bf16 %v1835_v5, %v1831_v0  ;;  %v6649_v2 = vpack.c.bf16 %v7961_v13, %v7960_v29 }
 0x322   : > { %v6638_v58 = vpack.c.bf16 %v8168_v17, %v8167_v25  ;;  %v1706_v33 = vsel %vm389_vm4, %v6548_v9, %v1702_v15  ;;  %v6651_v48 = vsub.f32 %v1704_v45, %v1837_v60  ;;  %v8172_v25 = vand.u32 4294901760, %v6594_v52 }
 0x323   : > { %8165 = vst [vmem:[#allocation53_spill] sm:$0xff] %v6626_v14  ;;  %4894 = vmatprep.subr.bf16.mxu1 %v6626_v14  ;;  %8170 = vst [vmem:[#allocation55_spill] sm:$0xff] %v6643_v1  ;;  %v1841_v38 = vand.u32 4294901760, %v1706_v33  ;;  %v8173_v17 = vand.u32 4294901760, %v6607_v62  ;;  %v8176_v5 = vand.u32 4294901760, %v6585_v24  ;;  %v8178_v15 = vand.u32 4294901760, %v6384_v28 }
 0x324   : > { %8169 = vst [vmem:[#allocation54_spill] sm:$0xff] %v6638_v58  ;;  %8171 = vst [vmem:[#allocation56_spill] sm:$0xff] %v6649_v2  ;;  %v1883_v45 = vand.u32 4294901760, %v6566_v36  ;;  %v8179_v2 = vand.u32 4294901760, %v6284_v46  ;;  %4896 = vmatpush1.bf16.msra.mxu1 %v6643_v1  ;;  %v6689_v1 = vsub.f32 %v1703_v31, %v1839_v26 }
 0x325   : > { %v6657_v58 = vpack.c.bf16 %v8173_v17, %v8172_v25  ;;  %v6663_v0 = vpack.c.bf16 %v8176_v5, %v8175_v42  ;;  %v1909_v29 = vsub.f32 %v6384_v28, %v8178_v15  ;;  %v6673_v25 = vsub.f32 %v1706_v33, %v1841_v38  ;;  %v1698_v17 = vpop.permute.xlu0 %1697 }
 0x326   : > { %v1927_v14 = vsub.f32 %v6284_v46, %v8179_v2  ;;  %v8181_v42 = vand.u32 4294901760, %v6555_v22  ;;  %v8182_v15 = vand.u32 4294901760, %v6279_v20  ;;  %v1705_v13 = vsel %vm389_vm4, %v1698_v17, %v6548_v9 }
 0x327   : > { %8174 = vst [vmem:[#allocation57_spill] sm:$0xff] %v6657_v58  ;;  %8177 = vst [vmem:[#allocation58_spill] sm:$0xff] %v6663_v0  ;;  %v6676_v58 = vpack.c.bf16 %v1841_v38, %v1837_v60  ;;  %v1922_v0 = vand.u32 4294901760, %v1921_v43  ;;  %v8183_v2 = vand.u32 4294901760, %v6315_v54  ;;  %v1843_v55 = vand.u32 4294901760, %v1705_v13 }
 0x328   : > { %v1892_v5 = vsub.f32 %v6555_v22, %v8181_v42  ;;  %v1915_v36 = vsub.f32 %v6279_v20, %v8182_v15  ;;  %v8184_v42 = vand.u32 4294901760, %v6266_v7  ;;  %v1910_v44 = vand.u32 4294901760, %v1909_v29 }
 0x329   : > { %8180 = vst [vmem:[#allocation59_spill] sm:$0xff] %v6676_v58  ;;  %v1945_v33 = vsub.f32 %v6315_v54, %v8183_v2  ;;  %4898 = vmatprep.subr.bf16.mxu1 %v6676_v58  ;;  %v8185_v9 = vand.u32 4294901760, %v6310_v47  ;;  %v8186_v17 = vand.u32 4294901760, %v6581_v16  ;;  %v1928_v2 = vand.u32 4294901760, %v1927_v14 }
 0x32a   : > { %v1951_v15 = vsub.f32 %v6266_v7, %v8184_v42  ;;  %v6703_v60 = vsub.f32 %v1705_v13, %v1843_v55  ;;  %v6705_v38 = vpack.c.bf16 %v1843_v55, %v1839_v26  ;;  %v8188_v58 = vand.u32 4294901760, %v6651_v48 }
 0x32b   : > { %v1933_v43 = vsub.f32 %v6310_v47, %v8185_v9  ;;  %v1898_v31 = vsub.f32 %v6581_v16, %v8186_v17  ;;  %v8189_v22 = vand.u32 4294901760, %v6673_v25  ;;  %v4901_v29 = vpack.c.bf16 %v1922_v0, %v1910_v44 }
 0x32c   : > { %8187 = vst [vmem:[#allocation60_spill] sm:$0xff] %v6705_v38  ;;  %v1946_v42 = vand.u32 4294901760, %v1945_v33  ;;  %v1969_v9 = vsub.f32 %v6342_v49, %v8191_v35  ;;  %v1893_v40 = vand.u32 4294901760, %v1892_v5  ;;  %v8192_v17 = vand.u32 4294901760, %v6260_v19  ;;  %4900 = vmatpush1.bf16.msra.mxu1 %v6705_v38 }
 0x32d   : > { %v6711_v53 = vpack.c.bf16 %v8189_v22, %v8188_v58  ;;  %v1916_v14 = vand.u32 4294901760, %v1915_v36  ;;  %v7982_v55 = vand.u32 4294901760, %v6689_v1  ;;  %v2118_v26 = vand.u32 4294901760, %v6703_v60  ;;  %4902 = vmatprep.subr.bf16.mxu1 %v4901_v29 }
 0x32e   : > { %v1939_v13 = vsub.f32 %v6260_v19, %v8192_v17  ;;  %v1934_v22 = vand.u32 4294901760, %v1933_v43  ;;  %v8193_v44 = vand.u32 4294901760, %v6358_v4  ;;  %v1952_v0 = vand.u32 4294901760, %v1951_v15 }
 0x32f   : > { %8190 = vst [vmem:[#allocation61_spill] sm:$0xff] %v6711_v53  ;;  %v8194_v35 = vand.u32 4294901760, %v6364_v23  ;;  %v4903_v33 = vpack.c.bf16 %v1928_v2, %v1916_v14  ;;  %v6732_v36 = vpack.c.bf16 %v2118_v26, %v7982_v55  ;;  %1884 = vmatmul.mubr.f32.vlgmr.msra.gmra.mrb[0].mxu1 %v1883_v45  ;;  %v1970_v29 = vand.u32 4294901760, %v1969_v9 }
 0x330   : > { %v1957_v58 = vsub.f32 %v6358_v4, %v8193_v44  ;;  %v4905_v17 = vpack.c.bf16 %v1946_v42, %v1934_v22  ;;  %v8195_v43 = vand.u32 4294901760, %v6377_v11  ;;  %v1899_v44 = vand.u32 4294901760, %v1898_v31  ;;  %1894 = vmatprep.mubr.f32.mxu1 %v1893_v40 }
 0x331   : > { %v1975_v5 = vsub.f32 %v6364_v23, %v8194_v35  ;;  %v1940_v15 = vand.u32 4294901760, %v1939_v13  ;;  %v8196_v38 = vand.u32 4294901760, %v6370_v27  ;;  %4904 = vmatpush1.bf16.msra.mxu1 %v4903_v33  ;;  %v8197_v14 = vand.u32 4294901760, %v6375_v41 }
 0x332   : > { %v1993_v53 = vsub.f32 %v6377_v11, %v8195_v43  ;;  %4906 = vmatprep.subr.bf16.mxu1 %v4905_v17  ;;  %v1958_v2 = vand.u32 4294901760, %v1957_v58  ;;  %v8198_v9 = vand.u32 4294901760, %v6381_v21  ;;  %v8199_v55 = vand.u32 4294901760, %v6084_v32 }
 0x333   : > { %v1963_v35 = vsub.f32 %v6370_v27, %v8196_v38  ;;  %v1981_v45 = vsub.f32 %v6375_v41, %v8197_v14  ;;  %v1976_v42 = vand.u32 4294901760, %v1975_v5  ;;  %v4907_v43 = vpack.c.bf16 %v1952_v0, %v1940_v15  ;;  %1900 = vmatmul.mubr.f32.gmra.mrb[2].mxu1 %v1899_v44 }
 0x334   : > { %v1999_v22 = vsub.f32 %v6381_v21, %v8198_v9  ;;  %v4909_v31 = vpack.c.bf16 %v1970_v29, %v1958_v2  ;;  %v1994_v13 = vand.u32 4294901760, %v1993_v53  ;;  %v2017_v38 = vsub.f32 %v6084_v32, %v8199_v55  ;;  %2151 = vmatprep.mubr.f32.mxu1 %v6203_v37 }
 0x335   : > { %v1964_v40 = vand.u32 4294901760, %v1963_v35  ;;  %v8200_v58 = vand.u32 4294901760, %v6390_v10  ;;  %4908 = vmatpush1.bf16.msra.mxu1 %v4907_v43  ;;  %v1982_v5 = vand.u32 4294901760, %v1981_v45  ;;  %v8201_v17 = vand.u32 4294901760, %v6079_v59 }
 0x336   : > { %4910 = vmatprep.subr.bf16.mxu1 %v4909_v31  ;;  %v2000_v53 = vand.u32 4294901760, %v1999_v22  ;;  %v8202_v15 = vand.u32 4294901760, %v6096_v56  ;;  %v2018_v35 = vand.u32 4294901760, %v2017_v38  ;;  %v8203_v2 = vand.u32 4294901760, %v6568_v6 }
 0x337   : > { %v1987_v33 = vsub.f32 %v6390_v10, %v8200_v58  ;;  %v2005_v0 = vsub.f32 %v6079_v59, %v8201_v17  ;;  %v4911_v29 = vpack.c.bf16 %v1976_v42, %v1964_v40  ;;  %v4913_v44 = vpack.c.bf16 %v1994_v13, %v1982_v5 }
 0x338   : > { %v2023_v55 = vsub.f32 %v6096_v56, %v8202_v15  ;;  %v2041_v14 = vsub.f32 %v6568_v6, %v8203_v2  ;;  %v8204_v45 = vand.u32 4294901760, %v6091_v12  ;;  %v8205_v42 = vand.u32 4294901760, %v6557_v3 }
 0x339   : > { %v1988_v9 = vand.u32 4294901760, %v1987_v33  ;;  %4912 = vmatpush1.bf16.msra.mxu1 %v4911_v29  ;;  %v2006_v31 = vand.u32 4294901760, %v2005_v0  ;;  %v8206_v40 = vand.u32 4294901760, %v6570_v18  ;;  %v8207_v33 = vand.u32 4294901760, %v6605_v57 }
 0x33a   : > { %v2011_v43 = vsub.f32 %v6091_v12, %v8204_v45  ;;  %4914 = vmatprep.subr.bf16.mxu1 %v4913_v44  ;;  %v2029_v22 = vsub.f32 %v6557_v3, %v8205_v42  ;;  %v2024_v58 = vand.u32 4294901760, %v2023_v55  ;;  %v2042_v17 = vand.u32 4294901760, %v2041_v14 }
 0x33b   : > { %v2047_v13 = vsub.f32 %v6570_v18, %v8206_v40  ;;  %v4915_v38 = vpack.c.bf16 %v2000_v53, %v1988_v9  ;;  %v4917_v5 = vpack.c.bf16 %v2018_v35, %v2006_v31  ;;  %v2065_v29 = vsub.f32 %v6605_v57, %v8207_v33 }
 0x33c   : > { %v8208_v15 = vand.u32 4294901760, %v6560_v61  ;;  %v2012_v44 = vand.u32 4294901760, %v2011_v43  ;;  %v2030_v2 = vand.u32 4294901760, %v2029_v22  ;;  %v8209_v45 = vand.u32 4294901760, %v6591_v50 }
 0x33d   : > { %4916 = vmatpush1.bf16.msra.mxu1 %v4915_v38  ;;  %v2048_v53 = vand.u32 4294901760, %v2047_v13  ;;  %v8210_v55 = vand.u32 4294901760, %v6607_v62  ;;  %v2066_v31 = vand.u32 4294901760, %v2065_v29  ;;  %v8211_v40 = vand.u32 4294901760, %v6502_v8 }
 0x33e   : > { %v2035_v0 = vsub.f32 %v6560_v61, %v8208_v15  ;;  %4918 = vmatprep.subr.bf16.mxu1 %v4917_v5  ;;  %v2053_v42 = vsub.f32 %v6591_v50, %v8209_v45  ;;  %v4919_v14 = vpack.c.bf16 %v2024_v58, %v2012_v44  ;;  %v4921_v9 = vpack.c.bf16 %v2042_v17, %v2030_v2 }
 0x33f   : > { %v2071_v35 = vsub.f32 %v6607_v62, %v8210_v55  ;;  %v2089_v33 = vsub.f32 %v6502_v8, %v8211_v40  ;;  %v8212_v43 = vand.u32 4294901760, %v6594_v52  ;;  %v8213_v13 = vand.u32 4294901760, %v6479_v39 }
 0x340   : > { %v2036_v38 = vand.u32 4294901760, %v2035_v0  ;;  %v2054_v5 = vand.u32 4294901760, %v2053_v42  ;;  %v8214_v58 = vand.u32 4294901760, %v6585_v24  ;;  %v8215_v0 = vand.u32 4294901760, %v6673_v25 }
 0x341   : > { %v2059_v22 = vsub.f32 %v6594_v52, %v8212_v43  ;;  %4920 = vmatpush1.bf16.msra.mxu1 %v4919_v14  ;;  %v2077_v15 = vsub.f32 %v6479_v39, %v8213_v13  ;;  %v2072_v29 = vand.u32 4294901760, %v2071_v35  ;;  %v2090_v45 = vand.u32 4294901760, %v2089_v33 }
 0x342   : > { %4922 = vmatprep.subr.bf16.mxu1 %v4921_v9  ;;  %v2095_v17 = vsub.f32 %v6585_v24, %v8214_v58  ;;  %v4923_v44 = vpack.c.bf16 %v2048_v53, %v2036_v38  ;;  %v4925_v2 = vpack.c.bf16 %v2066_v31, %v2054_v5  ;;  %v2113_v55 = vsub.f32 %v6673_v25, %v8215_v0 }
 0x343   : > { %v2060_v40 = vand.u32 4294901760, %v2059_v22  ;;  %v8216_v14 = vand.u32 4294901760, %v6596_v63  ;;  %v2078_v9 = vand.u32 4294901760, %v2077_v15  ;;  %v8217_v43 = vand.u32 4294901760, %v6651_v48 }
 0x344   : > { %v2096_v35 = vand.u32 4294901760, %v2095_v17  ;;  %v2119_v53 = vsub.f32 %v6703_v60, %v2118_v26  ;;  %v2114_v38 = vand.u32 4294901760, %v2113_v55  ;;  %v8218_v5 = vand.u32 4294901760, %v6689_v1 }
 0x345   : > { %v2083_v42 = vsub.f32 %v6596_v63, %v8216_v14  ;;  %4924 = vmatpush1.bf16.msra.mxu1 %v4923_v44  ;;  %v2101_v13 = vsub.f32 %v6651_v48, %v8217_v43  ;;  %v4927_v31 = vpack.c.bf16 %v2072_v29, %v2060_v40  ;;  %v4929_v33 = vpack.c.bf16 %v2090_v45, %v2078_v9  ;;  %v8220_v40 = vld [vmem:[#allocation13_spill] sm:$0xff] }
 0x346   : > { %4926 = vmatprep.subr.bf16.mxu1 %v4925_v2  ;;  %v2107_v58 = vsub.f32 %v6689_v1, %v8218_v5  ;;  %v2120_v44 = vand.u32 4294901760, %v2119_v53  ;;  %v4937_v26 = vpack.c.bf16 %v6396_v30, %v6384_v28  ;;  %v4939_v29 = vpack.c.bf16 %v6284_v46, %v6279_v20  ;;  %v8219_v30 = vld [vmem:[#allocation45_spill] sm:$0xff] }
 0x347   : > { %v2084_v22 = vand.u32 4294901760, %v2083_v42  ;;  %v2102_v15 = vand.u32 4294901760, %v2101_v13  ;;  %v4941_v45 = vpack.c.bf16 %v6315_v54, %v6310_v47  ;;  %v4943_v55 = vpack.c.bf16 %v6266_v7, %v6260_v19  ;;  %v8242_v42 = vld [vmem:[#allocation35_spill] sm:$0xff]  ;;  %v8244_v43 = vld [vmem:[#allocation21_spill] sm:$0xff] }
 0x348   : > { %v2108_v14 = vand.u32 4294901760, %v2107_v58  ;;  %v4945_v28 = vpack.c.bf16 %v6342_v49, %v6358_v4  ;;  %v4947_v46 = vpack.c.bf16 %v6364_v23, %v6370_v27  ;;  %v4949_v54 = vpack.c.bf16 %v6377_v11, %v6375_v41  ;;  %v8221_v4 = vld [vmem:[#allocation23_spill] sm:$0xff]  ;;  %v8222_v23 = vld [vmem:[#allocation41_spill] sm:$0xff]  ;;  %v8223_v41 = vld [vmem:[#allocation30_spill] sm:$0xff] }
 0x349   : > { %4928 = vmatpush1.bf16.msra.mxu1 %v4927_v31  ;;  %v4931_v2 = vpack.c.bf16 %v2096_v35, %v2084_v22  ;;  %v4933_v0 = vpack.c.bf16 %v2114_v38, %v2102_v15  ;;  %v4951_v47 = vpack.c.bf16 %v6381_v21, %v6390_v10  ;;  %v4953_v20 = vpack.c.bf16 %v6084_v32, %v6079_v59  ;;  %v8224_v11 = vld [vmem:[#allocation47_spill] sm:$0xff]  ;;  %v8225_v21 = vld [vmem:[#allocation32_spill] sm:$0xff]  ;;  %v8246_v35 = vld [vmem:[#allocation22_spill] sm:$0xff] }
 0x34a   : > { %4930 = vmatprep.subr.bf16.mxu1 %v4929_v33  ;;  %v4935_v17 = vpack.c.bf16 %v2120_v44, %v2108_v14  ;;  %v4955_v49 = vpack.c.bf16 %v6096_v56, %v6091_v12  ;;  %v4957_v19 = vpack.c.bf16 %v6568_v6, %v6557_v3  ;;  %v4959_v27 = vpack.c.bf16 %v6570_v18, %v6560_v61  ;;  %v8226_v10 = vld [vmem:[#allocation36_spill] sm:$0xff]  ;;  %v8229_v61 = vld [vmem:[#allocation39_spill] sm:$0xff]  ;;  %v8231_v18 = vld [vmem:[#allocation42_spill] sm:$0xff] }
 0x34b   : > { %v4961_v7 = vpack.c.bf16 %v6605_v57, %v6591_v50  ;;  %v4963_v59 = vpack.c.bf16 %v6607_v62, %v6594_v52  ;;  %v4965_v32 = vpack.c.bf16 %v6502_v8, %v6479_v39  ;;  %v4967_v3 = vpack.c.bf16 %v6585_v24, %v6596_v63  ;;  %v8228_v8 = vld [vmem:[#allocation38_spill] sm:$0xff]  ;;  %v8230_v6 = vld [vmem:[#allocation40_spill] sm:$0xff]  ;;  %v8232_v24 = vld [vmem:[#allocation43_spill] sm:$0xff] }
 0x34c   : > { %v4969_v12 = vpack.c.bf16 %v6673_v25, %v6651_v48  ;;  %v4971_v56 = vpack.c.bf16 %v6703_v60, %v6689_v1  ;;  %v8227_v39 = vand.u32 4294901760, %v8220_v40  ;;  %v8233_v62 = vld [vmem:[#allocation44_spill] sm:$0xff]  ;;  %v8235_v52 = vld [vmem:[#allocation49_spill] sm:$0xff]  ;;  %v8236_v63 = vld [vmem:[#allocation51_spill] sm:$0xff]  ;;  %v8243_v9 = vand.u32 4294901760, %v8222_v23 }
 0x34d   : > { %4932 = vmatpush1.bf16.msra.mxu1 %v4931_v2  ;;  %v8234_v50 = vld [vmem:[#allocation48_spill] sm:$0xff]  ;;  %v8238_v1 = vld [vmem:[#allocation53_spill] sm:$0xff]  ;;  %v8239_v48 = vld [vmem:[#allocation55_spill] sm:$0xff]  ;;  %v8245_v13 = vand.u32 4294901760, %v8224_v11  ;;  %v8247_v53 = vand.u32 4294901760, %v6581_v16 }
 0x34e   : > { %4934 = vmatprep.subr.bf16.mxu1 %v4933_v0  ;;  %v8237_v57 = vld [vmem:[#allocation52_spill] sm:$0xff]  ;;  %v8240_v25 = vld [vmem:[#allocation59_spill] sm:$0xff]  ;;  %v8250_v38 = vld [vmem:[#allocation33_spill] sm:$0xff] }
 0x34f   : > { %v8241_v60 = vld [vmem:[#allocation60_spill] sm:$0xff]  ;;  %v8249_v33 = vld [vmem:[#allocation31_spill] sm:$0xff]  ;;  %v8251_v22 = vld [vmem:[#allocation34_spill] sm:$0xff] }
 0x350   : > { %v8248_v31 = vld [vmem:[#allocation20_spill] sm:$0xff]  ;;  %v8252_v5 = vld [vmem:[#allocation37_spill] sm:$0xff]  ;;  %v8255_v44 = vld [vmem:[#allocation50_spill] sm:$0xff] }
 0x351   : > { %4936 = vmatpush1.bf16.msra.mxu1 %v4935_v17  ;;  %v8253_v58 = vld [vmem:[#allocation28_spill] sm:$0xff]  ;;  %v8254_v15 = vld [vmem:[#allocation29_spill] sm:$0xff]  ;;  %v8259_v14 = vld [vmem:[#allocation46_spill] sm:$0xff] }
 0x352   : > { %4938 = vmatprep.subr.bf16.mxu1 %v4937_v26  ;;  %v8257_v2 = vld [vmem:[#allocation56_spill] sm:$0xff]  ;;  %v8258_v0 = vld [vmem:[#allocation57_spill] sm:$0xff]  ;;  %v8260_v17 = vld [vmem:[#allocation58_spill] sm:$0xff] }
 0x353   : > { %v8261_v26 = vld [vmem:[#allocation61_spill] sm:$0xff] }
 0x354   : > { %2153 = vmatmul.mubr.f32.vlgmr.msra.gmra.mrb[0].mxu1 %v6461_v34 }
 0x355   : > { %4940 = vmatpush1.bf16.msra.mxu1 %v4939_v29  ;;  %2159 = vmatprep.mubr.f32.mxu1 %v6509_v51 }
 0x356   : > { %4942 = vmatprep.subr.bf16.mxu1 %v4941_v45 }
 0x358   : > { %2161 = vmatmul.mubr.f32.gmra.mrb[2].mxu1 %v8219_v30 }
 0x359   : > { %4944 = vmatpush1.bf16.msra.mxu1 %v4943_v55  ;;  %2305 = vmatprep.mubr.f32.mxu1 %v8220_v40  ;;  %v1765_v40 = vpop.permute.xlu0 %1764 }
 0x35a   : > { %4946 = vmatprep.subr.bf16.mxu1 %v4945_v28 }
 0x35d   : > { %4948 = vmatpush1.bf16.msra.mxu1 %v4947_v46 }
 0x35e   : > { %4950 = vmatprep.subr.bf16.mxu1 %v4949_v54 }
 0x361   : > { %4952 = vmatpush1.bf16.msra.mxu1 %v4951_v47 }
 0x362   : > { %4954 = vmatprep.subr.bf16.mxu1 %v4953_v20 }
 0x365   : > { %4956 = vmatpush1.bf16.msra.mxu1 %v4955_v49 }
 0x366   : > { %4958 = vmatprep.subr.bf16.mxu1 %v4957_v19 }
 0x369   : > { %4960 = vmatpush1.bf16.msra.mxu1 %v4959_v27  ;;  %v8262_v27 = vld [vmem:[#allocation10_spill] sm:$0xff] }
 0x36a   : > { %4962 = vmatprep.subr.bf16.mxu1 %v4961_v7 }
 0x36d   : > { %4964 = vmatpush1.bf16.msra.mxu1 %v4963_v59  ;;  %v8263_v59 = vld [vmem:[#allocation12_spill] sm:$0xff] }
 0x36e   : > { %4966 = vmatprep.subr.bf16.mxu1 %v4965_v32 }
 0x371   : > { %4968 = vmatpush1.bf16.msra.mxu1 %v4967_v3 }
 0x372   : > { %4970 = vmatprep.subr.bf16.mxu1 %v4969_v12 }
 0x375   : > { %4972 = vmatpush1.bf16.msra.mxu1 %v4971_v56  ;;  %v8264_v56 = vld [vmem:[#allocation8_spill] sm:$0xff] }
 0x376   : > { %4974 = vmatprep.subr.bf16.mxu1 %v8221_v4 }
 0x378   : > { %2308 = vmatmul.mubr.f32.vlgmr.msra.gmra.mrb[0].mxu1 %v8222_v23  ;;  %v8265_v23 = vld [vmem:[#allocation15_spill] sm:$0xff] }
 0x379   : > { %4976 = vmatpush1.bf16.msra.mxu1 %v8223_v41  ;;  %2315 = vmatprep.mubr.f32.mxu1 %v8224_v11 }
 0x37a   : > { %4978 = vmatprep.subr.bf16.mxu1 %v8225_v21 }
 0x37c   : > { %2318 = vmatmul.mubr.f32.gmra.mrb[2].mxu1 %v6581_v16  ;;  %v8256_v16 = vld [vmem:[#allocation54_spill] sm:$0xff] }
 0x37d   : > { %4980 = vmatpush1.bf16.msra.mxu1 %v8226_v10  ;;  %2427 = vmatprep.mubr.f32.mxu1 %v8227_v39 }
 0x37e   : > { %4982 = vmatprep.subr.bf16.mxu1 %v8228_v8 }
 0x381   : > { %4984 = vmatpush1.bf16.msra.mxu1 %v8229_v61 }
 0x382   : > { %4986 = vmatprep.subr.bf16.mxu1 %v8230_v6 }
 0x385   : > { %4988 = vmatpush1.bf16.msra.mxu1 %v8231_v18 }
 0x386   : > { %4990 = vmatprep.subr.bf16.mxu1 %v8232_v24 }
 0x389   : > { %4992 = vmatpush1.bf16.msra.mxu1 %v8233_v62 }
 0x38a   : > { %4994 = vmatprep.subr.bf16.mxu1 %v8234_v50 }
 0x38d   : > { %4996 = vmatpush1.bf16.msra.mxu1 %v8235_v52 }
 0x38e   : > { %4998 = vmatprep.subr.bf16.mxu1 %v8236_v63 }
 0x391   : > { %5000 = vmatpush1.bf16.msra.mxu1 %v8237_v57 }
 0x392   : > { %5002 = vmatprep.subr.bf16.mxu1 %v8238_v1 }
 0x395   : > { %5004 = vmatpush1.bf16.msra.mxu1 %v8239_v48 }
 0x396   : > { %5006 = vmatprep.subr.bf16.mxu1 %v8240_v25 }
 0x399   : > { %5008 = vmatpush1.bf16.msra.mxu1 %v8241_v60 }
 0x39a   : > { %5010 = vmatprep.subr.bf16.mxu1 %v8242_v42 }
 0x39c   : > { %2431 = vmatmul.mubr.f32.vlgmr.msra.gmra.mrb[0].mxu1 %v8243_v9 }
 0x39d   : > { %5012 = vmatpush1.bf16.msra.mxu1 %v8244_v43  ;;  %2439 = vmatprep.mubr.f32.mxu1 %v8245_v13 }
 0x39e   : > { %5014 = vmatprep.subr.bf16.mxu1 %v8246_v35 }
 0x3a0   : > { %2443 = vmatmul.mubr.f32.gmra.mrb[2].mxu1 %v8247_v53  ;;  %v8273_v53 = vld [vmem:[#allocation6_spill] sm:$0xff] }
 0x3a1   : > { %5016 = vmatpush1.bf16.msra.mxu1 %v8248_v31  ;;  %2622 = vmatprep.mubr.f32.mxu1 %v6203_v37 }
 0x3a2   : > { %5018 = vmatprep.subr.bf16.mxu1 %v8249_v33 }
 0x3a5   : > { %5020 = vmatpush1.bf16.msra.mxu1 %v8250_v38 }
 0x3a6   : > { %5022 = vmatprep.subr.bf16.mxu1 %v8251_v22 }
 0x3a9   : > { %5024 = vmatpush1.bf16.msra.mxu1 %v8252_v5 }
 0x3aa   : > { %5026 = vmatprep.subr.bf16.mxu1 %v8253_v58 }
 0x3ad   : > { %5028 = vmatpush1.bf16.msra.mxu1 %v8254_v15 }
 0x3ae   : > { %5030 = vmatprep.subr.bf16.mxu1 %v8255_v44 }
 0x3b1   : > { %5032 = vmatpush1.bf16.msra.mxu1 %v8256_v16 }
 0x3b2   : > { %5034 = vmatprep.subr.bf16.mxu1 %v8257_v2 }
 0x3b5   : > { %5036 = vmatpush1.bf16.msra.mxu1 %v8258_v0  ;;  %v8276_v0 = vld [vmem:[#allocation18_spill] sm:$0xff] }
 0x3b6   : > { %5038 = vmatprep.subr.bf16.mxu1 %v8259_v14 }
 0x3b9   : > { %5040 = vmatpush1.bf16.msra.mxu1 %v8260_v17 }
 0x3ba   : > { %5042 = vmatprep.subr.bf16.mxu1 %v8261_v26 }
 0x3bd   : > { %5044 = vmatpush1.bf16.msra.mxu1 %v6732_v36 }
 0x3be   : > { %5046 = vmatprep.subr.bf16.mxu1 %v8221_v4 }
 0x3c0   : > { %2624 = vmatmul.mubr.f32.vlgmr.msra.gmra.mrb[0].mxu1 %v6461_v34 }
 0x3c1   : > { %5048 = vmatpush1.bf16.msra.mxu1 %v8223_v41  ;;  %2630 = vmatprep.mubr.f32.mxu1 %v6509_v51 }
 0x3c2   : > { %5050 = vmatprep.subr.bf16.mxu1 %v8225_v21 }
 0x3c4   : > { %2632 = vmatmul.mubr.f32.gmra.mrb[2].mxu1 %v8219_v30 }
 0x3c5   : > { %5052 = vmatpush1.bf16.msra.mxu1 %v8226_v10  ;;  %2739 = vmatprep.mubr.f32.mxu1 %v6203_v37  ;;  %v1760_v37 = vpop.permute.xlu1 %1759 }
 0x3c6   : > { %5054 = vmatprep.subr.bf16.mxu1 %v8228_v8  ;;  %v8266_v8 = vld [vmem:[#allocation9_spill] sm:$0xff] }
 0x3c9   : > { %5056 = vmatpush1.bf16.msra.mxu1 %v8229_v61 }
 0x3ca   : > { %5058 = vmatprep.subr.bf16.mxu1 %v8230_v6 }
 0x3cd   : > { %5060 = vmatpush1.bf16.msra.mxu1 %v8231_v18 }
 0x3ce   : > { %5062 = vmatprep.subr.bf16.mxu1 %v8232_v24 }
 0x3d1   : > { %5064 = vmatpush1.bf16.msra.mxu1 %v8233_v62 }
 0x3d2   : > { %5066 = vmatprep.subr.bf16.mxu1 %v8234_v50  ;;  %v8269_v50 = vld [vmem:[#allocation7_spill] sm:$0xff] }
 0x3d5   : > { %5068 = vmatpush1.bf16.msra.mxu1 %v8235_v52 }
 0x3d6   : > { %5070 = vmatprep.subr.bf16.mxu1 %v8236_v63 }
 0x3d9   : > { %5072 = vmatpush1.bf16.msra.mxu1 %v8237_v57 }
 0x3da   : > { %5074 = vmatprep.subr.bf16.mxu1 %v8238_v1 }
 0x3dd   : > { %5076 = vmatpush1.bf16.msra.mxu1 %v8239_v48 }
 0x3de   : > { %5078 = vmatprep.subr.bf16.mxu1 %v8240_v25 }
 0x3e1   : > { %5080 = vmatpush1.bf16.msra.mxu1 %v8241_v60 }
 0x3e4   : > { %2741 = vmatmul.mubr.f32.vlgmr.msra.gmra.mrb[0].mxu1 %v6461_v34 }
 0x3e5   : > { %2747 = vmatprep.mubr.f32.mxu1 %v6509_v51 }
 0x3e8   : > { %2749 = vmatmul.mubr.f32.gmra.mrb[2].mxu1 %v8219_v30 }
 0x4b7   : > { %v2742_v36 = vpop.f32.mrb[0].mxu1 }
 0x4b8   : > { %v5325_v29 = vadd.f32 %v2742_v36, %v1760_v37  ;;  %v2744_v45 = vpop.f32.mrb[1].mxu1 }
 0x4b9   : > { %v5326_v55 = vadd.f32 %v2744_v45, %v1760_v37  ;;  %v8278_v37 = vld [vmem:[#allocation16_spill] sm:$0xff] }
 0x4ba   : > { %vm2755_vm1 = vcmp.ge.f32.partialorder %v5325_v29, 0.0  ;;  %v2759_v28 = vmul.f32 0.2, %v5325_v29 }
 0x4bb   : > { %vm2756_vm2 = vcmp.ge.f32.partialorder %v5326_v55, 0.0  ;;  %v2760_v46 = vmul.f32 0.2, %v5326_v55  ;;  %v2750_v54 = vpop.f32.mrb[2].mxu1 }
 0x4bc   : > { %v6923_v47 = vsel %vm2755_vm1, %v5325_v29, %v2759_v28  ;;  %v5327_v20 = vadd.f32 %v2750_v54, %v1765_v40  ;;  %v2752_v49 = vpop.f32.mrb[3].mxu1  ;;  %v8279_v28 = vld [vmem:[#allocation11_spill] sm:$0xff] }
 0x4bd   : > { %v6925_v34 = vsel %vm2756_vm2, %v5326_v55, %v2760_v46  ;;  %v5328_v51 = vadd.f32 %v2752_v49, %v1765_v40  ;;  %2827 = vrot.lane.b32.xlu1 %v6923_v47, %s5499_s22  ;;  %v2778_v7 = vmul.f32 %v6923_v47, %v8262_v27  ;;  %v2856_v32 = vmul.f32 %v6923_v47, %v8263_v59 }
 0x4be   : > { %v2761_v30 = vmul.f32 0.2, %v5327_v20  ;;  %2829 = vrot.lane.b32.xlu0 %v6925_v34, %s5499_s22  ;;  %vm2757_vm3 = vcmp.ge.f32.partialorder %v5327_v20, 0.0  ;;  %v2857_v4 = vmul.f32 %v8264_v56, %v6925_v34  ;;  %v2898_v41 = vmul.f32 %v6923_v47, %v8265_v23 }
 0x4bf   : > { %vm2758_vm11 = vcmp.ge.f32.partialorder %v5328_v51, 0.0  ;;  %v2762_v19 = vmul.f32 0.2, %v5328_v51  ;;  %v3193_v11 = vand.u32 4294901760, %v6925_v34  ;;  %v3195_v10 = vand.u32 4294901760, %v6923_v47 }
 0x4c0   : > { %v6936_v3 = vsel %vm2757_vm3, %v5327_v20, %v2761_v30  ;;  %v2899_v61 = vmul.f32 %v8266_v8, %v6925_v34  ;;  %v2947_v52 = vmul.f32 %v8269_v50, %v6923_v47  ;;  %v2779_v31 = vmul.f32 %v8273_v53, %v6925_v34 }
 0x4c1   : > { %2791 = vrot.lane.b32.xlu1 %v2778_v7, %s5498_s21  ;;  %v6938_v12 = vsel %vm2758_vm11, %v5328_v51, %v2762_v19  ;;  %v3199_v39 = vand.u32 4294901760, %v6936_v3  ;;  %v6956_v18 = vsub.f32 %v6925_v34, %v3193_v11  ;;  %v6966_v63 = vsub.f32 %v6923_v47, %v3195_v10  ;;  %v8281_v51 = vld [vmem:[#allocation17_spill] sm:$0xff] }
 0x4c2   : > { %2869 = vrot.lane.b32.xlu0 %v2856_v32, %s5497_s20  ;;  %v3197_v21 = vand.u32 4294901760, %v6938_v12  ;;  %v2781_v16 = vmul.f32 %v6936_v3, %v8262_v27  ;;  %v2948_v14 = vmul.f32 %v6925_v34, %v8276_v0  ;;  %v2950_v26 = vmul.f32 %v8269_v50, %v6936_v3  ;;  %v8282_v27 = vld [vmem:[#allocation14_spill] sm:$0xff]  ;;  %v4160_v32 = vld [vmem:[#allocation5] sm:$0x1] }
 0x4c3   : > { %8267 = vst [vmem:[#allocation45_spill] sm:$0xff] %v6956_v18  ;;  %v6961_v62 = vpack.c.bf16 %v3199_v39, %v3195_v10  ;;  %8270 = vst [vmem:[#allocation23_spill] sm:$0xff] %v6966_v63  ;;  %v6969_v57 = vsub.f32 %v6936_v3, %v3199_v39  ;;  %v3392_v1 = vand.u32 4294901760, %v6956_v18  ;;  %v3398_v60 = vand.u32 4294901760, %v6966_v63  ;;  %v3144_v39 = vld [vmem:[%s7854_s6 + $0x8] sm:$0xff] }
 0x4c4   : > { %v6953_v6 = vpack.c.bf16 %v3197_v21, %v3193_v11  ;;  %v6959_v24 = vsub.f32 %v6938_v12, %v3197_v21  ;;  %v2990_v36 = vmul.f32 %v6925_v34, %v8278_v37  ;;  %v2860_v29 = vmul.f32 %v8264_v56, %v6938_v12 }
 0x4c5   : > { %2871 = vrot.lane.b32.xlu1 %v2857_v4, %s5497_s20  ;;  %8271 = vst [vmem:[#allocation41_spill] sm:$0xff] %v6969_v57  ;;  %v3410_v42 = vand.u32 4294901760, %v6969_v57  ;;  %v3393_v43 = vsub.f32 %v6956_v18, %v3392_v1  ;;  %v3399_v33 = vsub.f32 %v6966_v63, %v3398_v60  ;;  %v2902_v45 = vmul.f32 %v8266_v8, %v6938_v12  ;;  %v8283_v4 = vld [vmem:[#allocation19_spill] sm:$0xff] }
 0x4c6   : > { %2911 = vrot.lane.b32.xlu0 %v2898_v41, %s5496_s16  ;;  %8268 = vst [vmem:[#allocation13_spill] sm:$0xff] %v6959_v24  ;;  %v3404_v48 = vand.u32 4294901760, %v6959_v24  ;;  %v2859_v55 = vmul.f32 %v6936_v3, %v8263_v59  ;;  %v2992_v40 = vmul.f32 %v8279_v28, %v6936_v3  ;;  %v2901_v46 = vmul.f32 %v6936_v3, %v8265_v23  ;;  %v3104_v23 = vld [vmem:[%s7853_s5 + $0x8] sm:$0xff] }
 0x4c7   : > { %v3411_v38 = vsub.f32 %v6969_v57, %v3410_v42  ;;  %v6989_v22 = vpack.c.bf16 %v3410_v42, %v3398_v60  ;;  %v3394_v5 = vand.u32 4294901760, %v3393_v43  ;;  %v3400_v15 = vand.u32 4294901760, %v3399_v33  ;;  %v2796_v60 = vpop.permute.xlu0 %2795 }
 0x4c8   : > { %v3405_v13 = vsub.f32 %v6959_v24, %v3404_v48  ;;  %v6983_v35 = vpack.c.bf16 %v3404_v48, %v3392_v1  ;;  %v2782_v54 = vmul.f32 %v8273_v53, %v6938_v12  ;;  %v8280_v20 = vmov 0.0  }
 0x4c9   : > { %2913 = vrot.lane.b32.xlu1 %v2899_v61, %s5496_s16  ;;  %8274 = vst [vmem:[#allocation47_spill] sm:$0xff] %v6989_v22  ;;  %v3412_v44 = vand.u32 4294901760, %v3411_v38  ;;  %v2989_v49 = vmul.f32 %v8279_v28, %v6923_v47  ;;  %v3068_v30 = vmul.f32 %v6925_v34, %v8281_v51  ;;  %v3071_v19 = vmul.f32 %v6938_v12, %v8281_v51 }
 0x4ca   : > { %2959 = vrot.lane.b32.xlu0 %v2947_v52, %s5493_s8  ;;  %8272 = vst [vmem:[#allocation30_spill] sm:$0xff] %v6983_v35  ;;  %v3406_v58 = vand.u32 4294901760, %v3405_v13  ;;  %v3067_v7 = vmul.f32 %v8282_v27, %v6923_v47  ;;  %v2951_v59 = vmul.f32 %v6938_v12, %v8276_v0  ;;  %v2993_v56 = vmul.f32 %v6938_v12, %v8278_v37 }
 0x4cb   : > { %v7000_v17 = vpack.c.bf16 %v3412_v44, %v3400_v15  ;;  %v3156_v11 = vsel %vm425_vm10, %v3104_v23, 0  ;;  %v2868_v43 = vpop.permute.xlu0 %2867 }
 0x4cc   : > { %v6996_v2 = vpack.c.bf16 %v3406_v58, %v3394_v5  ;;  %v7071_v21 = vand.u32 4294901760, %v3156_v11 }
 0x4cd   : > { %2833 = vrot.lane.b32.xlu1 %v6936_v3, %s5499_s22  ;;  %8277 = vst [vmem:[#allocation36_spill] sm:$0xff] %v7000_v17 }
 0x4ce   : > { %2793 = vrot.lane.b32.xlu0 %v2779_v31, %s5498_s21  ;;  %8275 = vst [vmem:[#allocation32_spill] sm:$0xff] %v6996_v2  ;;  %8284 = vst [vmem:[#allocation38_spill] sm:$0xff] %v7071_v21  ;;  %v7075_v10 = vsub.f32 %v3156_v11, %v7071_v21  ;;  %3539 = vmatprep.mubr.f32.mxu0 %v7071_v21 }
 0x4cf   : > { %v2910_v53 = vpop.permute.xlu0 %2909 }
 0x4d0   : > { %8285 = vst [vmem:[#allocation39_spill] sm:$0xff] %v7075_v10  ;;  %v7983_v8 = vand.u32 4294901760, %v7075_v10 }
 0x4d1   : > { %2797 = vrot.lane.b32.xlu1 %v2781_v16, %s5498_s21 }
 0x4d2   : > { %2961 = vrot.lane.b32.xlu0 %v2948_v14, %s5493_s8 }
 0x4d5   : > { %2965 = vrot.lane.b32.xlu1 %v2950_v26, %s5493_s8 }
 0x4d6   : > { %3003 = vrot.lane.b32.xlu0 %v2990_v36, %s5495_s15 }
 0x4d9   : > { %2877 = vrot.lane.b32.xlu1 %v2860_v29, %s5497_s20 }
 0x4da   : > { %2835 = vrot.lane.b32.xlu0 %v6938_v12, %s5499_s22 }
 0x4dd   : > { %2919 = vrot.lane.b32.xlu1 %v2902_v45, %s5496_s16 }
 0x4de   : > { %2875 = vrot.lane.b32.xlu0 %v2859_v55, %s5497_s20 }
 0x4e1   : > { %3007 = vrot.lane.b32.xlu1 %v2992_v40, %s5495_s15 }
 0x4e2   : > { %2917 = vrot.lane.b32.xlu0 %v2901_v46, %s5496_s16 }
 0x4e5   : > { %5472 = vrot.lane.b32.xlu1 %v8280_v20, %s5500_s23 }
 0x4e6   : > { %2799 = vrot.lane.b32.xlu0 %v2782_v54, %s5498_s21  ;;  %v3106_v54 = vld [vmem:[%s7853_s5 + $0x18] sm:$0xff] }
 0x4e9   : > { %3037 = vrot.lane.b32.xlu1 %v6923_v47, %s5500_s23  ;;  %v2790_v47 = vpop.permute.xlu1 %2789 }
 0x4ea   : > { %3001 = vrot.lane.b32.xlu0 %v2989_v49, %s5495_s15 }
 0x4ed   : > { %3081 = vrot.lane.b32.xlu1 %v3068_v30, %s5494_s13  ;;  %v5468_v41 = vpop.permute.xlu1 %5467 }
 0x4ee   : > { %3039 = vrot.lane.b32.xlu0 %v6925_v34, %s5500_s23  ;;  %v3143_v34 = vld [vmem:[%s7854_s6] sm:$0xff]  ;;  %v5469_v44 = vunpack.i.l.bf16 %v5468_v41  ;;  %v5470_v26 = vunpack.i.h.bf16 %v5468_v41 }
 0x4f1   : > { %3087 = vrot.lane.b32.xlu1 %v3071_v19, %s5494_s13  ;;  %v7082_v61 = vpop.permute.xlu1 %2873 }
 0x4f2   : > { %3045 = vrot.lane.b32.xlu0 %v6938_v12, %s5500_s23  ;;  %v3070_v12 = vmul.f32 %v8282_v27, %v6936_v3 }
 0x4f5   : > { %3079 = vrot.lane.b32.xlu1 %v3067_v7, %s5494_s13  ;;  %v7087_v52 = vpop.permute.xlu1 %2915  ;;  %v3103_v7 = vld [vmem:[%s7853_s5] sm:$0xff] }
 0x4f6   : > { %3043 = vrot.lane.b32.xlu0 %v6936_v3, %s5500_s23  ;;  %v3264_v3 = vsub.f32 %v7075_v10, %v7983_v8 }
 0x4f8   : > { %v3265_v50 = vand.u32 4294901760, %v3264_v3  ;;  %v3105_v3 = vld [vmem:[%s7853_s5 + $0x10] sm:$0xff] }
 0x4f9   : > { %3147 = vperm.xlu1 %5455, %v3143_v34   ;;  %v7089_v1 = vpop.permute.xlu1 %2963 }
 0x4fa   : > { %2967 = vrot.lane.b32.xlu0 %v2951_v59, %s5493_s8  ;;  %3266 = vmatprep.mubr.f32.mxu1 %v3265_v50 }
 0x4fd   : > { %4163 = vperm.xlu1 %5455, %v4160_v32   ;;  %v7091_v48 = vpop.permute.xlu1 %2969 }
 0x4fe   : > { %3009 = vrot.lane.b32.xlu0 %v2993_v56, %s5495_s15  ;;  %v3159_v56 = vsel %vm425_vm10, %v3106_v54, 0  ;;  %v7191_v54 = vand.u32 4294901760, %v3105_v3 }
 0x500   : > { %8294 = vst [vmem:[#allocation53_spill] sm:$0xff] %v7191_v54 }
 0x501   : > { %v7093_v42 = vpop.permute.xlu1 %3005 }
 0x502   : > { %3083 = vrot.lane.b32.xlu0 %v8283_v4, %s5494_s13 }
 0x505   : > { %v7095_v13 = vpop.permute.xlu1 %3011 }
 0x506   : > { %3089 = vrot.lane.b32.xlu0 %v8283_v4, %s5494_s13 }
 0x50a   : > { %3085 = vrot.lane.b32.xlu0 %v3070_v12, %s5494_s13 }
 0x50e   : > { %3152 = vperm.xlu0 %5454, %v3144_v39   ;;  %v7158_v39 = vand.u32 4294901760, %v3103_v7 }
 0x510   : > { %8289 = vst [vmem:[#allocation44_spill] sm:$0xff] %v7158_v39  ;;  %v7195_v9 = vsub.f32 %v3103_v7, %v7158_v39 }
 0x512   : > { %8295 = vst [vmem:[#allocation55_spill] sm:$0xff] %v7195_v9 }
 0x52f   : > { %v2828_v31 = vpop.permute.xlu1 %2827 }
 0x530   : > { %v2830_v33 = vpop.permute.xlu0 %2829  ;;  %v7098_v16 = vsel %vm425_vm10, %v5469_v44, %v2828_v31 }
 0x531   : > { %v7992_v37 = vand.u32 4294901760, %v7098_v16  ;;  %v7107_v45 = vsel %vm425_vm10, %v2828_v31, %v2830_v33 }
 0x532   : > { %v7984_v30 = vand.u32 4294901760, %v7107_v45 }
 0x533   : > { %v2792_v38 = vpop.permute.xlu1 %2791  ;;  %v7122_v49 = vsub.f32 %v7098_v16, %v7992_v37 }
 0x534   : > { %v2870_v5 = vpop.permute.xlu0 %2869  ;;  %v7104_v36 = vsel %vm406_vm8, %v2790_v47, %v2792_v38  ;;  %v7166_v50 = vsub.f32 %v7107_v45, %v7984_v30 }
 0x535   : > { %v7113_v40 = vsel %vm458_vm7, %v2868_v43, %v2870_v5  ;;  %8286 = vst [vmem:[#allocation40_spill] sm:$0xff] %v7122_v49  ;;  %v7986_v51 = vand.u32 4294901760, %v7104_v36  ;;  %v3326_v11 = vand.u32 4294901760, %v7122_v49 }
 0x536   : > { %v7987_v34 = vand.u32 4294901760, %v7113_v40  ;;  %8290 = vst [vmem:[#allocation48_spill] sm:$0xff] %v7166_v50  ;;  %v3320_v25 = vand.u32 4294901760, %v7166_v50 }
 0x537   : > { %v2872_v58 = vpop.permute.xlu1 %2871  ;;  %v7156_v12 = vsub.f32 %v7104_v36, %v7986_v51  ;;  %v7232_v37 = vsub.f32 %v7122_v49, %v3326_v11 }
 0x538   : > { %v2912_v15 = vpop.permute.xlu0 %2911  ;;  %v7145_v47 = vsel %vm458_vm7, %v2870_v5, %v2872_v58  ;;  %v7188_v44 = vsub.f32 %v7113_v40, %v7987_v34 }
 0x539   : > { %v7148_v4 = vsel %vm489_vm9, %v2910_v53, %v2912_v15  ;;  %8288 = vst [vmem:[#allocation43_spill] sm:$0xff] %v7156_v12  ;;  %v7175_v53 = vand.u32 4294901760, %v3159_v56  ;;  %v7990_v31 = vand.u32 4294901760, %v7145_v47  ;;  %v3302_v8 = vand.u32 4294901760, %v7156_v12 }
 0x53a   : > { %v7991_v33 = vand.u32 4294901760, %v7148_v4  ;;  %v8300_v35 = vand.u32 4294901760, %v7188_v44 }
 0x53b   : > { %v2914_v0 = vpop.permute.xlu1 %2913  ;;  %8292 = vst [vmem:[#allocation51_spill] sm:$0xff] %v7175_v53  ;;  %v7205_v34 = vsub.f32 %v3159_v56, %v7175_v53 }
 0x53c   : > { %v7100_v14 = vpop.permute.xlu0 %2959  ;;  %v7199_v30 = vsel %vm489_vm9, %v2912_v15, %v2914_v0  ;;  %v7215_v7 = vsub.f32 %v7148_v4, %v7991_v33  ;;  %v7252_v21 = vsub.f32 %v7188_v44, %v8300_v35 }
 0x53d   : > { %8296 = vst [vmem:[#allocation59_spill] sm:$0xff] %v7205_v34 }
 0x53e   : > { %v8307_v18 = vand.u32 4294901760, %v7215_v7 }
 0x53f   : > { %v2834_v29 = vpop.permute.xlu1 %2833 }
 0x540   : > { %v7110_v55 = vsel %vm425_vm10, %v5470_v26, %v2834_v29  ;;  %v2794_v28 = vpop.permute.xlu0 %2793  ;;  %v7288_v24 = vsub.f32 %v7215_v7, %v8307_v18 }
 0x541   : > { %v7989_v46 = vand.u32 4294901760, %v7110_v55  ;;  %v8311_v49 = vand.u32 4294901760, %v7110_v55 }
 0x543   : > { %v7129_v19 = vsub.f32 %v7110_v55, %v7989_v46  ;;  %v7131_v27 = vpop.permute.xlu1 %2797 }
 0x544   : > { %v7139_v59 = vsel %vm406_vm8, %v2796_v60, %v7131_v27  ;;  %v7141_v32 = vpop.permute.xlu0 %2961 }
 0x545   : > { %8287 = vst [vmem:[#allocation42_spill] sm:$0xff] %v7129_v19  ;;  %v7988_v23 = vand.u32 4294901760, %v7129_v19  ;;  %v7985_v41 = vand.u32 4294901760, %v7139_v59  ;;  %v7293_v63 = vsel %vm472_vm6, %v7100_v14, %v7141_v32 }
 0x547   : > { %v7171_v60 = vsub.f32 %v7139_v59, %v7985_v41  ;;  %v7173_v43 = vpop.permute.xlu1 %2965  ;;  %v7183_v58 = vpack.c.bf16 %v7988_v23, %v3326_v11  ;;  %v7202_v41 = vsel %vm406_vm8, %v2792_v38, %v2794_v28  ;;  %v7210_v23 = vsub.f32 %v7145_v47, %v7990_v31 }
 0x548   : > { %v7179_v5 = vpop.permute.xlu0 %3003  ;;  %v7226_v28 = vsub.f32 %v3105_v3, %v7191_v54  ;;  %v8301_v38 = vand.u32 4294901760, %v7199_v30 }
 0x549   : > { %8291 = vst [vmem:[#allocation49_spill] sm:$0xff] %v7171_v60  ;;  %8293 = vst [vmem:[#allocation52_spill] sm:$0xff] %v7183_v58  ;;  %v7993_v26 = vand.u32 4294901760, %v7171_v60  ;;  %v3344_v3 = vand.u32 4294901760, %v7210_v23  ;;  %v8303_v58 = vand.u32 4294901760, %v7202_v41 }
 0x54a   : > { %8297 = vst [vmem:[#allocation60_spill] sm:$0xff] %v7210_v23  ;;  %8299 = vst [vmem:[#allocation21_spill] sm:$0xff] %v7226_v28 }
 0x54b   : > { %v2878_v51 = vpop.permute.xlu1 %2877  ;;  %v7219_v15 = vpack.c.bf16 %v7993_v26, %v3302_v8  ;;  %v7235_v26 = vsub.f32 %v7166_v50, %v3320_v25  ;;  %v7296_v31 = vsub.f32 %v7210_v23, %v3344_v3  ;;  %v8310_v23 = vand.u32 4294901760, %v7098_v16 }
 0x54c   : > { %v2836_v46 = vpop.permute.xlu0 %2835 }
 0x54d   : > { %8298 = vst [vmem:[#allocation35_spill] sm:$0xff] %v7219_v15  ;;  %v7223_v0 = vsel %vm425_vm10, %v2834_v29, %v2836_v46  ;;  %v7240_v46 = vsub.f32 %v7156_v12, %v3302_v8  ;;  %v7270_v15 = vsub.f32 %v7202_v41, %v8303_v58  ;;  %v7335_v53 = vpack.c.bf16 %v8311_v49, %v8310_v23 }
 0x54e   : > { %v7996_v33 = vand.u32 4294901760, %v7223_v0  ;;  %v8315_v23 = vand.u32 4294901760, %v7104_v36  ;;  %v8318_v12 = vand.u32 4294901760, %v7293_v63 }
 0x54f   : > { %v2920_v22 = vpop.permute.xlu1 %2919  ;;  %8304 = vst [vmem:[#allocation20_spill] sm:$0xff] %v7270_v15  ;;  %v3296_v54 = vand.u32 4294901760, %v7270_v15 }
 0x550   : > { %v7247_v11 = vsub.f32 %v7223_v0, %v7996_v33  ;;  %v2876_v56 = vpop.permute.xlu0 %2875  ;;  %v7265_v33 = vsub.f32 %v7199_v30, %v8301_v38  ;;  %v8305_v38 = vand.u32 4294901760, %v7195_v9 }
 0x551   : > { %v7256_v29 = vsel %vm458_vm7, %v7082_v61, %v2876_v56  ;;  %v7259_v8 = vsel %vm458_vm7, %v2876_v56, %v2878_v51 }
 0x552   : > { %8302 = vst [vmem:[#allocation22_spill] sm:$0xff] %v7265_v33  ;;  %v3332_v35 = vand.u32 4294901760, %v7247_v11  ;;  %v8008_v61 = vand.u32 4294901760, %v7259_v8  ;;  %v7282_v57 = vsub.f32 %v7195_v9, %v8305_v38  ;;  %v3368_v10 = vand.u32 4294901760, %v7265_v33 }
 0x553   : > { %v7276_v56 = vpop.permute.xlu1 %3007 }
 0x554   : > { %8306 = vst [vmem:[#allocation31_spill] sm:$0xff] %v7282_v57  ;;  %v2918_v51 = vpop.permute.xlu0 %2917  ;;  %v7301_v38 = vsub.f32 %v7259_v8, %v8008_v61  ;;  %v7310_v9 = vpack.c.bf16 %v3332_v35, %v3320_v25  ;;  %v7319_v61 = vsel %vm472_vm6, %v7141_v32, %v7089_v1  ;;  %v3333_v57 = vsub.f32 %v7247_v11, %v3332_v35 }
 0x555   : > { %v7305_v58 = vsel %vm489_vm9, %v7087_v52, %v2918_v51  ;;  %v7308_v18 = vsel %vm489_vm9, %v2918_v51, %v2920_v22  ;;  %v8309_v22 = vand.u32 4294901760, %v7256_v29  ;;  %v8313_v51 = vand.u32 4294901760, %v7129_v19 }
 0x556   : > { %8308 = vst [vmem:[#allocation33_spill] sm:$0xff] %v7310_v9  ;;  %v8312_v1 = vand.u32 4294901760, %v7308_v18  ;;  %v3356_v9 = vand.u32 4294901760, %v7301_v38  ;;  %v8314_v16 = vand.u32 4294901760, %v7305_v58  ;;  %v8330_v35 = vand.u32 4294901760, %v7259_v8 }
 0x557   : > { %v7325_v25 = vsub.f32 %v7256_v29, %v8309_v22  ;;  %v7328_v14 = vpop.permute.xlu1 %5472  ;;  %v7346_v50 = vsub.f32 %v7129_v19, %v8313_v51  ;;  %v7364_v19 = vsub.f32 %v7265_v33, %v3368_v10  ;;  %v8320_v33 = vand.u32 4294901760, %v7202_v41 }
 0x558   : > { %v7340_v32 = vsub.f32 %v7308_v18, %v8312_v1  ;;  %v2800_v52 = vpop.permute.xlu0 %2799  ;;  %v7352_v55 = vsub.f32 %v7305_v58, %v8314_v16  ;;  %v8316_v1 = vand.u32 4294901760, %v7139_v59  ;;  %v7369_v16 = vsub.f32 %v7293_v63, %v8318_v12 }
 0x559   : > { %v2804_v49 = vsel %vm406_vm8, %v7131_v27, %v2800_v52  ;;  %v3362_v20 = vand.u32 4294901760, %v7325_v25  ;;  %v3297_v59 = vsub.f32 %v7270_v15, %v3296_v54  ;;  %v8319_v52 = vand.u32 4294901760, %v7171_v60 }
 0x55a   : > { %v7360_v22 = vpack.c.bf16 %v8316_v1, %v8315_v23  ;;  %v3165_v51 = vand.u32 4294901760, %v2804_v49  ;;  %v3380_v27 = vand.u32 4294901760, %v7340_v32  ;;  %v7380_v1 = vsel %vm441_vm5, %v7179_v5, %v7093_v42 }
 0x55b   : > { %v3038_v36 = vpop.permute.xlu1 %3037  ;;  %v3315_v23 = vsub.f32 %v7171_v60, %v8319_v52  ;;  %v3386_v15 = vand.u32 4294901760, %v7352_v55  ;;  %v5474_v34 = vunpack.i.l.bf16 %v7328_v14  ;;  %v7391_v17 = vpack.c.bf16 %v3356_v9, %v3344_v3 }
 0x55c   : > { %8317 = vst [vmem:[#allocation34_spill] sm:$0xff] %v7360_v22  ;;  %v7382_v39 = vsub.f32 %v2804_v49, %v3165_v51  ;;  %v3002_v12 = vpop.permute.xlu0 %3001  ;;  %v7386_v28 = vpack.c.bf16 %v3165_v51, %v8320_v33  ;;  %v8323_v52 = vand.u32 4294901760, %v7319_v61  ;;  %v8324_v41 = vand.u32 4294901760, %v7107_v45 }
 0x55d   : > { %8322 = vst [vmem:[#allocation28_spill] sm:$0xff] %v7391_v17  ;;  %v8325_v33 = vand.u32 4294901760, %v7223_v0  ;;  %v8326_v60 = vand.u32 4294901760, %v7188_v44  ;;  %v3316_v45 = vand.u32 4294901760, %v3315_v23  ;;  %v8332_v23 = vand.u32 4294901760, %v7215_v7 }
 0x55e   : > { %8321 = vst [vmem:[#allocation37_spill] sm:$0xff] %v7386_v28  ;;  %v7396_v42 = vsub.f32 %v7319_v61, %v8323_v52  ;;  %v3308_v49 = vand.u32 4294901760, %v7382_v39  ;;  %5082 = vmatprep.subr.bf16.mxu1 %v7386_v28  ;;  %v3298_v52 = vand.u32 4294901760, %v3297_v59  ;;  %v7415_v28 = vpack.c.bf16 %v3380_v27, %v3368_v10 }
 0x55f   : > { %v7404_v51 = vpack.c.bf16 %v8325_v33, %v8324_v41  ;;  %v7408_v17 = vpop.permute.xlu1 %3081  ;;  %5084 = vmatpush1.bf16.msra.mxu1 %v7360_v22  ;;  %v7413_v2 = vpack.c.bf16 %v3362_v20, %v8326_v60  ;;  %v8329_v41 = vand.u32 4294901760, %v7145_v47  ;;  %v5475_v59 = vunpack.i.h.bf16 %v7328_v14 }
 0x560   : > { %8328 = vst [vmem:[#allocation50_spill] sm:$0xff] %v7415_v28  ;;  %v3040_v0 = vpop.permute.xlu0 %3039  ;;  %v3309_v3 = vsub.f32 %v7382_v39, %v3308_v49  ;;  %v7425_v22 = vpack.c.bf16 %v3308_v49, %v3296_v54  ;;  %v7430_v10 = vsel %vm441_vm5, %v3002_v12, %v7179_v5  ;;  %v7437_v47 = vpack.c.bf16 %v3386_v15, %v8332_v23 }
 0x561   : > { %8327 = vst [vmem:[#allocation29_spill] sm:$0xff] %v7413_v2  ;;  %5086 = vmatprep.subr.bf16.mxu1 %v7404_v51  ;;  %v7422_v33 = vpack.c.bf16 %v8330_v35, %v8329_v41  ;;  %v7433_v60 = vsel %vm570_vm12, %v3040_v0, %v5474_v34  ;;  %v7440_v8 = vsel %vm570_vm12, %v3038_v36, %v3040_v0  ;;  %v3334_v35 = vand.u32 4294901760, %v3333_v57 }
 0x562   : > { %8331 = vst [vmem:[#allocation54_spill] sm:$0xff] %v7425_v22  ;;  %8333 = vst [vmem:[#allocation56_spill] sm:$0xff] %v7437_v47  ;;  %v3310_v41 = vand.u32 4294901760, %v3309_v3  ;;  %v3357_v54 = vsub.f32 %v7301_v38, %v3356_v9  ;;  %v8334_v5 = vand.u32 4294901760, %v7380_v1  ;;  %v3363_v36 = vsub.f32 %v7325_v25, %v3362_v20 }
 0x563   : > { %v7451_v23 = vpop.permute.xlu1 %3087  ;;  %5088 = vmatpush1.bf16.msra.mxu1 %v7335_v53  ;;  %v8335_v0 = vand.u32 4294901760, %v7240_v46  ;;  %v8337_v49 = vand.u32 4294901760, %v7256_v29  ;;  %v8028_v47 = vand.u32 4294901760, %v7440_v8  ;;  %v8338_v20 = vand.u32 4294901760, %v7199_v30 }
 0x564   : > { %v7448_v34 = vsub.f32 %v7380_v1, %v8334_v5  ;;  %5090 = vmatprep.subr.bf16.mxu1 %v7422_v33  ;;  %v3046_v9 = vpop.permute.xlu0 %3045  ;;  %v5117_v3 = vpack.c.bf16 %v3310_v41, %v3298_v52  ;;  %v8336_v5 = vand.u32 4294901760, %v7113_v40  ;;  %v8339_v57 = vand.u32 4294901760, %v7308_v18 }
 0x565   : > { %v5119_v14 = vpack.c.bf16 %v3316_v45, %v8335_v0  ;;  %v7467_v28 = vsel %vm570_vm12, %v3046_v9, %v5475_v59  ;;  %v8340_v40 = vand.u32 4294901760, %v7235_v26  ;;  %v3358_v29 = vand.u32 4294901760, %v3357_v54 }
 0x566   : > { %v7463_v12 = vpack.c.bf16 %v8337_v49, %v8336_v5  ;;  %v7473_v2 = vpack.c.bf16 %v8339_v57, %v8338_v20  ;;  %v8029_v46 = vand.u32 4294901760, %v7467_v28  ;;  %5118 = vmatprep.subr.bf16.mxu0 %v5117_v3  ;;  %v3381_v45 = vsub.f32 %v7340_v32, %v3380_v27 }
 0x567   : > { %v5121_v52 = vpack.c.bf16 %v3334_v35, %v8340_v40  ;;  %v8030_v41 = vand.u32 4294901760, %v7448_v34  ;;  %v3387_v59 = vsub.f32 %v7352_v55, %v3386_v15  ;;  %v8341_v49 = vand.u32 4294901760, %v7433_v60  ;;  %5120 = vmatpush1.bf16.msra.mxu0 %v5119_v14  ;;  %v3080_v5 = vpop.permute.xlu1 %3079 }
 0x568   : > { %5092 = vmatpush1.bf16.msra.mxu1 %v7463_v12  ;;  %v3370_v18 = vand.u32 4294901760, %v7364_v19  ;;  %v8342_v26 = vand.u32 4294901760, %v7369_v16  ;;  %v3364_v27 = vand.u32 4294901760, %v3363_v36  ;;  %v8343_v54 = vand.u32 4294901760, %v7430_v10  ;;  %v3044_v19 = vpop.permute.xlu0 %3043 }
 0x569   : > { %v7484_v30 = vsub.f32 %v7433_v60, %v8341_v49  ;;  %v7501_v57 = vsub.f32 %v7467_v28, %v8029_v46  ;;  %5094 = vmatprep.subr.bf16.mxu1 %v7473_v2  ;;  %5122 = vmatprep.subr.bf16.mxu0 %v5121_v52  ;;  %v8344_v14 = vand.u32 4294901760, %v7148_v4  ;;  %v8345_v3 = vand.u32 4294901760, %v7305_v58 }
 0x56a   : > { %v7491_v35 = vsub.f32 %v7369_v16, %v8342_v26  ;;  %v7496_v15 = vsub.f32 %v7430_v10, %v8343_v54  ;;  %v7513_v36 = vsub.f32 %v7440_v8, %v8028_v47  ;;  %v3051_v20 = vsel %vm570_vm12, %v3044_v19, %v3046_v9 }
 0x56b   : > { %v7508_v0 = vpack.c.bf16 %v8345_v3, %v8344_v14  ;;  %v8346_v40 = vand.u32 4294901760, %v7232_v37  ;;  %v8347_v49 = vand.u32 4294901760, %v7346_v50  ;;  %v8034_v26 = vand.u32 4294901760, %v7501_v57 }
 0x56c   : > { %v8348_v4 = vand.u32 4294901760, %v7296_v31  ;;  %v3382_v54 = vand.u32 4294901760, %v3381_v45  ;;  %v8349_v14 = vand.u32 4294901760, %v7396_v42  ;;  %v3388_v47 = vand.u32 4294901760, %v3387_v59  ;;  %v2968_v45 = vpop.permute.xlu0 %2967 }
 0x56d   : > { %v5123_v52 = vpack.c.bf16 %v8347_v49, %v8346_v40  ;;  %v3464_v46 = vand.u32 4294901760, %v7484_v30  ;;  %v3223_v9 = vand.u32 4294901760, %v3051_v20  ;;  %5096 = vmatpush1.bf16.msra.mxu1 %v7508_v0  ;;  %v7533_v37 = vsub.f32 %v7448_v34, %v8030_v41 }
 0x56e   : > { %v5125_v58 = vpack.c.bf16 %v3358_v29, %v8348_v4  ;;  %v7526_v3 = vsub.f32 %v7396_v42, %v8349_v14  ;;  %v8033_v31 = vand.u32 4294901760, %v7496_v15  ;;  %v7539_v29 = vsel %vm389_vm4, %v3080_v5, %v7408_v17  ;;  %5098 = vmatprep.subr.bf16.mxu1 %v6953_v6 }
 0x56f   : > { %5124 = vmatpush1.bf16.msra.mxu0 %v5123_v52  ;;  %v8350_v59 = vand.u32 4294901760, %v7252_v21  ;;  %v8031_v40 = vand.u32 4294901760, %v7513_v36  ;;  %v2973_v49 = vsel %vm472_vm6, %v7173_v43, %v2968_v45  ;;  %v2974_v52 = vsel %vm472_vm6, %v2968_v45, %v7091_v48 }
 0x570   : > { %5126 = vmatprep.subr.bf16.mxu0 %v5125_v58  ;;  %v7551_v4 = vpack.c.bf16 %v8034_v26, %v3464_v46  ;;  %v3205_v5 = vand.u32 4294901760, %v2974_v52  ;;  %v3207_v14 = vand.u32 4294901760, %v2973_v49  ;;  %v5129_v41 = vpack.c.bf16 %v3382_v54, %v3370_v18 }
 0x571   : > { %v5127_v19 = vpack.c.bf16 %v3364_v27, %v8350_v59  ;;  %v3418_v58 = vand.u32 4294901760, %v7526_v3  ;;  %v8032_v21 = vand.u32 4294901760, %v7539_v29  ;;  %v7555_v27 = vsub.f32 %v3051_v20, %v3223_v9  ;;  %5100 = vmatpush1.bf16.msra.mxu1 %v6961_v62 }
 0x572   : > { %8351 = vst [vmem:[#allocation57_spill] sm:$0xff] %v7551_v4  ;;  %v8352_v43 = vand.u32 4294901760, %v7288_v24  ;;  %v7564_v45 = vsub.f32 %v7496_v15, %v8033_v31  ;;  %v8353_v18 = vand.u32 4294901760, %v7293_v63  ;;  %v7570_v3 = vsub.f32 %v2974_v52, %v3205_v5 }
 0x573   : > { %5128 = vmatpush1.bf16.msra.mxu0 %v5127_v19  ;;  %v7572_v20 = vsub.f32 %v2973_v49, %v3207_v14  ;;  %v3010_v19 = vpop.permute.xlu0 %3009  ;;  %v7577_v24 = vsub.f32 %v7513_v36, %v8031_v40  ;;  %v8354_v63 = vand.u32 4294901760, %v7319_v61  ;;  %v8355_v52 = vand.u32 4294901760, %v7433_v60 }
 0x574   : > { %v5131_v59 = vpack.c.bf16 %v3388_v47, %v8352_v43  ;;  %v7568_v54 = vpack.c.bf16 %v3207_v14, %v8353_v18  ;;  %5130 = vmatprep.subr.bf16.mxu0 %v5129_v41  ;;  %v3015_v47 = vsel %vm441_vm5, %v7276_v56, %v3010_v19  ;;  %v3016_v43 = vsel %vm441_vm5, %v3010_v19, %v7095_v13 }
 0x575   : > { %v7585_v18 = vpack.c.bf16 %v3205_v5, %v8354_v63  ;;  %v3428_v49 = vand.u32 4294901760, %v7570_v3  ;;  %v3434_v41 = vand.u32 4294901760, %v7572_v20  ;;  %v8356_v14 = vand.u32 4294901760, %v7467_v28  ;;  %v8359_v63 = vld [vmem:[#allocation32_spill] sm:$0xff] }
 0x576   : > { %v7596_v40 = vsub.f32 %v7484_v30, %v3464_v46  ;;  %v7601_v13 = vsub.f32 %v7539_v29, %v8032_v21  ;;  %v3482_v61 = vand.u32 4294901760, %v7555_v27  ;;  %v3213_v56 = vand.u32 4294901760, %v3016_v43 }
 0x577   : > { %v7593_v48 = vpack.c.bf16 %v8356_v14, %v8355_v52  ;;  %v3215_v5 = vand.u32 4294901760, %v3015_v47  ;;  %5102 = vmatprep.subr.bf16.mxu1 %v7585_v18  ;;  %5132 = vmatpush1.bf16.msra.mxu0 %v5131_v59  ;;  %v3448_v60 = vand.u32 4294901760, %v7564_v45  ;;  %v8358_v28 = vand.u32 4294901760, %v7440_v8  ;;  %v3084_v52 = vpop.permute.xlu0 %3083 }
 0x578   : > { %v3435_v46 = vsub.f32 %v7572_v20, %v3434_v41  ;;  %5104 = vmatpush1.bf16.msra.mxu1 %v7568_v54  ;;  %5134 = vmatprep.subr.bf16.mxu0 %v8359_v63  ;;  %v3429_v14 = vsub.f32 %v7570_v3, %v3428_v49  ;;  %v8360_v21 = vand.u32 4294901760, %v7430_v10  ;;  %v7618_v59 = vsub.f32 %v3016_v43, %v3213_v56  ;;  %v8363_v43 = vld [vmem:[#allocation36_spill] sm:$0xff] }
 0x579   : > { %8357 = vst [vmem:[#allocation46_spill] sm:$0xff] %v7593_v48  ;;  %v7608_v19 = vpack.c.bf16 %v3223_v9, %v8358_v28  ;;  %v7620_v45 = vsub.f32 %v3015_v47, %v3215_v5  ;;  %v3092_v8 = vsel %vm389_vm4, %v7408_v17, %v3084_v52  ;;  %v8361_v50 = vand.u32 4294901760, %v7380_v1 }
 0x57a   : > { %v7616_v31 = vpack.c.bf16 %v3215_v5, %v8360_v21  ;;  %v3436_v9 = vand.u32 4294901760, %v3435_v46  ;;  %v3225_v28 = vand.u32 4294901760, %v3092_v8  ;;  %v3430_v63 = vand.u32 4294901760, %v3429_v14 }
 0x57b   : > { %v7626_v26 = vpack.c.bf16 %v3213_v56, %v8361_v50  ;;  %v3483_v4 = vsub.f32 %v7555_v27, %v3482_v61  ;;  %v3452_v10 = vand.u32 4294901760, %v7618_v59  ;;  %v3458_v21 = vand.u32 4294901760, %v7620_v45  ;;  %5136 = vmatpush1.bf16.msra.mxu0 %v8363_v43  ;;  %v3090_v1 = vpop.permute.xlu0 %3089 }
 0x57c   : > { %v8364_v47 = vand.u32 4294901760, %v7501_v57  ;;  %v7635_v17 = vsub.f32 %v3092_v8, %v3225_v28  ;;  %v5137_v50 = vpack.c.bf16 %v3430_v63, %v3418_v58  ;;  %v8365_v56 = vand.u32 4294901760, %v7491_v35 }
 0x57d   : > { %8362 = vst [vmem:[#allocation58_spill] sm:$0xff] %v7626_v26  ;;  %5106 = vmatprep.subr.bf16.mxu1 %v7626_v26  ;;  %v8366_v52 = vand.u32 4294901760, %v7396_v42  ;;  %v3459_v22 = vsub.f32 %v7620_v45, %v3458_v21  ;;  %v3094_v43 = vsel %vm389_vm4, %v7451_v23, %v3090_v1  ;;  %v3453_v8 = vsub.f32 %v7618_v59, %v3452_v10 }
 0x57e   : > { %v3477_v5 = vsub.f32 %v7501_v57, %v8364_v47  ;;  %v5139_v46 = vpack.c.bf16 %v3436_v9, %v8365_v56  ;;  %5108 = vmatpush1.bf16.msra.mxu1 %v7616_v31  ;;  %v8368_v47 = vand.u32 4294901760, %v7369_v16  ;;  %v3488_v35 = vand.u32 4294901760, %v7635_v17  ;;  %5138 = vmatprep.subr.bf16.mxu0 %v5137_v50 }
 0x57f   : > { %v7642_v14 = vpack.c.bf16 %v3428_v49, %v8366_v52  ;;  %5110 = vmatprep.subr.bf16.mxu1 %v7593_v48  ;;  %v3229_v58 = vand.u32 4294901760, %v3094_v43  ;;  %v8370_v49 = vand.u32 4294901760, %v7448_v34  ;;  %v8372_v63 = vand.u32 4294901760, %v7496_v15  ;;  %v3086_v48 = vpop.permute.xlu0 %3085 }
 0x580   : > { %v7651_v26 = vpack.c.bf16 %v3434_v41, %v8368_v47  ;;  %v3460_v1 = vand.u32 4294901760, %v3459_v22  ;;  %5140 = vmatpush1.bf16.msra.mxu0 %v5139_v46  ;;  %v3454_v52 = vand.u32 4294901760, %v3453_v8  ;;  %v8373_v41 = vand.u32 4294901760, %v7513_v36 }
 0x581   : > { %8367 = vst [vmem:[#allocation61_spill] sm:$0xff] %v7642_v14  ;;  %v7657_v9 = vpack.c.bf16 %v3452_v10, %v8370_v49  ;;  %v7661_v56 = vpack.c.bf16 %v3458_v21, %v8372_v63  ;;  %v3478_v14 = vand.u32 4294901760, %v3477_v5  ;;  %v7669_v50 = vpack.c.bf16 %v3229_v58, %v3225_v28  ;;  %v8375_v49 = vld [vmem:[#allocation59_spill] sm:$0xff] }
 0x582   : > { %8369 = vst [vmem:[#allocation10_spill] sm:$0xff] %v7651_v26  ;;  %v7665_v47 = vpack.c.bf16 %v3482_v61, %v8373_v41  ;;  %v7667_v26 = vsub.f32 %v3094_v43, %v3229_v58  ;;  %v3466_v10 = vand.u32 4294901760, %v7596_v40  ;;  %v3494_v22 = vand.u32 4294901760, %v7601_v13  ;;  %5112 = vmatpush1.bf16.msra.mxu1 %v7608_v19 }
 0x583   : > { %8371 = vst [vmem:[#allocation12_spill] sm:$0xff] %v7657_v9  ;;  %v8376_v9 = vand.u32 4294901760, %v8375_v49  ;;  %v3093_v5 = vsel %vm389_vm4, %v3086_v48, %v7451_v23  ;;  %v8377_v61 = vand.u32 4294901760, %v7533_v37  ;;  %v5143_v43 = vpack.c.bf16 %v3460_v1, %v3448_v60  ;;  %5114 = vmatprep.subr.bf16.mxu1 %v7669_v50  ;;  %v8379_v60 = vld [vmem:[#allocation31_spill] sm:$0xff] }
 0x584   : > { %8374 = vst [vmem:[#allocation8_spill] sm:$0xff] %v7665_v47  ;;  %v3484_v8 = vand.u32 4294901760, %v3483_v4  ;;  %v3500_v28 = vand.u32 4294901760, %v7667_v26  ;;  %v3231_v58 = vand.u32 4294901760, %v3093_v5  ;;  %v3489_v40 = vsub.f32 %v7635_v17, %v3488_v35 }
 0x585   : > { %v3280_v21 = vsub.f32 %v8375_v49, %v8376_v9  ;;  %v5141_v46 = vpack.c.bf16 %v3454_v52, %v8377_v61  ;;  %v3472_v9 = vand.u32 4294901760, %v7577_v24  ;;  %v5145_v63 = vpack.c.bf16 %v3478_v14, %v3466_v10  ;;  %v8380_v24 = vld [vmem:[#allocation21_spill] sm:$0xff] }
 0x586   : > { %v8378_v41 = vand.u32 4294901760, %v7539_v29  ;;  %v7689_v23 = vsub.f32 %v3093_v5, %v3231_v58  ;;  %v3501_v37 = vsub.f32 %v7667_v26, %v3500_v28  ;;  %v7692_v4 = vpack.c.bf16 %v3500_v28, %v3488_v35 }
 0x587   : > { %5142 = vmatprep.subr.bf16.mxu0 %v5141_v46  ;;  %v3495_v48 = vsub.f32 %v7601_v13, %v3494_v22  ;;  %v3271_v1 = vand.u32 4294901760, %v8379_v60  ;;  %v3281_v52 = vand.u32 4294901760, %v3280_v21  ;;  %v8381_v61 = vand.u32 4294901760, %v8380_v24  ;;  %v8382_v60 = vld [vmem:[#allocation20_spill] sm:$0xff] }
 0x588   : > { %v7687_v47 = vpack.c.bf16 %v3231_v58, %v8378_v41  ;;  %5144 = vmatpush1.bf16.msra.mxu0 %v5143_v43  ;;  %v3506_v29 = vand.u32 4294901760, %v7689_v23  ;;  %v5147_v10 = vpack.c.bf16 %v3484_v8, %v3472_v9  ;;  %v3490_v5 = vand.u32 4294901760, %v3489_v40  ;;  %v8384_v40 = vld [vmem:[#allocation43_spill] sm:$0xff]  ;;  %v8385_v9 = vld [vmem:[#allocation49_spill] sm:$0xff] }
 0x589   : > { %5146 = vmatprep.subr.bf16.mxu0 %v5145_v63  ;;  %v3286_v14 = vsub.f32 %v8380_v24, %v8381_v61  ;;  %v3502_v46 = vand.u32 4294901760, %v3501_v37  ;;  %v3496_v21 = vand.u32 4294901760, %v3495_v48  ;;  %v5153_v61 = vpack.c.bf16 %v7382_v39, %v8382_v60  ;;  %v8391_v39 = vld [vmem:[#allocation60_spill] sm:$0xff] }
 0x58a   : > { %5116 = vmatpush1.bf16.msra.mxu1 %v7687_v47  ;;  %v3507_v35 = vsub.f32 %v7689_v23, %v3506_v29  ;;  %v7702_v28 = vpack.c.bf16 %v3506_v29, %v3494_v22  ;;  %v8383_v8 = vmov 0.0   ;;  %v5155_v37 = vpack.c.bf16 %v8385_v9, %v8384_v40  ;;  %v8386_v22 = vld [vmem:[#allocation44_spill] sm:$0xff]  ;;  %v8390_v29 = vld [vmem:[#allocation42_spill] sm:$0xff]  ;;  %v8399_v40 = vld [vmem:[#allocation23_spill] sm:$0xff] }
 0x58b   : > { %v5149_v43 = vpack.c.bf16 %v3502_v46, %v3490_v5  ;;  %v3287_v58 = vand.u32 4294901760, %v3286_v14  ;;  %v8388_v14 = vld [vmem:[#allocation51_spill] sm:$0xff]  ;;  %v5161_v5 = vpack.c.bf16 %v7301_v38, %v8391_v39  ;;  %v8392_v46 = vld [vmem:[#allocation53_spill] sm:$0xff]  ;;  %v5173_v60 = vpack.c.bf16 %v7570_v3, %v7396_v42  ;;  %v8403_v3 = vld [vmem:[#allocation34_spill] sm:$0xff] }
 0x58c   : > { %5148 = vmatpush1.bf16.msra.mxu0 %v5147_v10  ;;  %v3508_v63 = vand.u32 4294901760, %v3507_v35  ;;  %v8393_v35 = vld [vmem:[#allocation39_spill] sm:$0xff]  ;;  %v8396_v38 = vld [vmem:[#allocation45_spill] sm:$0xff]  ;;  %v5185_v42 = vpack.c.bf16 %v7667_v26, %v7635_v17  ;;  %v8407_v26 = vld [vmem:[#allocation54_spill] sm:$0xff] }
 0x58d   : > { %3272 = vmatmul.mubr.f32.vlgmr.msra.gmra.mrb[4].mxu1 %v3271_v1  ;;  %5150 = vmatprep.subr.bf16.mxu0 %v5149_v43  ;;  %v8387_v1 = vld [vmem:[#allocation48_spill] sm:$0xff]  ;;  %v5163_v43 = vpack.c.bf16 %v7325_v25, %v7188_v44  ;;  %v5175_v44 = vpack.c.bf16 %v7572_v20, %v7369_v16  ;;  %v5177_v25 = vpack.c.bf16 %v7618_v59, %v7448_v34  ;;  %v8401_v34 = vld [vmem:[#allocation37_spill] sm:$0xff]  ;;  %v8409_v20 = vld [vmem:[#allocation35_spill] sm:$0xff] }
 0x58e   : > { %3282 = vmatprep.mubr.f32.mxu1 %v3281_v52  ;;  %v5151_v41 = vpack.c.bf16 %v3508_v63, %v3496_v21  ;;  %v5157_v48 = vpack.c.bf16 %v7247_v11, %v8387_v1  ;;  %v8389_v52 = vld [vmem:[#allocation40_spill] sm:$0xff]  ;;  %v8394_v11 = vld [vmem:[#allocation22_spill] sm:$0xff]  ;;  %v5167_v21 = vpack.c.bf16 %v7352_v55, %v7215_v7  ;;  %v8395_v63 = vld [vmem:[#allocation13_spill] sm:$0xff]  ;;  %v5179_v7 = vpack.c.bf16 %v7620_v45, %v7496_v15 }
 0x58f   : > { %v5159_v10 = vpack.c.bf16 %v8390_v29, %v8389_v52  ;;  %v5183_v55 = vpack.c.bf16 %v7555_v27, %v7513_v36  ;;  %v5187_v16 = vpack.c.bf16 %v7689_v23, %v7601_v13  ;;  %v8402_v15 = vld [vmem:[#allocation55_spill] sm:$0xff]  ;;  %v8406_v36 = vld [vmem:[#allocation46_spill] sm:$0xff]  ;;  %v8410_v13 = vand.u32 4294901760, %v8375_v49  ;;  %v8411_v59 = vld [vmem:[#allocation33_spill] sm:$0xff] }
 0x590   : > { %5152 = vmatpush1.bf16.msra.mxu0 %v5151_v41  ;;  %v8397_v41 = vpack.c.bf16 %v8395_v63, %v8396_v38  ;;  %v8408_v27 = vand.u32 4294901760, %v8402_v15  ;;  %v8412_v45 = vand.u32 4294901760, %v8380_v24  ;;  %v8413_v17 = vld [vmem:[#allocation52_spill] sm:$0xff]  ;;  %v8414_v23 = vld [vmem:[#allocation38_spill] sm:$0xff]  ;;  %v8416_v1 = vld [vmem:[#allocation29_spill] sm:$0xff] }
 0x591   : > { %3288 = vmatmul.mubr.f32.gmra.mrb[6].mxu1 %v3287_v58  ;;  %5154 = vmatprep.subr.bf16.mxu0 %v5153_v61  ;;  %v5165_v58 = vpack.c.bf16 %v7340_v32, %v8394_v11  ;;  %v8398_v61 = vld [vmem:[#allocation41_spill] sm:$0xff]  ;;  %v5181_v32 = vpack.c.bf16 %v7501_v57, %v7484_v30  ;;  %v8404_v30 = vand.u32 4294901760, %v8393_v35  ;;  %v8405_v57 = vld [vmem:[#allocation58_spill] sm:$0xff]  ;;  %v8418_v52 = vld [vmem:[#allocation56_spill] sm:$0xff] }
 0x592   : > { %4241 = vmatprep.mubr.f32.mxu1 %v8383_v8  ;;  %v8400_v9 = vpack.c.bf16 %v8398_v61, %v8399_v40  ;;  %v8419_v29 = vld [vmem:[#allocation30_spill] sm:$0xff]  ;;  %v8423_v39 = vld [vmem:[#allocation12_spill] sm:$0xff] }
 0x593   : > { %3541 = vmatmul.mubr.f32.vlgmr.msra.gmra.mrb[4].mxu0 %v8386_v22  ;;  %v8428_v40 = vld [vmem:[#allocation26_spill] sm:$0xff] }
 0x594   : > { %5156 = vmatpush1.bf16.msra.mxu0 %v5155_v37  ;;  %3547 = vmatprep.mubr.f32.mxu0 %v8388_v14  ;;  %v8415_v37 = vld [vmem:[#allocation28_spill] sm:$0xff] }
 0x595   : > { %5158 = vmatprep.subr.bf16.mxu0 %v5157_v48  ;;  %v8417_v48 = vld [vmem:[#allocation50_spill] sm:$0xff] }
 0x597   : > { %3549 = vmatmul.mubr.f32.gmra.mrb[6].mxu0 %v8392_v46 }
 0x598   : > { %5160 = vmatpush1.bf16.msra.mxu0 %v5159_v10  ;;  %3693 = vmatprep.mubr.f32.mxu0 %v8393_v35  ;;  %v8421_v10 = vld [vmem:[#allocation61_spill] sm:$0xff]  ;;  %v8425_v35 = vld [vmem:[#allocation8_spill] sm:$0xff] }
 0x599   : > { %5162 = vmatprep.subr.bf16.mxu0 %v5161_v5  ;;  %v8424_v5 = vld [vmem:[#allocation57_spill] sm:$0xff] }
 0x59c   : > { %5164 = vmatpush1.bf16.msra.mxu0 %v5163_v43 }
 0x59d   : > { %5166 = vmatprep.subr.bf16.mxu0 %v5165_v58 }
 0x5a0   : > { %5168 = vmatpush1.bf16.msra.mxu0 %v5167_v21 }
 0x5a1   : > { %5170 = vmatprep.subr.bf16.mxu0 %v8397_v41 }
 0x5a4   : > { %5172 = vmatpush1.bf16.msra.mxu0 %v8400_v9 }
 0x5a5   : > { %5174 = vmatprep.subr.bf16.mxu0 %v5173_v60 }
 0x5a8   : > { %5176 = vmatpush1.bf16.msra.mxu0 %v5175_v44 }
 0x5a9   : > { %5178 = vmatprep.subr.bf16.mxu0 %v5177_v25  ;;  %v8429_v25 = vld [vmem:[#allocation27_spill] sm:$0xff] }
 0x5ac   : > { %5180 = vmatpush1.bf16.msra.mxu0 %v5179_v7 }
 0x5ad   : > { %5182 = vmatprep.subr.bf16.mxu0 %v5181_v32 }
 0x5b0   : > { %5184 = vmatpush1.bf16.msra.mxu0 %v5183_v55 }
 0x5b1   : > { %5186 = vmatprep.subr.bf16.mxu0 %v5185_v42 }
 0x5b4   : > { %5188 = vmatpush1.bf16.msra.mxu0 %v5187_v16 }
 0x5b5   : > { %5190 = vmatprep.subr.bf16.mxu0 %v8401_v34 }
 0x5b7   : > { %3696 = vmatmul.mubr.f32.vlgmr.msra.gmra.mrb[4].mxu0 %v8402_v15 }
 0x5b8   : > { %5192 = vmatpush1.bf16.msra.mxu0 %v8403_v3  ;;  %3703 = vmatprep.mubr.f32.mxu0 %v8375_v49  ;;  %v8420_v49 = vld [vmem:[#allocation47_spill] sm:$0xff] }
 0x5b9   : > { %5194 = vmatprep.subr.bf16.mxu0 %v7404_v51 }
 0x5bb   : > { %3706 = vmatmul.mubr.f32.gmra.mrb[6].mxu0 %v8380_v24  ;;  %v8422_v24 = vld [vmem:[#allocation10_spill] sm:$0xff] }
 0x5bc   : > { %5196 = vmatpush1.bf16.msra.mxu0 %v7335_v53  ;;  %3815 = vmatprep.mubr.f32.mxu0 %v8404_v30 }
 0x5bd   : > { %5198 = vmatprep.subr.bf16.mxu0 %v7422_v33 }
 0x5c0   : > { %5200 = vmatpush1.bf16.msra.mxu0 %v7463_v12 }
 0x5c1   : > { %5202 = vmatprep.subr.bf16.mxu0 %v7473_v2 }
 0x5c4   : > { %5204 = vmatpush1.bf16.msra.mxu0 %v7508_v0 }
 0x5c5   : > { %5206 = vmatprep.subr.bf16.mxu0 %v6953_v6 }
 0x5c8   : > { %5208 = vmatpush1.bf16.msra.mxu0 %v6961_v62 }
 0x5c9   : > { %5210 = vmatprep.subr.bf16.mxu0 %v7585_v18 }
 0x5cc   : > { %5212 = vmatpush1.bf16.msra.mxu0 %v7568_v54 }
 0x5cd   : > { %5214 = vmatprep.subr.bf16.mxu0 %v8405_v57 }
 0x5d0   : > { %5216 = vmatpush1.bf16.msra.mxu0 %v7616_v31 }
 0x5d1   : > { %5218 = vmatprep.subr.bf16.mxu0 %v8406_v36 }
 0x5d4   : > { %5220 = vmatpush1.bf16.msra.mxu0 %v7608_v19 }
 0x5d5   : > { %5222 = vmatprep.subr.bf16.mxu0 %v7669_v50 }
 0x5d8   : > { %5224 = vmatpush1.bf16.msra.mxu0 %v7687_v47 }
 0x5d9   : > { %5226 = vmatprep.subr.bf16.mxu0 %v8407_v26 }
 0x5db   : > { %3819 = vmatmul.mubr.f32.vlgmr.msra.gmra.mrb[4].mxu0 %v8408_v27 }
 0x5dc   : > { %5228 = vmatpush1.bf16.msra.mxu0 %v8409_v20  ;;  %3827 = vmatprep.mubr.f32.mxu0 %v8410_v13 }
 0x5dd   : > { %5230 = vmatprep.subr.bf16.mxu0 %v8411_v59 }
 0x5df   : > { %3831 = vmatmul.mubr.f32.gmra.mrb[6].mxu0 %v8412_v45 }
 0x5e0   : > { %5232 = vmatpush1.bf16.msra.mxu0 %v8413_v17  ;;  %4010 = vmatprep.mubr.f32.mxu0 %v8414_v23 }
 0x5e1   : > { %5234 = vmatprep.subr.bf16.mxu0 %v8415_v37 }
 0x5e4   : > { %5236 = vmatpush1.bf16.msra.mxu0 %v8416_v1 }
 0x5e5   : > { %5238 = vmatprep.subr.bf16.mxu0 %v8417_v48 }
 0x5e8   : > { %5240 = vmatpush1.bf16.msra.mxu0 %v8418_v52 }
 0x5e9   : > { %5242 = vmatprep.subr.bf16.mxu0 %v8419_v29 }
 0x5ec   : > { %5244 = vmatpush1.bf16.msra.mxu0 %v8420_v49 }
 0x5ed   : > { %5246 = vmatprep.subr.bf16.mxu0 %v8421_v10 }
 0x5f0   : > { %5248 = vmatpush1.bf16.msra.mxu0 %v8422_v24 }
 0x5f1   : > { %5250 = vmatprep.subr.bf16.mxu0 %v8423_v39 }
 0x5f4   : > { %5252 = vmatpush1.bf16.msra.mxu0 %v7661_v56 }
 0x5f5   : > { %5254 = vmatprep.subr.bf16.mxu0 %v8424_v5 }
 0x5f8   : > { %5256 = vmatpush1.bf16.msra.mxu0 %v8425_v35 }
 0x5f9   : > { %5258 = vmatprep.subr.bf16.mxu0 %v7692_v4 }
 0x5fc   : > { %5260 = vmatpush1.bf16.msra.mxu0 %v7702_v28  ;;  %v8426_v28 = vld [vmem:[#allocation24_spill] sm:$0xff] }
 0x5fd   : > { %5262 = vmatprep.subr.bf16.mxu0 %v8401_v34 }
 0x5ff   : > { %4012 = vmatmul.mubr.f32.vlgmr.msra.gmra.mrb[4].mxu0 %v8386_v22 }
 0x600   : > { %5264 = vmatpush1.bf16.msra.mxu0 %v8403_v3  ;;  %4018 = vmatprep.mubr.f32.mxu0 %v8388_v14 }
 0x601   : > { %5266 = vmatprep.subr.bf16.mxu0 %v7404_v51  ;;  %v4159_v51 = vld [vmem:[%s7855_s7] sm:$0x1] }
 0x603   : > { %4020 = vmatmul.mubr.f32.gmra.mrb[6].mxu0 %v8392_v46 }
 0x604   : > { %5268 = vmatpush1.bf16.msra.mxu0 %v7335_v53  ;;  %4127 = vmatprep.mubr.f32.mxu0 %v8414_v23 }
 0x605   : > { %5270 = vmatprep.subr.bf16.mxu0 %v7422_v33  ;;  %v3148_v33 = vpop.permute.xlu1 %3147 }
 0x608   : > { %5272 = vmatpush1.bf16.msra.mxu0 %v7463_v12  ;;  %v4171_v12 = vsel %vm425_vm10, %v4159_v51, 0 }
 0x609   : > { %5274 = vmatprep.subr.bf16.mxu0 %v7473_v2  ;;  %v7824_v56 = vand.u32 4294901760, %v4171_v12 }
 0x60b   : > { %v4243_v38 = vsub.f32 %v4171_v12, %v7824_v56  ;;  %v8430_v12 = vlaneseq }
 0x60c   : > { %5276 = vmatpush1.bf16.msra.mxu0 %v7508_v0 }
 0x60d   : > { %5278 = vmatprep.subr.bf16.mxu0 %v6953_v6  ;;  %v4244_v16 = vand.u32 4294901760, %v4243_v38  ;;  %vm4696_vm8 = vcmp.lt.s32.totalorder %v8430_v12, 256 }
 0x60f   : > { %v4245_v20 = vsub.f32 %v4243_v38, %v4244_v16 }
 0x610   : > { %5280 = vmatpush1.bf16.msra.mxu0 %v6961_v62 }
 0x611   : > { %5282 = vmatprep.subr.bf16.mxu0 %v7585_v18  ;;  %v4246_v52 = vand.u32 4294901760, %v4245_v20 }
 0x614   : > { %5284 = vmatpush1.bf16.msra.mxu0 %v7568_v54 }
 0x615   : > { %5286 = vmatprep.subr.bf16.mxu0 %v8405_v57 }
 0x618   : > { %5288 = vmatpush1.bf16.msra.mxu0 %v7616_v31 }
 0x619   : > { %5290 = vmatprep.subr.bf16.mxu0 %v8406_v36 }
 0x61c   : > { %5292 = vmatpush1.bf16.msra.mxu0 %v7608_v19 }
 0x61d   : > { %5294 = vmatprep.subr.bf16.mxu0 %v7669_v50 }
 0x620   : > { %5296 = vmatpush1.bf16.msra.mxu0 %v7687_v47  ;;  %v3153_v47 = vpop.permute.xlu0 %3152 }
 0x623   : > { %4129 = vmatmul.mubr.f32.vlgmr.msra.gmra.mrb[4].mxu0 %v8386_v22 }
 0x624   : > { %4135 = vmatprep.mubr.f32.mxu0 %v8388_v14 }
 0x627   : > { %4137 = vmatmul.mubr.f32.gmra.mrb[6].mxu0 %v8392_v46  ;;  %v8427_v46 = vld [vmem:[#allocation25_spill] sm:$0xff] }
 0x660   : > { %v3273_v6 = vpop.f32.mrb[4].mxu1 }
 0x661   : > { %v3275_v62 = vpop.f32.mrb[5].mxu1  ;;  %v3274_v0 = vadd.f32 %v3273_v6, %v3148_v33 }
 0x662   : > { %v3276_v31 = vadd.f32 %v3275_v62, %v3148_v33 }
 0x664   : > { %v3289_v2 = vpop.f32.mrb[6].mxu1 }
 0x665   : > { %v3291_v53 = vpop.f32.mrb[7].mxu1  ;;  %v3290_v4 = vadd.f32 %v3289_v2, %v3153_v47 }
 0x666   : > { %v3292_v14 = vadd.f32 %v3291_v53, %v3153_v47 }
 0x6f6   : > { %v4130_v54 = vpop.f32.mrb[4].mxu0 }
 0x6f7   : > { %v5330_v18 = vadd.f32 %v4130_v54, %v3274_v0  ;;  %v4132_v19 = vpop.f32.mrb[5].mxu0  ;;  %v4167_v0 = vshrl.u32 %v8430_v12, 7  ;;  %v4164_v54 = vpop.permute.xlu1 %4163 }
 0x6f8   : > { %v5332_v50 = vadd.f32 %v4132_v19, %v3276_v31 }
 0x6f9   : > { %v4143_v22 = vadd.f32 %v5330_v18, %v8426_v28  ;;  %v4168_v31 = vsub.s32 0, %v4167_v0 }
 0x6fa   : > { %v4144_v43 = vadd.f32 %v5332_v50, %v8427_v46  ;;  %v4138_v11 = vpop.f32.mrb[6].mxu0 }
 0x6fb   : > { %vm4147_vm4 = vcmp.ge.f32.partialorder %v4143_v22, 0.0  ;;  %v4151_v58 = vmul.f32 0.01, %v4143_v22  ;;  %v5334_v21 = vadd.f32 %v4138_v11, %v3290_v4  ;;  %v4140_v63 = vpop.f32.mrb[7].mxu0  ;;  %v4169_v18 = vrot.slane %v4164_v54, %v4168_v31 }
 0x6fc   : > { %vm4148_vm5 = vcmp.ge.f32.partialorder %v4144_v43, 0.0  ;;  %v4152_v41 = vmul.f32 0.01, %v4144_v43  ;;  %v5336_v60 = vadd.f32 %v4140_v63, %v3292_v14 }
 0x6fd   : > { %v4155_v61 = vsel %vm4147_vm4, %v4143_v22, %v4151_v58  ;;  %v4145_v9 = vadd.f32 %v5334_v21, %v8428_v40 }
 0x6fe   : > { %v4175_v44 = vand.u32 4294901760, %v4155_v61  ;;  %v4146_v7 = vadd.f32 %v5336_v60, %v8429_v25  ;;  %v4156_v32 = vsel %vm4148_vm5, %v4144_v43, %v4152_v41 }
 0x6ff   : > { %vm4149_vm6 = vcmp.ge.f32.partialorder %v4145_v9, 0.0  ;;  %v4153_v55 = vmul.f32 0.01, %v4145_v9  ;;  %v4173_v42 = vand.u32 4294901760, %v4156_v32 }
 0x700   : > { %v4260_v34 = vsub.f32 %v4155_v61, %v4175_v44  ;;  %vm4150_vm7 = vcmp.ge.f32.partialorder %v4146_v7, 0.0  ;;  %v4154_v15 = vmul.f32 0.01, %v4146_v7 }
 0x701   : > { %v4157_v3 = vsel %vm4149_vm6, %v4145_v9, %v4153_v55  ;;  %v4254_v30 = vsub.f32 %v4156_v32, %v4173_v42 }
 0x702   : > { %v4179_v57 = vand.u32 4294901760, %v4157_v3  ;;  %v4158_v36 = vsel %vm4150_vm7, %v4146_v7, %v4154_v15  ;;  %v4261_v26 = vand.u32 4294901760, %v4260_v34 }
 0x703   : > { %v4177_v27 = vand.u32 4294901760, %v4158_v36  ;;  %v4255_v13 = vand.u32 4294901760, %v4254_v30 }
 0x704   : > { %v4272_v59 = vsub.f32 %v4157_v3, %v4179_v57  ;;  %v5299_v45 = vpack.c.bf16 %v4179_v57, %v4175_v44  ;;  %v4262_v37 = vsub.f32 %v4260_v34, %v4261_v26 }
 0x705   : > { %v5297_v17 = vpack.c.bf16 %v4177_v27, %v4173_v42  ;;  %v4266_v23 = vsub.f32 %v4158_v36, %v4177_v27  ;;  %v4256_v29 = vsub.f32 %v4254_v30, %v4255_v13 }
 0x706   : > { %v4273_v1 = vand.u32 4294901760, %v4272_v59  ;;  %v5307_v48 = vpack.c.bf16 %v4272_v59, %v4260_v34  ;;  %v4263_v6 = vand.u32 4294901760, %v4262_v37 }
 0x707   : > { %5298 = vmatprep.subr.bf16.mxu1 %v5297_v17  ;;  %v4267_v49 = vand.u32 4294901760, %v4266_v23  ;;  %v5305_v10 = vpack.c.bf16 %v4266_v23, %v4254_v30  ;;  %v4257_v2 = vand.u32 4294901760, %v4256_v29 }
 0x708   : > { %5300 = vmatpush1.bf16.msra.mxu1 %v5299_v45  ;;  %v4274_v24 = vsub.f32 %v4272_v59, %v4273_v1  ;;  %v5315_v39 = vpack.c.bf16 %v4273_v1, %v4261_v26 }
 0x709   : > { %v4268_v5 = vsub.f32 %v4266_v23, %v4267_v49  ;;  %v5313_v35 = vpack.c.bf16 %v4267_v49, %v4255_v13 }
 0x70a   : > { %v4275_v62 = vand.u32 4294901760, %v4274_v24 }
 0x70b   : > { %4247 = vmatmul.mubr.f32.vlgmr.msra.gmra.mrb[8].mxu1 %v4246_v52  ;;  %v4269_v53 = vand.u32 4294901760, %v4268_v5 }
 0x70c   : > { %v5303_v51 = vpack.c.bf16 %v4275_v62, %v4263_v6  ;;  %4337 = vmatprep.mubr.f32.mxu1 %v8383_v8 }
 0x70d   : > { %v5301_v33 = vpack.c.bf16 %v4269_v53, %v4257_v2 }
 0x70f   : > { %5302 = vmatprep.subr.bf16.mxu1 %v5301_v33 }
 0x710   : > { %5304 = vmatpush1.bf16.msra.mxu1 %v5303_v51 }
 0x711   : > { %5306 = vmatprep.subr.bf16.mxu1 %v5305_v10 }
 0x713   : > { %4339 = vmatmul.mubr.f32.vlgmr.msra.gmra.mrb[8].mxu1 %v7824_v56 }
 0x714   : > { %5308 = vmatpush1.bf16.msra.mxu1 %v5307_v48  ;;  %4417 = vmatprep.mubr.f32.mxu1 %v8383_v8 }
 0x715   : > { %5310 = vmatprep.subr.bf16.mxu1 %v5297_v17 }
 0x71b   : > { %4420 = vmatmul.mubr.f32.vlgmr.msra.gmra.mrb[8].mxu1 %v4243_v38 }
 0x71c   : > { %5312 = vmatpush1.bf16.msra.mxu1 %v5299_v45  ;;  %4494 = vmatprep.mubr.f32.mxu1 %v8383_v8 }
 0x71d   : > { %5314 = vmatprep.subr.bf16.mxu1 %v5313_v35 }
 0x723   : > { %4498 = vmatmul.mubr.f32.vlgmr.msra.gmra.mrb[8].mxu1 %v4244_v16 }
 0x724   : > { %5316 = vmatpush1.bf16.msra.mxu1 %v5315_v39  ;;  %4580 = vmatprep.mubr.f32.mxu1 %v8383_v8 }
 0x725   : > { %5318 = vmatprep.subr.bf16.mxu1 %v5297_v17 }
 0x72b   : > { %4582 = vmatmul.mubr.f32.vlgmr.msra.gmra.mrb[8].mxu1 %v7824_v56 }
 0x72c   : > { %5320 = vmatpush1.bf16.msra.mxu1 %v5299_v45  ;;  %4656 = vmatprep.mubr.f32.mxu1 %v8383_v8 }
 0x733   : > { %4658 = vmatmul.mubr.f32.vlgmr.msra.gmra.mrb[8].mxu1 %v7824_v56  ;;  %v5502_v56 = vmov 1966171168  }
 0x734   : > { %v4680_v11 = vunpack.c.l.s4 %v5502_v56 }
 0x736   : > { %v4681_v58 = vunpack.c.0.s8 %v4680_v11 }
 0x738   : > { %v4684_v63 = vsub.s32 %v4681_v58, %v4167_v0 }
 0x806   : > { %v4659_v19 = vpop.f32.mrb[8].mxu1 }
 0x807   : > { %v5337_v47 = vadd.f32 %v4659_v19, %v4169_v18  ;;  %v4661_v50 = vpop.f32.mrb[9].mxu1 }
 0x808   : > { %v5338_v4 = vadd.f32 %v4661_v50, %v4169_v18 }
 0x809   : > { %v4764_v28 = vmul.f32 -1.442695, %v5337_v47 }
 0x80a   : > { %v4765_v22 = vmul.f32 -1.442695, %v5338_v4 }
 0x80b   : > { %5476 = vpow2.f32 %v4764_v28 }
 0x80c   : > { %5478 = vpow2.f32 %v4765_v22 }
 0x815   : > { %v5477_v14 = vpop.eup %5476 }
 0x816   : > { %v5479_v46 = vpop.eup %5478  ;;  %v4670_v43 = vadd.f32 1.0, %v5477_v14 }
 0x817   : > { %v4671_v8 = vadd.f32 1.0, %v5479_v46 }
 0x818   : > { %5480 = vrcp.f32 %v4670_v43 }
 0x819   : > { %5482 = vrcp.f32 %v4671_v8 }
 0x822   : > { %v5481_v21 = vpop.eup %5480 }
 0x823   : > { %v5483_v38 = vpop.eup %5482 }
 0x824   : > { %v4678_v41 = vcombine.low %v5481_v21, %v5483_v38 }
 0x826   : > { %v4685_v60 = vrot.slane %v4678_v41, %v4684_v63 }
 0x828   : > { %v4692_v61 = vrot.slane %v4685_v60, %v4684_v63 }
 0x82a   : > { %4698 = vst.msk [vmem:[%s332_s29] sm:$0x3] %vm4696_vm8, %v4692_v61 }
 0x82b PF: > { %s21_s11 = sadd.s32 1, %s5490_s11  }
 0x82c   : > { %p18_p4 = scmp.ge.s32.totalorder %s21_s11, 4  }
 0x82e   :  { %20 = sbr.rel (!%p18_p4) target bundleno = 3 (0x3), region = 86 }

</bundles_post_ra>
